<compile_context>
chip_gen: v6e
topology: v6e:2x2x1
jax: 0.10.0
libtpu: 0.0.40
codegen_flags: <defaults>
</compile_context>

<pallas_src>
import jax
import jax.numpy as jnp
from jax.experimental import pallas as pl
from jax.experimental.pallas import tpu as pltpu


def _relu(v):
    return jnp.maximum(v, 0.0)


# -----------------------------------------------------------------------------
# Layout helper: zero-pad H/W by 1 and split into stride-phases so every 3x3
# tap becomes a *contiguous, stride-1* window of one phase plane:
#   out[n, py*s+px, i, j, c] == pad(x)[n, i*s+py, j*s+px, c]
# For stride 1 this is simply pad(x)[:, None].
# -----------------------------------------------------------------------------
def _pad_phase_split(x_nhwc, stride, pad=1):
    N, H, W, C = x_nhwc.shape
    xp = jnp.pad(x_nhwc, ((0, 0), (pad, pad), (pad, pad), (0, 0)))
    Hp, Wp = H + 2 * pad, W + 2 * pad
    assert Hp % stride == 0 and Wp % stride == 0, (
        "padded spatial dims must be divisible by the conv stride")
    Hq, Wq = Hp // stride, Wp // stride
    ph = xp.reshape(N, Hq, stride, Wq, stride, C)
    ph = ph.transpose(0, 2, 4, 1, 3, 5)            # (N, sy, sx, Hq, Wq, C)
    return ph.reshape(N, stride * stride, Hq, Wq, C)


def _pick_batch_tile(N, per_image_bytes, fixed_bytes, budget=20 * 1024 * 1024):
    """Largest divisor of N whose VMEM estimate fits the budget; prefer >= 2
    grid steps so the parallel grid axis can shard across v7x's 2 TCs."""
    divisors = [d for d in range(1, N + 1) if N % d == 0]
    fitting = [d for d in divisors if fixed_bytes + d * per_image_bytes <= budget]
    if not fitting:
        return 1
    tb = fitting[-1]
    if tb == N and N > 1 and len(fitting) > 1:
        tb = fitting[-2]
    return tb


# -----------------------------------------------------------------------------
# Fused 3x3 conv kernel:
#   optional prologue  : per-channel scale/bias + activation + pad-ring mask
#   body               : 9 accumulated tap GEMMs (f32 accumulator, MXU)
#   optional epilogue  : per-channel scale/bias, activation, residual add
#   optional 2nd output: fused 1x1 strided shortcut conv on the activated input
# Grid is over batch tiles only; every operand is read from HBM exactly once.
# -----------------------------------------------------------------------------
def _fused_conv3x3(
    x_ph,                    # (N, s*s, Hq, Wq, Cin)  padded + phase-split
    w_taps,                  # (9, Cin, Cout)         tap-major (dy*3 + dx)
    *,
    stride,
    out_hw,                  # (Ho, Wo)
    act_fn,
    pre_scale=None, pre_bias=None, pre_mask=None,      # BN1 + act prologue
    post_scale=None, post_bias=None, post_act=False,   # BN2 + act epilogue
    residual=None,                                     # (N, Ho, Wo, Cout) f32
    shortcut_w=None,                                   # (Cin, Cout)
    out_dtype=jnp.float32,
    interpret=False,
):
    N, P, Hq, Wq, Cin = x_ph.shape
    Cout = w_taps.shape[-1]
    Ho, Wo = out_hw
    s = stride
    assert P == s * s and w_taps.shape[0] == 9 and w_taps.shape[1] == Cin

    has_pre = pre_scale is not None
    has_post = post_scale is not None
    has_res = residual is not None
    has_sc = shortcut_w is not None
    cdt = x_ph.dtype

    # ---- batch tile under a conservative VMEM budget ------------------------
    it_x = jnp.dtype(cdt).itemsize
    it_o = jnp.dtype(out_dtype).itemsize
    fixed = 2 * int(w_taps.size) * jnp.dtype(w_taps.dtype).itemsize
    if has_sc:
        fixed += 2 * int(shortcut_w.size) * jnp.dtype(shortcut_w.dtype).itemsize
    per_img = 2 * P * Hq * Wq * Cin * it_x          # x block (double buffered)
    per_img += 2 * Ho * Wo * Cout * it_o            # out block
    if has_res:
        per_img += 2 * Ho * Wo * Cout * 4
    if has_sc:
        per_img += 2 * Ho * Wo * Cout * 4
    per_img += Ho * Wo * Cout * 4 + Ho * Wo * Cin * it_x   # acc + tap scratch
    tb = _pick_batch_tile(N, per_img, fixed)
    M = tb * Ho * Wo

    def kernel(*refs):
        it = iter(refs)
        x_ref = next(it)
        w_ref = next(it)
        ps_ref = next(it) if has_pre else None
        pb_ref = next(it) if has_pre else None
        pm_ref = next(it) if has_pre else None
        qs_ref = next(it) if has_post else None
        qb_ref = next(it) if has_post else None
        r_ref = next(it) if has_res else None
        wsc_ref = next(it) if has_sc else None
        o_ref = next(it)
        sc_ref = next(it) if has_sc else None

        a = x_ref[...]                                   # (tb, P, Hq, Wq, Cin)
        if has_pre:
            af = a.astype(jnp.float32) * ps_ref[...] + pb_ref[...]
            a = (act_fn(af) * pm_ref[...]).astype(cdt)   # zero the pad ring

        # 9 accumulated tap GEMMs (VMEM-level im2col, nothing re-read from HBM)
        acc = jnp.zeros((M, Cout), jnp.float32)
        for dy in range(3):
            qy = dy // s
            for dx in range(3):
                qx = dx // s
                p = (dy % s) * s + (dx % s)
                at = a[:, p, qy:qy + Ho, qx:qx + Wo, :].reshape(M, Cin)
                acc = acc + jnp.dot(at, w_ref[dy * 3 + dx],
                                    preferred_element_type=jnp.float32)

        y = acc
        if has_post:
            y = y * qs_ref[...] + qb_ref[...]
        if post_act:
            y = act_fn(y)
        if has_res:
            y = y + r_ref[...].reshape(M, Cout).astype(jnp.float32)
        o_ref[...] = y.reshape(tb, Ho, Wo, Cout).astype(o_ref.dtype)

        if has_sc:                                   # fused 1x1 strided shortcut
            p = (1 % s) * s + (1 % s)
            off = 1 // s
            asc = a[:, p, off:off + Ho, off:off + Wo, :].reshape(M, Cin)
            rsc = jnp.dot(asc, wsc_ref[...], preferred_element_type=jnp.float32)
            sc_ref[...] = rsc.reshape(tb, Ho, Wo, Cout).astype(sc_ref.dtype)

    in_specs = [
        pl.BlockSpec((tb, P, Hq, Wq, Cin), lambda i: (i, 0, 0, 0, 0)),
        pl.BlockSpec((9, Cin, Cout), lambda i: (0, 0, 0)),
    ]
    args = [x_ph, w_taps]
    if has_pre:
        in_specs += [pl.BlockSpec((1, Cin), lambda i: (0, 0)),
                     pl.BlockSpec((1, Cin), lambda i: (0, 0)),
                     pl.BlockSpec((1, P, Hq, Wq, 1), lambda i: (0, 0, 0, 0, 0))]
        args += [pre_scale.reshape(1, Cin).astype(jnp.float32),
                 pre_bias.reshape(1, Cin).astype(jnp.float32),
                 pre_mask.astype(jnp.float32)]
    if has_post:
        in_specs += [pl.BlockSpec((1, Cout), lambda i: (0, 0)),
                     pl.BlockSpec((1, Cout), lambda i: (0, 0))]
        args += [post_scale.reshape(1, Cout).astype(jnp.float32),
                 post_bias.reshape(1, Cout).astype(jnp.float32)]
    if has_res:
        in_specs += [pl.BlockSpec((tb, Ho, Wo, Cout), lambda i: (i, 0, 0, 0))]
        args += [residual.astype(jnp.float32)]
    if has_sc:
        in_specs += [pl.BlockSpec((Cin, Cout), lambda i: (0, 0))]
        args += [shortcut_w]

    out_shapes = [jax.ShapeDtypeStruct((N, Ho, Wo, Cout), out_dtype)]
    out_specs = [pl.BlockSpec((tb, Ho, Wo, Cout), lambda i: (i, 0, 0, 0))]
    if has_sc:
        out_shapes.append(jax.ShapeDtypeStruct((N, Ho, Wo, Cout), jnp.float32))
        out_specs.append(pl.BlockSpec((tb, Ho, Wo, Cout), lambda i: (i, 0, 0, 0)))

    flops = 2 * N * Ho * Wo * 9 * Cin * Cout
    if has_sc:
        flops += 2 * N * Ho * Wo * Cin * Cout
    bytes_accessed = sum(int(a.size) * jnp.dtype(a.dtype).itemsize for a in args)
    for sds in out_shapes:
        n_el = 1
        for d in sds.shape:
            n_el *= d
        bytes_accessed += n_el * jnp.dtype(sds.dtype).itemsize

    return pl.pallas_call(
        kernel,
        out_shape=tuple(out_shapes),
        grid_spec=pltpu.PrefetchScalarGridSpec(
            num_scalar_prefetch=0,
            grid=(N // tb,),
            in_specs=in_specs,
            out_specs=tuple(out_specs),
        ),
        compiler_params=pltpu.CompilerParams(dimension_semantics=("parallel",)),
        cost_estimate=pl.CostEstimate(flops=int(flops), transcendentals=0,
                                      bytes_accessed=int(bytes_accessed)),
        interpret=interpret,
    )(*args)


# -----------------------------------------------------------------------------
# PAF_BasicBlock forward (inference).  NHWC core + NCHW wrapper.
# -----------------------------------------------------------------------------
def paf_basic_block_forward_nhwc(x_nhwc, params, *, stride=1, eps=1e-5,
                                 act_fn=_relu, compute_dtype=jnp.bfloat16,
                                 interpret=False):
    N, H, W, Cin = x_nhwc.shape
    conv1_w = params["conv1_w"]                      # (Cout, Cin, 3, 3) OIHW
    Cout = conv1_w.shape[0]
    equal_in_out = (Cin == Cout)
    if equal_in_out:
        assert stride == 1, "identity shortcut requires stride == 1"
    else:
        assert "shortcut_w" in params, "non-equal in/out planes need shortcut_w"

    Ho = (H + 2 - 3) // stride + 1
    Wo = (W + 2 - 3) // stride + 1

    # Folded (inference) BatchNorm affine parameters.
    s1 = params["bn1_gamma"] * jax.lax.rsqrt(params["bn1_var"] + eps)
    b1 = params["bn1_beta"] - params["bn1_mean"] * s1
    s2 = params["bn2_gamma"] * jax.lax.rsqrt(params["bn2_var"] + eps)
    b2 = params["bn2_beta"] - params["bn2_mean"] * s2

    # Conv weights as tap-major GEMM operands (9, Cin, Cout), MXU dtype.
    w1 = jnp.transpose(conv1_w, (2, 3, 1, 0)).reshape(9, Cin, Cout).astype(compute_dtype)
    w2 = jnp.transpose(params["conv2_w"], (2, 3, 1, 0)).reshape(9, Cout, Cout).astype(compute_dtype)
    wsc = None
    if not equal_in_out:
        wsc = jnp.transpose(params["shortcut_w"][:, :, 0, 0], (1, 0)).astype(compute_dtype)

    # Padded + phase-split input (one fused XLA pass: pad + reshape + cast) and
    # the pad-ring mask (BN bias must not leak into the zero padding).
    x_ph = _pad_phase_split(x_nhwc, stride).astype(compute_dtype)
    mask = _pad_phase_split(jnp.ones((1, H, W, 1), jnp.float32), stride)

    # conv1: act(bn1(x)) prologue -> 3x3/stride conv -> act(bn2(.)) epilogue,
    # with the 1x1 strided shortcut conv (if any) fused in as a second output.
    outs = _fused_conv3x3(
        x_ph, w1, stride=stride, out_hw=(Ho, Wo), act_fn=act_fn,
        pre_scale=s1, pre_bias=b1, pre_mask=mask,
        post_scale=s2, post_bias=b2, post_act=True,
        shortcut_w=wsc, out_dtype=compute_dtype, interpret=interpret)
    a2 = outs[0]
    residual = x_nhwc.astype(jnp.float32) if equal_in_out else outs[1]

    # TODO(synk): F.dropout (dropRate > 0, training mode) is not implemented;
    # the module defaults to dropRate=0.0 and this is the inference path.

    # conv2: 3x3 / stride 1 with the residual add fused into the epilogue.
    a2_ph = jnp.pad(a2, ((0, 0), (1, 1), (1, 1), (0, 0)))[:, None]
    (out,) = _fused_conv3x3(
        a2_ph, w2, stride=1, out_hw=(Ho, Wo), act_fn=act_fn,
        residual=residual, out_dtype=x_nhwc.dtype, interpret=interpret)
    return out                                            # (N, Ho, Wo, Cout)


def paf_basic_block_forward(x_nchw, params, *, stride=1, eps=1e-5, act_fn=_relu,
                            compute_dtype=jnp.bfloat16, interpret=False):
    # NCHW interface matching the PyTorch module.  A full WRN built from these
    # blocks should chain the NHWC entry point and skip these two transposes.
    x = jnp.transpose(x_nchw, (0, 2, 3, 1))
    out = paf_basic_block_forward_nhwc(
        x, params, stride=stride, eps=eps, act_fn=act_fn,
        compute_dtype=compute_dtype, interpret=interpret)
    return jnp.transpose(out, (0, 3, 1, 2))


# -----------------------------------------------------------------------------
# Pure-JAX reference (lax conv) for correctness checking
# -----------------------------------------------------------------------------
def _ref_forward(x, params, *, stride=1, eps=1e-5):
    def bn(v, g, b, m, var):
        inv = 1.0 / jnp.sqrt(var + eps)
        return ((v - m[None, :, None, None]) * (g * inv)[None, :, None, None]
                + b[None, :, None, None])

    def conv(v, w, s, pad):
        return jax.lax.conv_general_dilated(
            v, w, window_strides=(s, s), padding=[(pad, pad), (pad, pad)],
            dimension_numbers=("NCHW", "OIHW", "NCHW"))

    Cin = x.shape[1]
    Cout = params["conv1_w"].shape[0]
    equal = Cin == Cout

    a1 = _relu(bn(x, params["bn1_gamma"], params["bn1_beta"],
                  params["bn1_mean"], params["bn1_var"]))
    o = conv(a1, params["conv1_w"], stride, 1)
    o = _relu(bn(o, params["bn2_gamma"], params["bn2_beta"],
                 params["bn2_mean"], params["bn2_var"]))
    o = conv(o, params["conv2_w"], 1, 1)
    res = x if equal else conv(a1, params["shortcut_w"], stride, 0)
    return res + o


if __name__ == "__main__":
    key = jax.random.PRNGKey(0)

    def make_params(k, cin, cout, shortcut):
        ks = jax.random.split(k, 11)
        p = {
            "bn1_gamma": 1.0 + 0.1 * jax.random.normal(ks[0], (cin,)),
            "bn1_beta": 0.1 * jax.random.normal(ks[1], (cin,)),
            "bn1_mean": 0.1 * jax.random.normal(ks[2], (cin,)),
            "bn1_var": jax.random.uniform(ks[3], (cin,), minval=0.5, maxval=1.5),
            "conv1_w": 0.1 * jax.random.normal(ks[4], (cout, cin, 3, 3)),
            "bn2_gamma": 1.0 + 0.1 * jax.random.normal(ks[5], (cout,)),
            "bn2_beta": 0.1 * jax.random.normal(ks[6], (cout,)),
            "bn2_mean": 0.1 * jax.random.normal(ks[7], (cout,)),
            "bn2_var": jax.random.uniform(ks[8], (cout,), minval=0.5, maxval=1.5),
            "conv2_w": 0.1 * jax.random.normal(ks[9], (cout, cout, 3, 3)),
        }
        if shortcut:
            p["shortcut_w"] = 0.1 * jax.random.normal(ks[10], (cout, cin, 1, 1))
        return p

    kx, kp1, kp2 = jax.random.split(key, 3)
    x = jax.random.normal(kx, (2, 4, 16, 16), dtype=jnp.float32)

    # Case 1: equalInOut (4->4, stride 1), exact f32 compute path.
    p1 = make_params(kp1, 4, 4, shortcut=False)
    out1 = jax.block_until_ready(
        paf_basic_block_forward(x, p1, stride=1, compute_dtype=jnp.float32))
    ref1 = _ref_forward(x, p1, stride=1)
    assert out1.shape == (2, 4, 16, 16), out1.shape
    assert jnp.allclose(out1, ref1, atol=1e-4, rtol=1e-4), \
        float(jnp.max(jnp.abs(out1 - ref1)))

    # Case 2: not equalInOut (4->8, stride 2) with 1x1-conv shortcut, f32 path.
    p2 = make_params(kp2, 4, 8, shortcut=True)
    out2 = jax.block_until_ready(
        paf_basic_block_forward(x, p2, stride=2, compute_dtype=jnp.float32))
    ref2 = _ref_forward(x, p2, stride=2)
    assert out2.shape == (2, 8, 8, 8), out2.shape
    assert jnp.allclose(out2, ref2, atol=1e-4, rtol=1e-4), \
        float(jnp.max(jnp.abs(out2 - ref2)))

    # Case 3: default bf16 MXU path (performance configuration), loose tolerance.
    out3 = jax.block_until_ready(paf_basic_block_forward(x, p2, stride=2))
    assert out3.shape == (2, 8, 8, 8), out3.shape
    assert jnp.allclose(out3, ref2, atol=5e-2, rtol=5e-2), \
        float(jnp.max(jnp.abs(out3 - ref2)))

    print("KERNEL_OK")
</pallas_src>

<mosaic_0001>
module attributes {stable_mosaic.version = 11 : i64} {
  func.func @kernel(%arg0: i32, %arg1: memref<1x1x18x18x4xf32, #tpu.memory_space<vmem>>, %arg2: memref<9x4x4xf32, #tpu.memory_space<vmem>>, %arg3: memref<1x4xf32, #tpu.memory_space<vmem>>, %arg4: memref<1x4xf32, #tpu.memory_space<vmem>>, %arg5: memref<1x1x18x18x1xf32, #tpu.memory_space<vmem>>, %arg6: memref<1x4xf32, #tpu.memory_space<vmem>>, %arg7: memref<1x4xf32, #tpu.memory_space<vmem>>, %arg8: memref<1x16x16x4xf32, #tpu.memory_space<vmem>>) attributes {dimension_semantics = [#tpu.dimension_semantics<parallel>], iteration_bounds = array<i64: 2>, scalar_prefetch = 0 : i64, scratch_operands = 0 : i64, tpu.core_type = #tpu.core_type<tc>, window_params = [{transform_indices = @transform_0, window_bounds = array<i64: 1, 1, 18, 18, 4>}, {pipeline_mode = #tpu.pipeline_mode<synchronous>, transform_indices = @transform_1, window_bounds = array<i64: 9, 4, 4>}, {pipeline_mode = #tpu.pipeline_mode<synchronous>, transform_indices = @transform_2, window_bounds = array<i64: 1, 4>}, {pipeline_mode = #tpu.pipeline_mode<synchronous>, transform_indices = @transform_3, window_bounds = array<i64: 1, 4>}, {pipeline_mode = #tpu.pipeline_mode<synchronous>, transform_indices = @transform_4, window_bounds = array<i64: 1, 1, 18, 18, 1>}, {pipeline_mode = #tpu.pipeline_mode<synchronous>, transform_indices = @transform_5, window_bounds = array<i64: 1, 4>}, {pipeline_mode = #tpu.pipeline_mode<synchronous>, transform_indices = @transform_6, window_bounds = array<i64: 1, 4>}, {transform_indices = @transform_7, window_bounds = array<i64: 1, 16, 16, 4>}]} {
    %c0 = arith.constant 0 : index
    %c0_0 = arith.constant 0 : index
    %c0_1 = arith.constant 0 : index
    %c0_2 = arith.constant 0 : index
    %c0_3 = arith.constant 0 : index
    %0 = vector.load %arg1[%c0, %c0_0, %c0_1, %c0_2, %c0_3] : memref<1x1x18x18x4xf32, #tpu.memory_space<vmem>>, vector<1x1x18x18x4xf32>
    %c0_4 = arith.constant 0 : index
    %c0_5 = arith.constant 0 : index
    %1 = vector.load %arg3[%c0_4, %c0_5] : memref<1x4xf32, #tpu.memory_space<vmem>>, vector<1x4xf32>
    %2 = vector.shape_cast %1 : vector<1x4xf32> to vector<1x1x1x1x4xf32>
    %3 = vector.broadcast %2 : vector<1x1x1x1x4xf32> to vector<1x1x18x18x4xf32>
    %4 = arith.mulf %0, %3 : vector<1x1x18x18x4xf32>
    %c0_6 = arith.constant 0 : index
    %c0_7 = arith.constant 0 : index
    %5 = vector.load %arg4[%c0_6, %c0_7] : memref<1x4xf32, #tpu.memory_space<vmem>>, vector<1x4xf32>
    %6 = vector.shape_cast %5 : vector<1x4xf32> to vector<1x1x1x1x4xf32>
    %7 = vector.broadcast %6 : vector<1x1x1x1x4xf32> to vector<1x1x18x18x4xf32>
    %8 = arith.addf %4, %7 : vector<1x1x18x18x4xf32>
    %cst = arith.constant 0.000000e+00 : f32
    %9 = vector.broadcast %cst : f32 to vector<1x1x18x18x4xf32>
    %10 = arith.maximumf %8, %9 : vector<1x1x18x18x4xf32>
    %c0_8 = arith.constant 0 : index
    %c0_9 = arith.constant 0 : index
    %c0_10 = arith.constant 0 : index
    %c0_11 = arith.constant 0 : index
    %c0_12 = arith.constant 0 : index
    %11 = vector.load %arg5[%c0_8, %c0_9, %c0_10, %c0_11, %c0_12] : memref<1x1x18x18x1xf32, #tpu.memory_space<vmem>>, vector<1x1x18x18x1xf32>
    %12 = vector.broadcast %11 : vector<1x1x18x18x1xf32> to vector<1x1x18x18x4xf32>
    %13 = arith.mulf %10, %12 : vector<1x1x18x18x4xf32>
    %cst_13 = arith.constant 0.000000e+00 : f32
    %14 = vector.broadcast %cst_13 : f32 to vector<256x4xf32>
    %15 = vector.extract_strided_slice %13 {offsets = [0, 0, 0, 0, 0], sizes = [1, 1, 16, 16, 4], strides = [1, 1, 1, 1, 1]} : vector<1x1x18x18x4xf32> to vector<1x1x16x16x4xf32>
    %16 = vector.shape_cast %15 : vector<1x1x16x16x4xf32> to vector<1x16x16x4xf32>
    %17 = vector.shape_cast %16 : vector<1x16x16x4xf32> to vector<256x4xf32>
    %c0_14 = arith.constant 0 : index
    %c0_15 = arith.constant 0 : index
    %c0_16 = arith.constant 0 : index
    %18 = vector.load %arg2[%c0_14, %c0_15, %c0_16] : memref<9x4x4xf32, #tpu.memory_space<vmem>>, vector<1x4x4xf32>
    %19 = vector.shape_cast %18 : vector<1x4x4xf32> to vector<4x4xf32>
    %cst_17 = arith.constant dense<0.000000e+00> : vector<256x4xf32>
    %20 = tpu.matmul %17, %19, %cst_17 {dimension_numbers = #tpu.dot_dimension_numbers<[1], [0], [0], [1], [0, 0, 1, 1], [], []>} : vector<256x4xf32>, vector<4x4xf32>, vector<256x4xf32> -> vector<256x4xf32>
    %21 = arith.addf %14, %20 : vector<256x4xf32>
    %22 = vector.extract_strided_slice %13 {offsets = [0, 0, 0, 1, 0], sizes = [1, 1, 16, 16, 4], strides = [1, 1, 1, 1, 1]} : vector<1x1x18x18x4xf32> to vector<1x1x16x16x4xf32>
    %23 = vector.shape_cast %22 : vector<1x1x16x16x4xf32> to vector<1x16x16x4xf32>
    %24 = vector.shape_cast %23 : vector<1x16x16x4xf32> to vector<256x4xf32>
    %c1 = arith.constant 1 : index
    %c0_18 = arith.constant 0 : index
    %c0_19 = arith.constant 0 : index
    %25 = vector.load %arg2[%c1, %c0_18, %c0_19] : memref<9x4x4xf32, #tpu.memory_space<vmem>>, vector<1x4x4xf32>
    %26 = vector.shape_cast %25 : vector<1x4x4xf32> to vector<4x4xf32>
    %cst_20 = arith.constant dense<0.000000e+00> : vector<256x4xf32>
    %27 = tpu.matmul %24, %26, %cst_20 {dimension_numbers = #tpu.dot_dimension_numbers<[1], [0], [0], [1], [0, 0, 1, 1], [], []>} : vector<256x4xf32>, vector<4x4xf32>, vector<256x4xf32> -> vector<256x4xf32>
    %28 = arith.addf %21, %27 : vector<256x4xf32>
    %29 = vector.extract_strided_slice %13 {offsets = [0, 0, 0, 2, 0], sizes = [1, 1, 16, 16, 4], strides = [1, 1, 1, 1, 1]} : vector<1x1x18x18x4xf32> to vector<1x1x16x16x4xf32>
    %30 = vector.shape_cast %29 : vector<1x1x16x16x4xf32> to vector<1x16x16x4xf32>
    %31 = vector.shape_cast %30 : vector<1x16x16x4xf32> to vector<256x4xf32>
    %c2 = arith.constant 2 : index
    %c0_21 = arith.constant 0 : index
    %c0_22 = arith.constant 0 : index
    %32 = vector.load %arg2[%c2, %c0_21, %c0_22] : memref<9x4x4xf32, #tpu.memory_space<vmem>>, vector<1x4x4xf32>
    %33 = vector.shape_cast %32 : vector<1x4x4xf32> to vector<4x4xf32>
    %cst_23 = arith.constant dense<0.000000e+00> : vector<256x4xf32>
    %34 = tpu.matmul %31, %33, %cst_23 {dimension_numbers = #tpu.dot_dimension_numbers<[1], [0], [0], [1], [0, 0, 1, 1], [], []>} : vector<256x4xf32>, vector<4x4xf32>, vector<256x4xf32> -> vector<256x4xf32>
    %35 = arith.addf %28, %34 : vector<256x4xf32>
    %36 = vector.extract_strided_slice %13 {offsets = [0, 0, 1, 0, 0], sizes = [1, 1, 16, 16, 4], strides = [1, 1, 1, 1, 1]} : vector<1x1x18x18x4xf32> to vector<1x1x16x16x4xf32>
    %37 = vector.shape_cast %36 : vector<1x1x16x16x4xf32> to vector<1x16x16x4xf32>
    %38 = vector.shape_cast %37 : vector<1x16x16x4xf32> to vector<256x4xf32>
    %c3 = arith.constant 3 : index
    %c0_24 = arith.constant 0 : index
    %c0_25 = arith.constant 0 : index
    %39 = vector.load %arg2[%c3, %c0_24, %c0_25] : memref<9x4x4xf32, #tpu.memory_space<vmem>>, vector<1x4x4xf32>
    %40 = vector.shape_cast %39 : vector<1x4x4xf32> to vector<4x4xf32>
    %cst_26 = arith.constant dense<0.000000e+00> : vector<256x4xf32>
    %41 = tpu.matmul %38, %40, %cst_26 {dimension_numbers = #tpu.dot_dimension_numbers<[1], [0], [0], [1], [0, 0, 1, 1], [], []>} : vector<256x4xf32>, vector<4x4xf32>, vector<256x4xf32> -> vector<256x4xf32>
    %42 = arith.addf %35, %41 : vector<256x4xf32>
    %43 = vector.extract_strided_slice %13 {offsets = [0, 0, 1, 1, 0], sizes = [1, 1, 16, 16, 4], strides = [1, 1, 1, 1, 1]} : vector<1x1x18x18x4xf32> to vector<1x1x16x16x4xf32>
    %44 = vector.shape_cast %43 : vector<1x1x16x16x4xf32> to vector<1x16x16x4xf32>
    %45 = vector.shape_cast %44 : vector<1x16x16x4xf32> to vector<256x4xf32>
    %c4 = arith.constant 4 : index
    %c0_27 = arith.constant 0 : index
    %c0_28 = arith.constant 0 : index
    %46 = vector.load %arg2[%c4, %c0_27, %c0_28] : memref<9x4x4xf32, #tpu.memory_space<vmem>>, vector<1x4x4xf32>
    %47 = vector.shape_cast %46 : vector<1x4x4xf32> to vector<4x4xf32>
    %cst_29 = arith.constant dense<0.000000e+00> : vector<256x4xf32>
    %48 = tpu.matmul %45, %47, %cst_29 {dimension_numbers = #tpu.dot_dimension_numbers<[1], [0], [0], [1], [0, 0, 1, 1], [], []>} : vector<256x4xf32>, vector<4x4xf32>, vector<256x4xf32> -> vector<256x4xf32>
    %49 = arith.addf %42, %48 : vector<256x4xf32>
    %50 = vector.extract_strided_slice %13 {offsets = [0, 0, 1, 2, 0], sizes = [1, 1, 16, 16, 4], strides = [1, 1, 1, 1, 1]} : vector<1x1x18x18x4xf32> to vector<1x1x16x16x4xf32>
    %51 = vector.shape_cast %50 : vector<1x1x16x16x4xf32> to vector<1x16x16x4xf32>
    %52 = vector.shape_cast %51 : vector<1x16x16x4xf32> to vector<256x4xf32>
    %c5 = arith.constant 5 : index
    %c0_30 = arith.constant 0 : index
    %c0_31 = arith.constant 0 : index
    %53 = vector.load %arg2[%c5, %c0_30, %c0_31] : memref<9x4x4xf32, #tpu.memory_space<vmem>>, vector<1x4x4xf32>
    %54 = vector.shape_cast %53 : vector<1x4x4xf32> to vector<4x4xf32>
    %cst_32 = arith.constant dense<0.000000e+00> : vector<256x4xf32>
    %55 = tpu.matmul %52, %54, %cst_32 {dimension_numbers = #tpu.dot_dimension_numbers<[1], [0], [0], [1], [0, 0, 1, 1], [], []>} : vector<256x4xf32>, vector<4x4xf32>, vector<256x4xf32> -> vector<256x4xf32>
    %56 = arith.addf %49, %55 : vector<256x4xf32>
    %57 = vector.extract_strided_slice %13 {offsets = [0, 0, 2, 0, 0], sizes = [1, 1, 16, 16, 4], strides = [1, 1, 1, 1, 1]} : vector<1x1x18x18x4xf32> to vector<1x1x16x16x4xf32>
    %58 = vector.shape_cast %57 : vector<1x1x16x16x4xf32> to vector<1x16x16x4xf32>
    %59 = vector.shape_cast %58 : vector<1x16x16x4xf32> to vector<256x4xf32>
    %c6 = arith.constant 6 : index
    %c0_33 = arith.constant 0 : index
    %c0_34 = arith.constant 0 : index
    %60 = vector.load %arg2[%c6, %c0_33, %c0_34] : memref<9x4x4xf32, #tpu.memory_space<vmem>>, vector<1x4x4xf32>
    %61 = vector.shape_cast %60 : vector<1x4x4xf32> to vector<4x4xf32>
    %cst_35 = arith.constant dense<0.000000e+00> : vector<256x4xf32>
    %62 = tpu.matmul %59, %61, %cst_35 {dimension_numbers = #tpu.dot_dimension_numbers<[1], [0], [0], [1], [0, 0, 1, 1], [], []>} : vector<256x4xf32>, vector<4x4xf32>, vector<256x4xf32> -> vector<256x4xf32>
    %63 = arith.addf %56, %62 : vector<256x4xf32>
    %64 = vector.extract_strided_slice %13 {offsets = [0, 0, 2, 1, 0], sizes = [1, 1, 16, 16, 4], strides = [1, 1, 1, 1, 1]} : vector<1x1x18x18x4xf32> to vector<1x1x16x16x4xf32>
    %65 = vector.shape_cast %64 : vector<1x1x16x16x4xf32> to vector<1x16x16x4xf32>
    %66 = vector.shape_cast %65 : vector<1x16x16x4xf32> to vector<256x4xf32>
    %c7 = arith.constant 7 : index
    %c0_36 = arith.constant 0 : index
    %c0_37 = arith.constant 0 : index
    %67 = vector.load %arg2[%c7, %c0_36, %c0_37] : memref<9x4x4xf32, #tpu.memory_space<vmem>>, vector<1x4x4xf32>
    %68 = vector.shape_cast %67 : vector<1x4x4xf32> to vector<4x4xf32>
    %cst_38 = arith.constant dense<0.000000e+00> : vector<256x4xf32>
    %69 = tpu.matmul %66, %68, %cst_38 {dimension_numbers = #tpu.dot_dimension_numbers<[1], [0], [0], [1], [0, 0, 1, 1], [], []>} : vector<256x4xf32>, vector<4x4xf32>, vector<256x4xf32> -> vector<256x4xf32>
    %70 = arith.addf %63, %69 : vector<256x4xf32>
    %71 = vector.extract_strided_slice %13 {offsets = [0, 0, 2, 2, 0], sizes = [1, 1, 16, 16, 4], strides = [1, 1, 1, 1, 1]} : vector<1x1x18x18x4xf32> to vector<1x1x16x16x4xf32>
    %72 = vector.shape_cast %71 : vector<1x1x16x16x4xf32> to vector<1x16x16x4xf32>
    %73 = vector.shape_cast %72 : vector<1x16x16x4xf32> to vector<256x4xf32>
    %c8 = arith.constant 8 : index
    %c0_39 = arith.constant 0 : index
    %c0_40 = arith.constant 0 : index
    %74 = vector.load %arg2[%c8, %c0_39, %c0_40] : memref<9x4x4xf32, #tpu.memory_space<vmem>>, vector<1x4x4xf32>
    %75 = vector.shape_cast %74 : vector<1x4x4xf32> to vector<4x4xf32>
    %cst_41 = arith.constant dense<0.000000e+00> : vector<256x4xf32>
    %76 = tpu.matmul %73, %75, %cst_41 {dimension_numbers = #tpu.dot_dimension_numbers<[1], [0], [0], [1], [0, 0, 1, 1], [], []>} : vector<256x4xf32>, vector<4x4xf32>, vector<256x4xf32> -> vector<256x4xf32>
    %77 = arith.addf %70, %76 : vector<256x4xf32>
    %c0_42 = arith.constant 0 : index
    %c0_43 = arith.constant 0 : index
    %78 = vector.load %arg6[%c0_42, %c0_43] : memref<1x4xf32, #tpu.memory_space<vmem>>, vector<1x4xf32>
    %79 = vector.broadcast %78 : vector<1x4xf32> to vector<256x4xf32>
    %80 = arith.mulf %77, %79 : vector<256x4xf32>
    %c0_44 = arith.constant 0 : index
    %c0_45 = arith.constant 0 : index
    %81 = vector.load %arg7[%c0_44, %c0_45] : memref<1x4xf32, #tpu.memory_space<vmem>>, vector<1x4xf32>
    %82 = vector.broadcast %81 : vector<1x4xf32> to vector<256x4xf32>
    %83 = arith.addf %80, %82 : vector<256x4xf32>
    %cst_46 = arith.constant 0.000000e+00 : f32
    %84 = vector.broadcast %cst_46 : f32 to vector<256x4xf32>
    %85 = arith.maximumf %83, %84 : vector<256x4xf32>
    %86 = vector.shape_cast %85 : vector<256x4xf32> to vector<1x16x16x4xf32>
    %c0_47 = arith.constant 0 : index
    %c0_48 = arith.constant 0 : index
    %c0_49 = arith.constant 0 : index
    %c0_50 = arith.constant 0 : index
    %87 = vector.load %arg8[%c0_47, %c0_48, %c0_49, %c0_50] : memref<1x16x16x4xf32, #tpu.memory_space<vmem>>, vector<1x16x16x4xf32>
    tpu.vector_store %arg8[%c0_47, %c0_48, %c0_49, %c0_50], %86 {strides = array<i32>} : memref<1x16x16x4xf32, #tpu.memory_space<vmem>>, vector<1x16x16x4xf32>,
    return
  }
  func.func @transform_0(%arg0: i32) -> (i32, i32, i32, i32, i32) {
    %c0_i32 = arith.constant 0 : i32
    %c0_i32_0 = arith.constant 0 : i32
    %c0_i32_1 = arith.constant 0 : i32
    %c0_i32_2 = arith.constant 0 : i32
    %c0_i32_3 = arith.constant 0 : i32
    return %arg0, %c0_i32, %c0_i32_0, %c0_i32_1, %c0_i32_2 : i32, i32, i32, i32, i32
  }
  func.func @transform_1(%arg0: i32) -> (i32, i32, i32) {
    %c0_i32 = arith.constant 0 : i32
    %c0_i32_0 = arith.constant 0 : i32
    %c0_i32_1 = arith.constant 0 : i32
    %c0_i32_2 = arith.constant 0 : i32
    return %c0_i32, %c0_i32_0, %c0_i32_1 : i32, i32, i32
  }
  func.func @transform_2(%arg0: i32) -> (i32, i32) {
    %c0_i32 = arith.constant 0 : i32
    %c0_i32_0 = arith.constant 0 : i32
    %c0_i32_1 = arith.constant 0 : i32
    return %c0_i32, %c0_i32_0 : i32, i32
  }
  func.func @transform_3(%arg0: i32) -> (i32, i32) {
    %c0_i32 = arith.constant 0 : i32
    %c0_i32_0 = arith.constant 0 : i32
    %c0_i32_1 = arith.constant 0 : i32
    return %c0_i32, %c0_i32_0 : i32, i32
  }
  func.func @transform_4(%arg0: i32) -> (i32, i32, i32, i32, i32) {
    %c0_i32 = arith.constant 0 : i32
    %c0_i32_0 = arith.constant 0 : i32
    %c0_i32_1 = arith.constant 0 : i32
    %c0_i32_2 = arith.constant 0 : i32
    %c0_i32_3 = arith.constant 0 : i32
    %c0_i32_4 = arith.constant 0 : i32
    return %c0_i32, %c0_i32_0, %c0_i32_1, %c0_i32_2, %c0_i32_3 : i32, i32, i32, i32, i32
  }
  func.func @transform_5(%arg0: i32) -> (i32, i32) {
    %c0_i32 = arith.constant 0 : i32
    %c0_i32_0 = arith.constant 0 : i32
    %c0_i32_1 = arith.constant 0 : i32
    return %c0_i32, %c0_i32_0 : i32, i32
  }
  func.func @transform_6(%arg0: i32) -> (i32, i32) {
    %c0_i32 = arith.constant 0 : i32
    %c0_i32_0 = arith.constant 0 : i32
    %c0_i32_1 = arith.constant 0 : i32
    return %c0_i32, %c0_i32_0 : i32, i32
  }
  func.func @transform_7(%arg0: i32) -> (i32, i32, i32, i32) {
    %c0_i32 = arith.constant 0 : i32
    %c0_i32_0 = arith.constant 0 : i32
    %c0_i32_1 = arith.constant 0 : i32
    %c0_i32_2 = arith.constant 0 : i32
    return %arg0, %c0_i32, %c0_i32_0, %c0_i32_1 : i32, i32, i32, i32
  }
}

</mosaic_0001>

<bundles_post_ra>
// kernel: tpu_custom_call.1
= control target key start
LH: loop header
LB: loop body
LE: loop exit
PB: predicated region body
PF: predicated region fallthrough
CT: control target
= control target key end

     0   :  { %s4963_s24 = smov 0   ;;  %s7013_s0 = inlined_call_operand.vmem [shape: f32[2,1,18,18,4], index: 0, kind: input, shape index: {}]   ;;  %s7014_s1 = inlined_call_operand.vmem [shape: f32[9,4,4], index: 1, kind: input, shape index: {}]   ;;  %s7015_s2 = inlined_call_operand.vmem [shape: f32[1,4], index: 2, kind: input, shape index: {}]   ;;  %s7016_s3 = inlined_call_operand.vmem [shape: f32[1,4], index: 3, kind: input, shape index: {}]   ;;  %s7017_s4 = inlined_call_operand.vmem [shape: f32[1,1,18,18,1], index: 4, kind: input, shape index: {}]   ;;  %s7018_s5 = inlined_call_operand.vmem [shape: f32[1,4], index: 5, kind: input, shape index: {}]   ;;  %s7019_s6 = inlined_call_operand.vmem [shape: f32[1,4], index: 6, kind: input, shape index: {}]   ;;  %s7020_s7 = inlined_call_operand.vmem [shape: f32[2,16,16,4], index: 7, kind: output, shape index: {}]  }
   0x1 LB: > { %s3831_s25 = sadd.s32 4294967295, %s4920_s24   ;;  %p3835_p0 = scmp.ge.s32.totalorder %s4920_s24, 1  ;;  %s4920_s24 = sphi %s4963_s24, %s17_s24  }
   0x2   : > { %p237_p1 = scmp.lt.s32.totalorder %s4920_s24, 3 }
   0x4   : > { %p238_p2 = pnand %p3835_p0, %p237_p1 }
   0x6   : > { %241 = sbr.rel (%p238_p2) target bundleno = 695 (0x2b7), region = 48 }
   0xb   : > { %v535_v0 = vld [vmem:[%s7017_s4 + $0xd0] sm:$0x3]  ;;  %v533_v1 = vld [vmem:[%s7017_s4 + $0xc0] sm:$0xff]  ;;  %v4922_v2 = vmov 0   ;;  %v534_v3 = vld [vmem:[%s7017_s4 + $0xc8] sm:$0xff]  ;;  %vm1084_vm0 = vcmask 1043456  }
   0xc   : > { %4911 = vset.pattern.permute.xlu1 %v4922_v2  ;;  %4910 = vset.pattern.permute.xlu0 %v4922_v2  ;;  %v509_v4 = vld [vmem:[%s7017_s4] sm:$0xff]  ;;  %v510_v5 = vld [vmem:[%s7017_s4 + $0x8] sm:$0xff]  ;;  %v511_v6 = vld [vmem:[%s7017_s4 + $0x10] sm:$0x3]  ;;  %p269_p3 = scmp.lt.s32.totalorder %s3831_s25, 1  ;;  %vm936_vm1 = vcmask 1046528  }
   0xd   : > { %695 = vperm.xlu1 %4911, %v535_v0   ;;  %685 = vperm.xlu0 %4910, %v533_v1   ;;  %v536_v7 = vld [vmem:[%s7017_s4 + $0xd8] sm:$0xff]  ;;  %v537_v8 = vld [vmem:[%s7017_s4 + $0xe0] sm:$0xff]  ;;  %v538_v9 = vld [vmem:[%s7017_s4 + $0xe8] sm:$0x3]  ;;  %vm1019_vm2 = vcmask 31744   ;;  %vm1605_vm3 = vcmask 1045504  }
   0xe   : > { %v512_v10 = vld [vmem:[%s7017_s4 + $0x18] sm:$0xff]  ;;  %v513_v11 = vld [vmem:[%s7017_s4 + $0x20] sm:$0xff]  ;;  %v514_v12 = vld [vmem:[%s7017_s4 + $0x28] sm:$0x3]  ;;  %s7340_s25 = smov (!%p269_p3, %s3831_s25), 1 }
   0xf   : > { %v3841_v13 = vld [vmem:[%s7014_s1 + $0x4] sm:$0xf]  ;;  %v539_v14 = vld [vmem:[%s7017_s4 + $0xf0] sm:$0xff]  ;;  %v540_v15 = vld [vmem:[%s7017_s4 + $0xf8] sm:$0xff]  ;;  %s4900_s12 = smul.u32 432, %s7340_s25  ;;  %s4150_s19 = sshll.u32 %s7340_s25, 8 }
  0x10   : > { %4898 = vmatprep.subr.msk.mxu1 %vm1084_vm0, %v3841_v13  ;;  %4448 = vmatprep.subr.msk.mxu0 %vm1084_vm0, %v3841_v13  ;;  %v541_v16 = vld [vmem:[%s7017_s4 + $0x100] sm:$0x3]  ;;  %v515_v17 = vld [vmem:[%s7017_s4 + $0x30] sm:$0xff]  ;;  %v516_v18 = vld [vmem:[%s7017_s4 + $0x38] sm:$0xff]  ;;  %s6807_s21 = scalar_lea.vmem %s7020_s7, %s4150_s19 }
  0x11   : > { %690 = vperm.xlu0 %4910, %v534_v3   ;;  %565 = vperm.xlu1 %4911, %v509_v4   ;;  %v517_v19 = vld [vmem:[%s7017_s4 + $0x40] sm:$0x3]  ;;  %v542_v20 = vld [vmem:[%s7017_s4 + $0x108] sm:$0xff]  ;;  %v543_v21 = vld [vmem:[%s7017_s4 + $0x110] sm:$0xff]  ;;  %s5164_s15 = scalar_lea.vmem %s7013_s0, %s4900_s12 }
  0x12   : > { %4899 = vmatpush3.msk.msra.mxu1 %vm1084_vm0, %v3841_v13  ;;  %4449 = vmatpush3.msk.msra.mxu0 %vm1084_vm0, %v3841_v13  ;;  %v544_v22 = vld [vmem:[%s7017_s4 + $0x118] sm:$0x3]  ;;  %v518_v23 = vld [vmem:[%s7017_s4 + $0x48] sm:$0xff]  ;;  %v519_v24 = vld [vmem:[%s7017_s4 + $0x50] sm:$0xff] }
  0x13   : > { %v520_v25 = vld [vmem:[%s7017_s4 + $0x58] sm:$0x3]  ;;  %v545_v26 = vld [vmem:[%s7017_s4 + $0x120] sm:$0xff]  ;;  %v546_v27 = vld [vmem:[%s7017_s4 + $0x128] sm:$0xff] }
  0x14   : > { %v547_v28 = vld [vmem:[%s7017_s4 + $0x130] sm:$0x3]  ;;  %v521_v29 = vld [vmem:[%s7017_s4 + $0x60] sm:$0xff]  ;;  %v522_v30 = vld [vmem:[%s7017_s4 + $0x68] sm:$0xff] }
  0x15   : > { %570 = vperm.xlu0 %4910, %v510_v5   ;;  %575 = vperm.xlu1 %4911, %v511_v6   ;;  %v523_v31 = vld [vmem:[%s7017_s4 + $0x70] sm:$0x3]  ;;  %v548_v32 = vld [vmem:[%s7017_s4 + $0x138] sm:$0xff]  ;;  %v549_v33 = vld [vmem:[%s7017_s4 + $0x140] sm:$0xff] }
  0x16   : > { %v550_v34 = vld [vmem:[%s7017_s4 + $0x148] sm:$0x3]  ;;  %v524_v35 = vld [vmem:[%s7017_s4 + $0x78] sm:$0xff]  ;;  %v5083_v36 = vld [vmem:[%s7014_s1] sm:$0xf] }
  0x17   : > { %4498 = vmatprep.subr.msk.mxu1 %vm1084_vm0, %v5083_v36  ;;  %v525_v37 = vld [vmem:[%s7017_s4 + $0x80] sm:$0xff]  ;;  %v526_v38 = vld [vmem:[%s7017_s4 + $0x88] sm:$0x3]  ;;  %v551_v40 = vld [vmem:[%s7017_s4 + $0x150] sm:$0xff] }
  0x18   : > { %v5096_v39 = vld [vmem:[%s7014_s1 + $0x8] sm:$0xf]  ;;  %v552_v41 = vld [vmem:[%s7017_s4 + $0x158] sm:$0xff]  ;;  %v553_v42 = vld [vmem:[%s7017_s4 + $0x160] sm:$0x3] }
  0x19   : > { %700 = vperm.xlu0 %4910, %v536_v7   ;;  %705 = vperm.xlu1 %4911, %v537_v8   ;;  %v527_v43 = vld [vmem:[%s7017_s4 + $0x90] sm:$0xff]  ;;  %v528_v44 = vld [vmem:[%s7017_s4 + $0x98] sm:$0xff]  ;;  %v529_v45 = vld [vmem:[%s7017_s4 + $0xa0] sm:$0x3] }
  0x1a   : > { %4548 = vmatprep.subr.msk.mxu0 %vm1084_vm0, %v5096_v39  ;;  %v554_v46 = vld [vmem:[%s7017_s4 + $0x168] sm:$0xff]  ;;  %v555_v47 = vld [vmem:[%s7017_s4 + $0x170] sm:$0xff]  ;;  %v556_v48 = vld [vmem:[%s7017_s4 + $0x178] sm:$0x3] }
  0x1b   : > { %v530_v49 = vld [vmem:[%s7017_s4 + $0xa8] sm:$0xff]  ;;  %v531_v50 = vld [vmem:[%s7017_s4 + $0xb0] sm:$0xff]  ;;  %v532_v51 = vld [vmem:[%s7017_s4 + $0xb8] sm:$0x3] }
  0x1c   : > { %v557_v52 = vld [vmem:[%s7017_s4 + $0x180] sm:$0xff]  ;;  %v558_v53 = vld [vmem:[%s7017_s4 + $0x188] sm:$0xff]  ;;  %v559_v54 = vld [vmem:[%s7017_s4 + $0x190] sm:$0x3] }
  0x1d   : > { %710 = vperm.xlu0 %4910, %v538_v9   ;;  %580 = vperm.xlu1 %4911, %v512_v10   ;;  %v560_v55 = vld [vmem:[%s7017_s4 + $0x198] sm:$0xff]  ;;  %v561_v56 = vld [vmem:[%s7017_s4 + $0x1a0] sm:$0xff]  ;;  %v562_v57 = vld [vmem:[%s7017_s4 + $0x1a8] sm:$0x3] }
  0x1e   : > { %v305_v58 = vld [vmem:[%s5164_s15 + $0xd0] sm:$0x3]  ;;  %v5170_v59 = vld [vmem:[%s7015_s2] ss:$0 sm:$0xff]  ;;  %v304_v61 = vld [vmem:[%s5164_s15 + $0xc8] sm:$0xff] }
  0x1f   : > { %v303_v60 = vld [vmem:[%s5164_s15 + $0xc0] sm:$0xff]  ;;  %v366_v62 = vmul.f32 %v5170_v59, %v305_v58  ;;  %v365_v2 = vmul.f32 %v5170_v59, %v304_v61  ;;  %v280_v3 = vld [vmem:[%s5164_s15 + $0x8] sm:$0xff]  ;;  %v281_v4 = vld [vmem:[%s5164_s15 + $0x10] sm:$0x3] }
  0x20   : > { %v364_v63 = vmul.f32 %v5170_v59, %v303_v60  ;;  %v5179_v0 = vld [vmem:[%s7016_s3] ss:$0 sm:$0xff]  ;;  %v341_v9 = vmul.f32 %v5170_v59, %v280_v3  ;;  %v342_v10 = vmul.f32 %v5170_v59, %v281_v4  ;;  %v5237_v58 = vld [vmem:[%s7014_s1 + $0xc] sm:$0xf] }
  0x21   : > { %585 = vperm.xlu0 %4910, %v513_v11   ;;  %590 = vperm.xlu1 %4911, %v514_v12   ;;  %v279_v1 = vld [vmem:[%s5164_s15] sm:$0xff]  ;;  %v427_v5 = vadd.f32 %v5179_v0, %v366_v62  ;;  %v426_v8 = vadd.f32 %v5179_v0, %v365_v2  ;;  %v306_v11 = vld [vmem:[%s5164_s15 + $0xd8] sm:$0xff] }
  0x22   : > { %v425_v6 = vadd.f32 %v5179_v0, %v364_v63  ;;  %v340_v7 = vmul.f32 %v5170_v59, %v279_v1  ;;  %v307_v12 = vld [vmem:[%s5164_s15 + $0xe0] sm:$0xff] }
  0x23   : > { %v481_v13 = vmax.f32 %v427_v5, 0.0 }
  0x25   : > { %715 = vperm.xlu0 %4910, %v539_v14   ;;  %720 = vperm.xlu1 %4911, %v540_v15   ;;  %v479_v14 = vmax.f32 %v425_v6, 0.0  ;;  %v401_v15 = vadd.f32 %v5179_v0, %v340_v7 }
  0x29   : > { %725 = vperm.xlu0 %4910, %v541_v16   ;;  %595 = vperm.xlu1 %4911, %v515_v17  }
  0x2d   : > { %600 = vperm.xlu0 %4910, %v516_v18   ;;  %605 = vperm.xlu1 %4911, %v517_v19   ;;  %v367_v18 = vmul.f32 %v5170_v59, %v306_v11  ;;  %v368_v19 = vmul.f32 %v5170_v59, %v307_v12  ;;  %v311_v11 = vld [vmem:[%s5164_s15 + $0x100] sm:$0x3] }
  0x31   : > { %730 = vperm.xlu0 %4910, %v542_v20   ;;  %735 = vperm.xlu1 %4911, %v543_v21   ;;  %v480_v20 = vmax.f32 %v426_v8, 0.0  ;;  %v402_v21 = vadd.f32 %v5179_v0, %v341_v9 }
  0x35   : > { %740 = vperm.xlu0 %4910, %v544_v22   ;;  %610 = vperm.xlu1 %4911, %v518_v23   ;;  %v403_v22 = vadd.f32 %v5179_v0, %v342_v10  ;;  %v308_v23 = vld [vmem:[%s5164_s15 + $0xe8] sm:$0x3] }
  0x39   : > { %615 = vperm.xlu0 %4910, %v519_v24   ;;  %620 = vperm.xlu1 %4911, %v520_v25  }
  0x3d   : > { %745 = vperm.xlu0 %4910, %v545_v26   ;;  %750 = vperm.xlu1 %4911, %v546_v27   ;;  %v455_v26 = vmax.f32 %v401_v15, 0.0  ;;  %v282_v27 = vld [vmem:[%s5164_s15 + $0x18] sm:$0xff] }
  0x41   : > { %755 = vperm.xlu0 %4910, %v547_v28   ;;  %625 = vperm.xlu1 %4911, %v521_v29   ;;  %v283_v28 = vld [vmem:[%s5164_s15 + $0x20] sm:$0xff] }
  0x45   : > { %630 = vperm.xlu0 %4910, %v522_v30   ;;  %635 = vperm.xlu1 %4911, %v523_v31   ;;  %v428_v31 = vadd.f32 %v5179_v0, %v367_v18 }
  0x49   : > { %760 = vperm.xlu0 %4910, %v548_v32   ;;  %765 = vperm.xlu1 %4911, %v549_v33   ;;  %v429_v32 = vadd.f32 %v5179_v0, %v368_v19  ;;  %v369_v33 = vmul.f32 %v5170_v59, %v308_v23 }
  0x4d   : > { %770 = vperm.xlu0 %4910, %v550_v34   ;;  %640 = vperm.xlu1 %4911, %v524_v35   ;;  %v456_v35 = vmax.f32 %v402_v21, 0.0  ;;  %v372_v21 = vmul.f32 %v5170_v59, %v311_v11 }
  0x51   : > { %645 = vperm.xlu0 %4910, %v525_v37   ;;  %650 = vperm.xlu1 %4911, %v526_v38   ;;  %v457_v37 = vmax.f32 %v403_v22, 0.0  ;;  %v284_v38 = vld [vmem:[%s5164_s15 + $0x28] sm:$0x3] }
  0x55   : > { %775 = vperm.xlu0 %4910, %v551_v40   ;;  %780 = vperm.xlu1 %4911, %v552_v41   ;;  %v343_v40 = vmul.f32 %v5170_v59, %v282_v27  ;;  %v344_v41 = vmul.f32 %v5170_v59, %v283_v28  ;;  %v286_v28 = vld [vmem:[%s5164_s15 + $0x38] sm:$0xff] }
  0x57   : > { %v404_v63 = vadd.f32 %v5179_v0, %v343_v40  ;;  %v405_v4 = vadd.f32 %v5179_v0, %v344_v41  ;;  %v312_v41 = vld [vmem:[%s5164_s15 + $0x108] sm:$0xff] }
  0x59   : > { %785 = vperm.xlu0 %4910, %v553_v42   ;;  %655 = vperm.xlu1 %4911, %v527_v43   ;;  %v459_v19 = vmax.f32 %v405_v4, 0.0 }
  0x5d   : > { %660 = vperm.xlu0 %4910, %v528_v44   ;;  %665 = vperm.xlu1 %4911, %v529_v45  }
  0x61   : > { %790 = vperm.xlu0 %4910, %v554_v46   ;;  %795 = vperm.xlu1 %4911, %v555_v47  }
  0x65   : > { %800 = vperm.xlu0 %4910, %v556_v48   ;;  %670 = vperm.xlu1 %4911, %v530_v49   ;;  %v482_v48 = vmax.f32 %v428_v31, 0.0  ;;  %v483_v49 = vmax.f32 %v429_v32, 0.0 }
  0x69   : > { %675 = vperm.xlu0 %4910, %v531_v50   ;;  %680 = vperm.xlu1 %4911, %v532_v51   ;;  %v430_v50 = vadd.f32 %v5179_v0, %v369_v33  ;;  %v345_v51 = vmul.f32 %v5170_v59, %v284_v38  ;;  %v347_v38 = vmul.f32 %v5170_v59, %v286_v28 }
  0x6b   : > { %v484_v3 = vmax.f32 %v430_v50, 0.0  ;;  %v406_v10 = vadd.f32 %v5179_v0, %v345_v51 }
  0x6d   : > { %805 = vperm.xlu0 %4910, %v557_v52   ;;  %810 = vperm.xlu1 %4911, %v558_v53  }
  0x71   : > { %815 = vperm.xlu0 %4910, %v559_v54   ;;  %820 = vperm.xlu1 %4911, %v560_v55  }
  0x75   : > { %825 = vperm.xlu0 %4910, %v561_v56   ;;  %830 = vperm.xlu1 %4911, %v562_v57   ;;  %v309_v56 = vld [vmem:[%s5164_s15 + $0xf0] sm:$0xff]  ;;  %v310_v57 = vld [vmem:[%s5164_s15 + $0xf8] sm:$0xff] }
  0x76   : > { %v370_v5 = vmul.f32 %v5170_v59, %v309_v56  ;;  %v371_v6 = vmul.f32 %v5170_v59, %v310_v57  ;;  %v373_v56 = vmul.f32 %v5170_v59, %v312_v41 }
  0x78   : > { %v432_v27 = vadd.f32 %v5179_v0, %v371_v6 }
  0x88   : > { %v696_v16 = vpop.permute.xlu1 %695  ;;  %v686_v17 = vpop.permute.xlu0 %685 }
  0x89   : > { %v5199_v24 = vmul.f32 %v696_v16, %v481_v13  ;;  %v5201_v25 = vmul.f32 %v686_v17, %v479_v14  ;;  %v458_v13 = vmax.f32 %v404_v63, 0.0  ;;  %v285_v16 = vld [vmem:[%s5164_s15 + $0x30] sm:$0xff] }
  0x8b   : > { %v980_v42 = vrot.slane %v5199_v24, 1  ;;  %v977_v44 = vrot.slane %v5201_v25, 1 }
  0x8c   : > { %v691_v29 = vpop.permute.xlu0 %690  ;;  %v566_v30 = vpop.permute.xlu1 %565 }
  0x8d   : > { %v5208_v34 = vmul.f32 %v691_v29, %v480_v20  ;;  %v5214_v43 = vmul.f32 %v566_v30, %v455_v26  ;;  %v431_v20 = vadd.f32 %v5179_v0, %v370_v5  ;;  %v460_v26 = vmax.f32 %v406_v10, 0.0  ;;  %v287_v29 = vld [vmem:[%s5164_s15 + $0x40] sm:$0x3] }
  0x8e   : > { %v348_v40 = vmul.f32 %v5170_v59, %v287_v29 }
  0x8f   : > { %v978_v45 = vrot.slane %v5208_v34, 1  ;;  %v937_v61 = vrot.slane %v5214_v43, 1 }
  0x90   : > { %v571_v46 = vpop.permute.xlu0 %570  ;;  %v576_v47 = vpop.permute.xlu1 %575  ;;  %v409_v63 = vadd.f32 %v5179_v0, %v348_v40 }
  0x91   : > { %v5220_v52 = vmul.f32 %v571_v46, %v456_v35  ;;  %v5222_v53 = vmul.f32 %v576_v47, %v457_v37  ;;  %v5225_v54 = vsel %vm936_vm1, %v977_v44, %v978_v45  ;;  %v5228_v55 = vsel %vm936_vm1, %v978_v45, %v980_v42  ;;  %v313_v47 = vld [vmem:[%s5164_s15 + $0x110] sm:$0xff] }
  0x92   : > { %7111 = vst [vmem:[#allocation2_spill] sm:$0xff] %v5225_v54  ;;  %7112 = vst [vmem:[#allocation3_spill] sm:$0xff] %v5228_v55  ;;  %4474 = vmatprep.mubr.msk.f32.mxu1 %vm1019_vm2, %v5225_v54  ;;  %v485_v35 = vmax.f32 %v431_v20, 0.0  ;;  %v433_v37 = vadd.f32 %v5179_v0, %v372_v21  ;;  %v486_v46 = vmax.f32 %v432_v27, 0.0  ;;  %v463_v20 = vmax.f32 %v409_v63, 0.0  ;;  %v298_v54 = vld [vmem:[%s5164_s15 + $0x98] sm:$0xff] }
  0x93   : > { %v940_v60 = vrot.slane %v5222_v53, 1  ;;  %4475 = vmatmul.mubr.msk.f32.vlgmr.msra.gmra.mxu1 %vm1019_vm2, %v5228_v55  ;;  %v938_v62 = vrot.slane %v5220_v52, 1  ;;  %v290_v27 = vld [vmem:[%s5164_s15 + $0x58] sm:$0x3] }
  0x94   : > { %v701_v1 = vpop.permute.xlu0 %700  ;;  %v706_v2 = vpop.permute.xlu1 %705  ;;  %4499 = vmatpush3.msk.msra.mxu1 %vm1084_vm0, %v5083_v36  ;;  %v5264_v36 = vld [vmem:[%s7014_s1 + $0x10] sm:$0xf] }
  0x95   : > { %v5250_v7 = vmul.f32 %v701_v1, %v482_v48  ;;  %v5252_v8 = vmul.f32 %v706_v2, %v483_v49  ;;  %v939_v9 = vsel %vm936_vm1, %v937_v61, %v938_v62  ;;  %4598 = vmatprep.subr.msk.mxu1 %vm1084_vm0, %v5237_v58  ;;  %v941_v12 = vsel %vm936_vm1, %v938_v62, %v940_v60  ;;  %v314_v2 = vld [vmem:[%s5164_s15 + $0x118] sm:$0x3] }
  0x96   : > { %4450 = vmatprep.mubr.msk.f32.mxu0 %vm1019_vm2, %v939_v9  ;;  %v487_v61 = vmax.f32 %v433_v37, 0.0  ;;  %v408_v62 = vadd.f32 %v5179_v0, %v347_v38  ;;  %v374_v1 = vmul.f32 %v5170_v59, %v313_v47  ;;  %v351_v38 = vmul.f32 %v5170_v59, %v290_v27 }
  0x97   : > { %4451 = vmatmul.mubr.msk.f32.vlgmr.msra.gmra.mxu0 %vm1019_vm2, %v941_v12  ;;  %v982_v14 = vrot.slane %v5250_v7, 1  ;;  %v983_v15 = vrot.slane %v5252_v8, 1  ;;  %v375_v12 = vmul.f32 %v5170_v59, %v314_v2 }
  0x98   : > { %v711_v17 = vpop.permute.xlu0 %710  ;;  %v581_v18 = vpop.permute.xlu1 %580  ;;  %4549 = vmatpush3.msk.msra.mxu0 %vm1084_vm0, %v5096_v39  ;;  %v346_v39 = vmul.f32 %v5170_v59, %v285_v16  ;;  %v462_v16 = vmax.f32 %v408_v62, 0.0  ;;  %v435_v21 = vadd.f32 %v5179_v0, %v374_v1  ;;  %v412_v1 = vadd.f32 %v5179_v0, %v351_v38  ;;  %v293_v38 = vld [vmem:[%s5164_s15 + $0x70] sm:$0x3] }
  0x99   : > { %v5274_v22 = vmul.f32 %v711_v17, %v484_v3  ;;  %v5277_v23 = vsel %vm936_vm1, %v982_v14, %v983_v15  ;;  %4648 = vmatprep.subr.msk.mxu0 %vm1084_vm0, %v5264_v36  ;;  %v5288_v31 = vmul.f32 %v581_v18, %v458_v13  ;;  %v288_v13 = vld [vmem:[%s5164_s15 + $0x48] sm:$0xff]  ;;  %v434_v17 = vadd.f32 %v5179_v0, %v373_v56 }
  0x9a   : > { %7113 = vst [vmem:[#allocation4_spill] sm:$0xff] %v5277_v23  ;;  %4477 = vmatprep.mubr.msk.f32.mxu1 %vm1019_vm2, %v5277_v23  ;;  %v407_v48 = vadd.f32 %v5179_v0, %v346_v39  ;;  %v349_v28 = vmul.f32 %v5170_v59, %v288_v13  ;;  %v489_v47 = vmax.f32 %v435_v21, 0.0  ;;  %v291_v21 = vld [vmem:[%s5164_s15 + $0x60] sm:$0xff] }
  0x9b   : > { %v985_v30 = vrot.slane %v5274_v22, 1  ;;  %v942_v50 = vrot.slane %v5288_v31, 1 }
  0x9c   : > { %v586_v32 = vpop.permute.xlu0 %585  ;;  %v591_v33 = vpop.permute.xlu1 %590  ;;  %v461_v9 = vmax.f32 %v407_v48, 0.0  ;;  %v315_v48 = vld [vmem:[%s5164_s15 + $0x120] sm:$0xff] }
  0x9d   : > { %v5294_v42 = vmul.f32 %v586_v32, %v459_v19  ;;  %v5296_v44 = vmul.f32 %v591_v33, %v460_v26  ;;  %v5299_v45 = vsel %vm936_vm1, %v983_v15, %v985_v30  ;;  %v289_v26 = vld [vmem:[%s5164_s15 + $0x50] sm:$0xff]  ;;  %v436_v30 = vadd.f32 %v5179_v0, %v375_v12 }
  0x9e   : > { %7114 = vst [vmem:[#allocation5_spill] sm:$0xff] %v5299_v45  ;;  %4478 = vmatmul.mubr.msk.f32.gmra.mxu1 %vm1019_vm2, %v5299_v45  ;;  %v350_v37 = vmul.f32 %v5170_v59, %v289_v26  ;;  %v376_v2 = vmul.f32 %v5170_v59, %v315_v48 }
  0x9f   : > { %v945_v49 = vrot.slane %v5296_v44, 1  ;;  %v943_v51 = vrot.slane %v5294_v42, 1 }
  0xa0   : > { %v716_v57 = vpop.permute.xlu0 %715  ;;  %v721_v60 = vpop.permute.xlu1 %720  ;;  %v411_v63 = vadd.f32 %v5179_v0, %v350_v37  ;;  %v292_v37 = vld [vmem:[%s5164_s15 + $0x68] sm:$0xff] }
  0xa1   : > { %v5313_v3 = vmul.f32 %v716_v57, %v485_v35  ;;  %v5315_v4 = vmul.f32 %v721_v60, %v486_v46  ;;  %v5318_v5 = vsel %vm936_vm1, %v942_v50, %v943_v51  ;;  %v5321_v6 = vsel %vm936_vm1, %v943_v51, %v945_v49  ;;  %v316_v49 = vld [vmem:[%s5164_s15 + $0x128] sm:$0xff] }
  0xa2   : > { %7115 = vst [vmem:[#allocation6_spill] sm:$0xff] %v5318_v5  ;;  %7116 = vst [vmem:[#allocation7_spill] sm:$0xff] %v5321_v6  ;;  %4453 = vmatprep.mubr.msk.f32.mxu0 %vm1019_vm2, %v5318_v5  ;;  %v488_v35 = vmax.f32 %v434_v17, 0.0  ;;  %v410_v50 = vadd.f32 %v5179_v0, %v349_v28  ;;  %v490_v60 = vmax.f32 %v436_v30, 0.0  ;;  %v465_v28 = vmax.f32 %v411_v63, 0.0 }
  0xa3   : > { %4454 = vmatmul.mubr.msk.f32.gmra.mxu0 %vm1019_vm2, %v5321_v6  ;;  %v987_v10 = vrot.slane %v5313_v3, 1  ;;  %v988_v11 = vrot.slane %v5315_v4, 1  ;;  %v302_v6 = vld [vmem:[%s5164_s15 + $0xb8] sm:$0x3] }
  0xa4   : > { %v726_v14 = vpop.permute.xlu0 %725  ;;  %v596_v15 = vpop.permute.xlu1 %595 }
  0xa5   : > { %v5332_v18 = vmul.f32 %v726_v14, %v487_v61  ;;  %v5335_v19 = vsel %vm936_vm1, %v987_v10, %v988_v11  ;;  %v5344_v39 = vmul.f32 %v596_v15, %v461_v9  ;;  %v377_v9 = vmul.f32 %v5170_v59, %v316_v49  ;;  %v317_v10 = vld [vmem:[%s5164_s15 + $0x130] sm:$0x3] }
  0xa6   : > { %7117 = vst [vmem:[#allocation8_spill] sm:$0xff] %v5335_v19  ;;  %4480 = vmatprep.mubr.msk.f32.mxu1 %vm1019_vm2, %v5335_v19  ;;  %v464_v15 = vmax.f32 %v410_v50, 0.0 }
  0xa7   : > { %v990_v29 = vrot.slane %v5332_v18, 1  ;;  %v947_v56 = vrot.slane %v5344_v39, 1 }
  0xa8   : > { %v601_v32 = vpop.permute.xlu0 %600  ;;  %v606_v33 = vpop.permute.xlu1 %605 }
  0xa9   : > { %v5349_v40 = vmul.f32 %v601_v32, %v462_v16  ;;  %v5351_v41 = vmul.f32 %v606_v33, %v463_v20  ;;  %v5354_v46 = vsel %vm936_vm1, %v988_v11, %v990_v29  ;;  %v378_v20 = vmul.f32 %v5170_v59, %v317_v10  ;;  %v319_v10 = vld [vmem:[%s5164_s15 + $0x140] sm:$0xff] }
  0xaa   : > { %7118 = vst [vmem:[#allocation9_spill] sm:$0xff] %v5354_v46  ;;  %4481 = vmatmul.mubr.msk.f32.gmra.mxu1 %vm1019_vm2, %v5354_v46  ;;  %v437_v29 = vadd.f32 %v5179_v0, %v376_v2  ;;  %v466_v33 = vmax.f32 %v412_v1, 0.0 }
  0xab   : > { %v950_v51 = vrot.slane %v5351_v41, 1  ;;  %v948_v57 = vrot.slane %v5349_v40, 1  ;;  %v439_v50 = vadd.f32 %v5179_v0, %v378_v20 }
  0xac   : > { %v731_v61 = vpop.permute.xlu0 %730  ;;  %v736_v62 = vpop.permute.xlu1 %735 }
  0xad   : > { %v5369_v11 = vmul.f32 %v731_v61, %v488_v35  ;;  %v5371_v12 = vmul.f32 %v736_v62, %v489_v47  ;;  %v5374_v13 = vsel %vm936_vm1, %v947_v56, %v948_v57  ;;  %v5377_v14 = vsel %vm936_vm1, %v948_v57, %v950_v51 }
  0xae   : > { %7119 = vst [vmem:[#allocation10_spill] sm:$0xff] %v5374_v13  ;;  %7120 = vst [vmem:[#allocation11_spill] sm:$0xff] %v5377_v14  ;;  %4456 = vmatprep.mubr.msk.f32.mxu0 %vm1019_vm2, %v5374_v13  ;;  %v438_v35 = vadd.f32 %v5179_v0, %v377_v9  ;;  %v352_v47 = vmul.f32 %v5170_v59, %v291_v21  ;;  %v491_v57 = vmax.f32 %v437_v29, 0.0  ;;  %v318_v9 = vld [vmem:[%s5164_s15 + $0x138] sm:$0xff] }
  0xaf   : > { %4457 = vmatmul.mubr.msk.f32.gmra.mxu0 %vm1019_vm2, %v5377_v14  ;;  %v992_v16 = vrot.slane %v5369_v11, 1  ;;  %v993_v17 = vrot.slane %v5371_v12, 1  ;;  %v354_v61 = vmul.f32 %v5170_v59, %v293_v38  ;;  %v324_v14 = vld [vmem:[%s5164_s15 + $0x168] sm:$0xff]  ;;  %v326_v13 = vld [vmem:[%s5164_s15 + $0x178] sm:$0x3] }
  0xb0   : > { %v741_v26 = vpop.permute.xlu0 %740  ;;  %v611_v27 = vpop.permute.xlu1 %610  ;;  %v492_v2 = vmax.f32 %v438_v35, 0.0  ;;  %v380_v35 = vmul.f32 %v5170_v59, %v319_v10 }
  0xb1   : > { %v5388_v30 = vmul.f32 %v741_v26, %v490_v60  ;;  %v5391_v32 = vsel %vm936_vm1, %v992_v16, %v993_v17  ;;  %v5400_v49 = vmul.f32 %v611_v27, %v464_v15  ;;  %v353_v60 = vmul.f32 %v5170_v59, %v292_v37  ;;  %v320_v37 = vld [vmem:[%s5164_s15 + $0x148] sm:$0x3] }
  0xb2   : > { %7121 = vst [vmem:[#allocation12_spill] sm:$0xff] %v5391_v32  ;;  %4483 = vmatprep.mubr.msk.f32.mxu1 %vm1019_vm2, %v5391_v32  ;;  %v413_v15 = vadd.f32 %v5179_v0, %v352_v47  ;;  %v493_v26 = vmax.f32 %v439_v50, 0.0  ;;  %v415_v29 = vadd.f32 %v5179_v0, %v354_v61  ;;  %v294_v61 = vld [vmem:[%s5164_s15 + $0x78] sm:$0xff] }
  0xb3   : > { %v995_v48 = vrot.slane %v5388_v30, 1  ;;  %v952_v20 = vrot.slane %v5400_v49, 1 }
  0xb4   : > { %v616_v51 = vpop.permute.xlu0 %615  ;;  %v621_v56 = vpop.permute.xlu1 %620 }
  0xb5   : > { %v5405_v62 = vmul.f32 %v616_v51, %v465_v28  ;;  %v5407_v63 = vmul.f32 %v621_v56, %v466_v33  ;;  %v5410_v1 = vsel %vm936_vm1, %v993_v17, %v995_v48  ;;  %v414_v17 = vadd.f32 %v5179_v0, %v353_v60 }
  0xb6   : > { %7122 = vst [vmem:[#allocation13_spill] sm:$0xff] %v5410_v1  ;;  %4484 = vmatmul.mubr.msk.f32.gmra.mxu1 %vm1019_vm2, %v5410_v1  ;;  %v379_v33 = vmul.f32 %v5170_v59, %v318_v9  ;;  %v467_v51 = vmax.f32 %v413_v15, 0.0  ;;  %v381_v60 = vmul.f32 %v5170_v59, %v320_v37  ;;  %v441_v15 = vadd.f32 %v5179_v0, %v380_v35  ;;  %v296_v1 = vld [vmem:[%s5164_s15 + $0x88] sm:$0x3] }
  0xb7   : > { %v955_v16 = vrot.slane %v5407_v63, 1  ;;  %v953_v21 = vrot.slane %v5405_v62, 1  ;;  %v468_v10 = vmax.f32 %v414_v17, 0.0  ;;  %v355_v37 = vmul.f32 %v5170_v59, %v294_v61 }
  0xb8   : > { %v746_v27 = vpop.permute.xlu0 %745  ;;  %v751_v28 = vpop.permute.xlu1 %750  ;;  %v357_v32 = vmul.f32 %v5170_v59, %v296_v1  ;;  %v495_v61 = vmax.f32 %v441_v15, 0.0 }
  0xb9   : > { %v5425_v38 = vmul.f32 %v746_v27, %v491_v57  ;;  %v5427_v47 = vmul.f32 %v751_v28, %v492_v2  ;;  %v5430_v48 = vsel %vm936_vm1, %v952_v20, %v953_v21  ;;  %v5433_v50 = vsel %vm936_vm1, %v953_v21, %v955_v16  ;;  %v295_v28 = vld [vmem:[%s5164_s15 + $0x80] sm:$0xff] }
  0xba   : > { %7123 = vst [vmem:[#allocation14_spill] sm:$0xff] %v5430_v48  ;;  %7124 = vst [vmem:[#allocation15_spill] sm:$0xff] %v5433_v50  ;;  %4459 = vmatprep.mubr.msk.f32.mxu0 %vm1019_vm2, %v5430_v48  ;;  %v440_v16 = vadd.f32 %v5179_v0, %v379_v33  ;;  %v469_v27 = vmax.f32 %v415_v29, 0.0  ;;  %v356_v35 = vmul.f32 %v5170_v59, %v295_v28 }
  0xbb   : > { %4460 = vmatmul.mubr.msk.f32.gmra.mxu0 %vm1019_vm2, %v5433_v50  ;;  %v997_v56 = vrot.slane %v5425_v38, 1  ;;  %v998_v57 = vrot.slane %v5427_v47, 1  ;;  %v418_v15 = vadd.f32 %v5179_v0, %v357_v32 }
  0xbc   : > { %v756_v2 = vpop.permute.xlu0 %755  ;;  %v626_v9 = vpop.permute.xlu1 %625  ;;  %v494_v29 = vmax.f32 %v440_v16, 0.0 }
  0xbd   : > { %v5444_v20 = vmul.f32 %v756_v2, %v493_v26  ;;  %v5447_v21 = vsel %vm936_vm1, %v997_v56, %v998_v57  ;;  %v5456_v33 = vmul.f32 %v626_v9, %v467_v51  ;;  %v442_v26 = vadd.f32 %v5179_v0, %v381_v60  ;;  %v321_v51 = vld [vmem:[%s5164_s15 + $0x150] sm:$0xff]  ;;  %v322_v9 = vld [vmem:[%s5164_s15 + $0x158] sm:$0xff] }
  0xbe   : > { %7125 = vst [vmem:[#allocation16_spill] sm:$0xff] %v5447_v21  ;;  %4486 = vmatprep.mubr.msk.f32.mxu1 %vm1019_vm2, %v5447_v21  ;;  %v416_v60 = vadd.f32 %v5179_v0, %v355_v37  ;;  %v472_v55 = vmax.f32 %v418_v15, 0.0 }
  0xbf   : > { %v1000_v17 = vrot.slane %v5444_v20, 1  ;;  %v957_v1 = vrot.slane %v5456_v33, 1 }
  0xc0   : > { %v631_v56 = vpop.permute.xlu0 %630  ;;  %v636_v2 = vpop.permute.xlu1 %635  ;;  %v470_v32 = vmax.f32 %v416_v60, 0.0 }
  0xc1   : > { %v5461_v46 = vmul.f32 %v631_v56, %v468_v10  ;;  %v5463_v19 = vmul.f32 %v636_v2, %v469_v27  ;;  %v5466_v21 = vsel %vm936_vm1, %v998_v57, %v1000_v17  ;;  %v496_v27 = vmax.f32 %v442_v26, 0.0 }
  0xc2   : > { %7126 = vst [vmem:[#allocation17_spill] sm:$0xff] %v5466_v21  ;;  %4487 = vmatmul.mubr.msk.f32.gmra.mxu1 %vm1019_vm2, %v5466_v21  ;;  %v417_v57 = vadd.f32 %v5179_v0, %v356_v35  ;;  %v382_v17 = vmul.f32 %v5170_v59, %v321_v51  ;;  %v383_v2 = vmul.f32 %v5170_v59, %v322_v9  ;;  %v323_v21 = vld [vmem:[%s5164_s15 + $0x160] sm:$0x3]  ;;  %v297_v51 = vld [vmem:[%s5164_s15 + $0x90] sm:$0xff] }
  0xc3   : > { %v960_v16 = vrot.slane %v5463_v19, 1  ;;  %v958_v10 = vrot.slane %v5461_v46, 1 }
  0xc4   : > { %v761_v28 = vpop.permute.xlu0 %760  ;;  %v766_v56 = vpop.permute.xlu1 %765  ;;  %v444_v60 = vadd.f32 %v5179_v0, %v383_v2  ;;  %v359_v2 = vmul.f32 %v5170_v59, %v298_v54 }
  0xc5   : > { %v5481_v37 = vmul.f32 %v761_v28, %v494_v29  ;;  %v5483_v45 = vmul.f32 %v766_v56, %v495_v61  ;;  %v5486_v23 = vsel %vm936_vm1, %v957_v1, %v958_v10  ;;  %v5489_v26 = vsel %vm936_vm1, %v958_v10, %v960_v16 }
  0xc6   : > { %7127 = vst [vmem:[#allocation18_spill] sm:$0xff] %v5486_v23  ;;  %7128 = vst [vmem:[#allocation19_spill] sm:$0xff] %v5489_v26  ;;  %4462 = vmatprep.mubr.msk.f32.mxu0 %vm1019_vm2, %v5486_v23  ;;  %v384_v61 = vmul.f32 %v5170_v59, %v323_v21  ;;  %v471_v16 = vmax.f32 %v417_v57, 0.0  ;;  %v443_v10 = vadd.f32 %v5179_v0, %v382_v17 }
  0xc7   : > { %4463 = vmatmul.mubr.msk.f32.gmra.mxu0 %vm1019_vm2, %v5489_v26  ;;  %v1002_v29 = vrot.slane %v5481_v37, 1  ;;  %v1003_v35 = vrot.slane %v5483_v45, 1  ;;  %v299_v26 = vld [vmem:[%s5164_s15 + $0xa0] sm:$0x3]  ;;  %v358_v21 = vmul.f32 %v5170_v59, %v297_v51  ;;  %v498_v51 = vmax.f32 %v444_v60, 0.0 }
  0xc8   : > { %v771_v9 = vpop.permute.xlu0 %770  ;;  %v641_v1 = vpop.permute.xlu1 %640  ;;  %v497_v15 = vmax.f32 %v443_v10, 0.0  ;;  %v360_v23 = vmul.f32 %v5170_v59, %v299_v26 }
  0xc9   : > { %v5500_v28 = vmul.f32 %v771_v9, %v496_v27  ;;  %v5503_v56 = vsel %vm936_vm1, %v1002_v29, %v1003_v35  ;;  %v5512_v17 = vmul.f32 %v641_v1, %v470_v32  ;;  %v445_v27 = vadd.f32 %v5179_v0, %v384_v61  ;;  %v325_v32 = vld [vmem:[%s5164_s15 + $0x170] sm:$0xff] }
  0xca   : > { %7129 = vst [vmem:[#allocation20_spill] sm:$0xff] %v5503_v56  ;;  %4489 = vmatprep.mubr.msk.f32.mxu1 %vm1019_vm2, %v5503_v56  ;;  %v419_v61 = vadd.f32 %v5179_v0, %v358_v21  ;;  %v421_v60 = vadd.f32 %v5179_v0, %v360_v23 }
  0xcb   : > { %v1005_v57 = vrot.slane %v5500_v28, 1  ;;  %v962_v26 = vrot.slane %v5512_v17, 1 }
  0xcc   : > { %v646_v29 = vpop.permute.xlu0 %645  ;;  %v651_v9 = vpop.permute.xlu1 %650  ;;  %v473_v23 = vmax.f32 %v419_v61, 0.0 }
  0xcd   : > { %v5517_v50 = vmul.f32 %v646_v29, %v471_v16  ;;  %v5519_v48 = vmul.f32 %v651_v9, %v472_v55  ;;  %v5522_v56 = vsel %vm936_vm1, %v1003_v35, %v1005_v57  ;;  %v499_v55 = vmax.f32 %v445_v27, 0.0 }
  0xce   : > { %7130 = vst [vmem:[#allocation21_spill] sm:$0xff] %v5522_v56  ;;  %4490 = vmatmul.mubr.msk.f32.gmra.mxu1 %vm1019_vm2, %v5522_v56  ;;  %v420_v35 = vadd.f32 %v5179_v0, %v359_v2  ;;  %v385_v57 = vmul.f32 %v5170_v59, %v324_v14  ;;  %v386_v29 = vmul.f32 %v5170_v59, %v325_v32 }
  0xcf   : > { %v965_v54 = vrot.slane %v5519_v48, 1  ;;  %v963_v1 = vrot.slane %v5517_v50, 1 }
  0xd0   : > { %v776_v16 = vpop.permute.xlu0 %775  ;;  %v781_v10 = vpop.permute.xlu1 %780  ;;  %v474_v32 = vmax.f32 %v420_v35, 0.0  ;;  %v447_v61 = vadd.f32 %v5179_v0, %v386_v29  ;;  %v363_v29 = vmul.f32 %v5170_v59, %v302_v6 }
  0xd1   : > { %v5536_v9 = vmul.f32 %v776_v16, %v497_v15  ;;  %v5538_v21 = vmul.f32 %v781_v10, %v498_v51  ;;  %v5541_v56 = vsel %vm936_vm1, %v962_v26, %v963_v1  ;;  %v5544_v27 = vsel %vm936_vm1, %v963_v1, %v965_v54  ;;  %v300_v1 = vld [vmem:[%s5164_s15 + $0xa8] sm:$0xff] }
  0xd2   : > { %7133 = vst [vmem:[#allocation24_spill] sm:$0xff] %v5541_v56  ;;  %7134 = vst [vmem:[#allocation25_spill] sm:$0xff] %v5544_v27  ;;  %4465 = vmatprep.mubr.msk.f32.mxu0 %vm1019_vm2, %v5541_v56  ;;  %v446_v54 = vadd.f32 %v5179_v0, %v385_v57  ;;  %v387_v26 = vmul.f32 %v5170_v59, %v326_v13  ;;  %v475_v56 = vmax.f32 %v421_v60, 0.0 }
  0xd3   : > { %7131 = vst [vmem:[#allocation22_spill] sm:$0xff] %v5536_v9  ;;  %7132 = vst [vmem:[#allocation23_spill] sm:$0xff] %v5538_v21  ;;  %4466 = vmatmul.mubr.msk.f32.gmra.mxu0 %vm1019_vm2, %v5544_v27  ;;  %v1007_v14 = vrot.slane %v5536_v9, 1  ;;  %v1008_v15 = vrot.slane %v5538_v21, 1  ;;  %v301_v27 = vld [vmem:[%s5164_s15 + $0xb0] sm:$0xff]  ;;  %v361_v13 = vmul.f32 %v5170_v59, %v300_v1 }
  0xd4   : > { %v786_v2 = vpop.permute.xlu0 %785  ;;  %v656_v51 = vpop.permute.xlu1 %655  ;;  %v362_v60 = vmul.f32 %v5170_v59, %v301_v27 }
  0xd5   : > { %v5556_v16 = vmul.f32 %v786_v2, %v499_v55  ;;  %v5559_v10 = vsel %vm936_vm1, %v1007_v14, %v1008_v15  ;;  %v5567_v5 = vmul.f32 %v656_v51, %v473_v23  ;;  %v500_v2 = vmax.f32 %v446_v54, 0.0 }
  0xd6   : > { %7135 = vst [vmem:[#allocation26_spill] sm:$0xff] %v5559_v10  ;;  %4492 = vmatprep.mubr.msk.f32.mxu1 %vm1019_vm2, %v5559_v10  ;;  %v448_v14 = vadd.f32 %v5179_v0, %v387_v26  ;;  %v501_v23 = vmax.f32 %v447_v61, 0.0  ;;  %v422_v27 = vadd.f32 %v5179_v0, %v361_v13 }
  0xd7   : > { %v1010_v35 = vrot.slane %v5556_v16, 1  ;;  %v967_v54 = vrot.slane %v5567_v5, 1 }
  0xd8   : > { %v661_v57 = vpop.permute.xlu0 %660  ;;  %v666_v55 = vpop.permute.xlu1 %665  ;;  %v476_v13 = vmax.f32 %v422_v27, 0.0 }
  0xd9   : > { %v5573_v21 = vmul.f32 %v661_v57, %v474_v32  ;;  %v5575_v9 = vmul.f32 %v666_v55, %v475_v56  ;;  %v5578_v10 = vsel %vm936_vm1, %v1008_v15, %v1010_v35  ;;  %v502_v32 = vmax.f32 %v448_v14, 0.0 }
  0xda   : > { %7136 = vst [vmem:[#allocation27_spill] sm:$0xff] %v5578_v10  ;;  %4493 = vmatmul.mubr.msk.f32.gmra.mxu1 %vm1019_vm2, %v5578_v10  ;;  %v423_v56 = vadd.f32 %v5179_v0, %v362_v60  ;;  %v424_v15 = vadd.f32 %v5179_v0, %v363_v29 }
  0xdb   : > { %v970_v51 = vrot.slane %v5575_v9, 1  ;;  %v968_v26 = vrot.slane %v5573_v21, 1 }
  0xdc   : > { %v791_v59 = vpop.permute.xlu0 %790  ;;  %v796_v6 = vpop.permute.xlu1 %795 }
  0xdd   : > { %v5588_v1 = vmul.f32 %v791_v59, %v500_v2  ;;  %v5590_v61 = vmul.f32 %v796_v6, %v501_v23  ;;  %v5593_v35 = vsel %vm936_vm1, %v967_v54, %v968_v26  ;;  %v5596_v57 = vsel %vm936_vm1, %v968_v26, %v970_v51 }
  0xde   : > { %7137 = vst [vmem:[#allocation28_spill] sm:$0xff] %v5593_v35  ;;  %7138 = vst [vmem:[#allocation29_spill] sm:$0xff] %v5596_v57  ;;  %4468 = vmatprep.mubr.msk.f32.mxu0 %vm1019_vm2, %v5593_v35  ;;  %v477_v23 = vmax.f32 %v423_v56, 0.0  ;;  %v478_v51 = vmax.f32 %v424_v15, 0.0  ;;  %v1607_v56 = vrot.slane %v5220_v52, 2 }
  0xdf   : > { %4469 = vmatmul.mubr.msk.f32.gmra.mxu0 %vm1019_vm2, %v5596_v57  ;;  %v1012_v55 = vrot.slane %v5588_v1, 1  ;;  %v1013_v0 = vrot.slane %v5590_v61, 1 }
  0xe0   : > { %v801_v2 = vpop.permute.xlu0 %800  ;;  %v671_v14 = vpop.permute.xlu1 %670 }
  0xe1   : > { %v5604_v60 = vmul.f32 %v801_v2, %v502_v32  ;;  %v5607_v29 = vsel %vm936_vm1, %v1012_v55, %v1013_v0  ;;  %v5612_v26 = vmul.f32 %v671_v14, %v476_v13  ;;  %v1606_v2 = vrot.slane %v5214_v43, 2 }
  0xe2   : > { %7139 = vst [vmem:[#allocation30_spill] sm:$0xff] %v5607_v29  ;;  %4495 = vmatprep.mubr.msk.f32.mxu1 %vm1019_vm2, %v5607_v29 }
  0xe3   : > { %v1015_v54 = vrot.slane %v5604_v60, 1  ;;  %v972_v13 = vrot.slane %v5612_v26, 1 }
  0xe4   : > { %v676_v27 = vpop.permute.xlu0 %675  ;;  %v681_v59 = vpop.permute.xlu1 %680 }
  0xe5   : > { %v5614_v6 = vmul.f32 %v676_v27, %v477_v23  ;;  %v5616_v10 = vmul.f32 %v681_v59, %v478_v51  ;;  %v5619_v32 = vsel %vm936_vm1, %v1013_v0, %v1015_v54  ;;  %v1609_v23 = vrot.slane %v5222_v53, 2  ;;  %v5644_v51 = vld [vmem:[%s7014_s1 + $0x14] sm:$0xf]  ;;  %v5665_v59 = vld [vmem:[%s7014_s1 + $0x18] sm:$0xf] }
  0xe6   : > { %7140 = vst [vmem:[#allocation31_spill] sm:$0xff] %v5619_v32  ;;  %4496 = vmatmul.mubr.msk.f32.gmra.mxu1 %vm1019_vm2, %v5619_v32  ;;  %v1612_v53 = vrot.slane %v5294_v42, 2  ;;  %v1614_v27 = vrot.slane %v5296_v44, 2  ;;  %v1616_v44 = vrot.slane %v5344_v39, 2 }
  0xe7   : > { %v975_v15 = vrot.slane %v5616_v10, 1  ;;  %4500 = vmatprep.mubr.msk.f32.mxu1 %vm1019_vm2, %v5214_v43  ;;  %v973_v55 = vrot.slane %v5614_v6, 1  ;;  %v1608_v43 = vsel %vm1605_vm3, %v1606_v2, %v1607_v56  ;;  %v1610_v54 = vsel %vm1605_vm3, %v1607_v56, %v1609_v23 }
  0xe8   : > { %v1617_v56 = vrot.slane %v5349_v40, 2  ;;  %v1624_v2 = vrot.slane %v5407_v63, 2  ;;  %v1626_v63 = vrot.slane %v5456_v33, 2 }
  0xe9   : > { %v5631_v14 = vsel %vm936_vm1, %v972_v13, %v973_v55  ;;  %v5634_v0 = vsel %vm936_vm1, %v973_v55, %v975_v15  ;;  %v1619_v15 = vrot.slane %v5351_v41, 2  ;;  %v5685_v13 = vsel %vm1605_vm3, %v1612_v53, %v1614_v27 }
  0xea   : > { %7141 = vst [vmem:[#allocation32_spill] sm:$0xff] %v5631_v14  ;;  %7142 = vst [vmem:[#allocation33_spill] sm:$0xff] %v5634_v0  ;;  %4471 = vmatprep.mubr.msk.f32.mxu0 %vm1019_vm2, %v5631_v14  ;;  %4501 = vmatmul.mubr.msk.f32.vlgmr.msra.gmra.mxu1 %vm1019_vm2, %v5220_v52  ;;  %v1611_v52 = vrot.slane %v5288_v31, 2  ;;  %v1622_v55 = vrot.slane %v5405_v62, 2  ;;  %v1621_v41 = vrot.slane %v5400_v49, 2 }
  0xeb   : > { %4472 = vmatmul.mubr.msk.f32.gmra.mxu0 %vm1019_vm2, %v5634_v0  ;;  %4503 = vmatprep.mubr.msk.f32.mxu1 %vm1019_vm2, %v5288_v31  ;;  %v5702_v23 = vsel %vm1605_vm3, %v1617_v56, %v1619_v15 }
  0xec   : > { %4550 = vmatprep.mubr.msk.f32.mxu0 %vm1019_vm2, %v1608_v43  ;;  %4599 = vmatpush3.msk.msra.mxu1 %vm1084_vm0, %v5237_v58  ;;  %v5671_v58 = vsel %vm1605_vm3, %v1611_v52, %v1612_v53  ;;  %v5709_v43 = vsel %vm1605_vm3, %v1621_v41, %v1622_v55  ;;  %v1627_v53 = vrot.slane %v5461_v46, 2  ;;  %v1629_v52 = vrot.slane %v5463_v19, 2 }
  0xed   : > { %4698 = vmatprep.subr.msk.mxu1 %vm1084_vm0, %v5644_v51  ;;  %v1631_v19 = vrot.slane %v5512_v17, 2  ;;  %v1637_v41 = vrot.slane %v5573_v21, 2 }
  0xee   : > { %4504 = vmatmul.mubr.msk.f32.gmra.mxu1 %vm1019_vm2, %v5294_v42  ;;  %v5726_v27 = vsel %vm1605_vm3, %v1626_v63, %v1627_v53  ;;  %v5736_v15 = vsel %vm1605_vm3, %v1627_v53, %v1629_v52  ;;  %v1642_v52 = vrot.slane %v5614_v6, 2 }
  0xef   : > { %4506 = vmatprep.mubr.msk.f32.mxu1 %vm1019_vm2, %v5344_v39  ;;  %4551 = vmatmul.mubr.msk.f32.vlgmr.msra.gmra.mxu0 %vm1019_vm2, %v1610_v54  ;;  %v5719_v54 = vsel %vm1605_vm3, %v1622_v55, %v1624_v2  ;;  %v1639_v2 = vrot.slane %v5575_v9, 2  ;;  %v1641_v9 = vrot.slane %v5612_v26, 2 }
  0xf0   : > { %4649 = vmatpush3.msk.msra.mxu0 %vm1084_vm0, %v5264_v36  ;;  %4553 = vmatprep.mubr.msk.f32.mxu0 %vm1019_vm2, %v5671_v58  ;;  %v5692_v36 = vsel %vm1605_vm3, %v1616_v44, %v1617_v56  ;;  %v1632_v56 = vrot.slane %v5517_v50, 2  ;;  %v1634_v44 = vrot.slane %v5519_v48, 2  ;;  %v1636_v48 = vrot.slane %v5567_v5, 2 }
  0xf1   : > { %4748 = vmatprep.subr.msk.mxu0 %vm1084_vm0, %v5665_v59 }
  0xf2   : > { %4507 = vmatmul.mubr.msk.f32.gmra.mxu1 %vm1019_vm2, %v5349_v40  ;;  %v5743_v55 = vsel %vm1605_vm3, %v1631_v19, %v1632_v56  ;;  %v5753_v53 = vsel %vm1605_vm3, %v1632_v56, %v1634_v44  ;;  %v5760_v63 = vsel %vm1605_vm3, %v1636_v48, %v1637_v41  ;;  %v1644_v19 = vrot.slane %v5616_v10, 2 }
  0xf3   : > { %4509 = vmatprep.mubr.msk.f32.mxu1 %vm1019_vm2, %v5400_v49  ;;  %4554 = vmatmul.mubr.msk.f32.gmra.mxu0 %vm1019_vm2, %v5685_v13  ;;  %v5770_v56 = vsel %vm1605_vm3, %v1637_v41, %v1639_v2  ;;  %v5777_v44 = vsel %vm1605_vm3, %v1641_v9, %v1642_v52  ;;  %v1647_v48 = vrot.slane %v5208_v34, 2  ;;  %v1646_v10 = vrot.slane %v5201_v25, 2 }
  0xf4   : > { %4556 = vmatprep.mubr.msk.f32.mxu0 %vm1019_vm2, %v5692_v36  ;;  %7143 = vst [vmem:[#allocation34_spill] sm:$0xff] %v5770_v56  ;;  %7144 = vst [vmem:[#allocation35_spill] sm:$0xff] %v5777_v44  ;;  %v5786_v41 = vsel %vm1605_vm3, %v1642_v52, %v1644_v19  ;;  %v1651_v9 = vrot.slane %v5250_v7, 2  ;;  %v1654_v52 = vrot.slane %v5274_v22, 2  ;;  %v1659_v22 = vrot.slane %v5332_v18, 2 }
  0xf5   : > { %v5793_v2 = vsel %vm1605_vm3, %v1646_v10, %v1647_v48  ;;  %v1664_v18 = vrot.slane %v5388_v30, 2  ;;  %v1669_v30 = vrot.slane %v5444_v20, 2  ;;  %v1674_v20 = vrot.slane %v5500_v28, 2 }
  0xf6   : > { %4510 = vmatmul.mubr.msk.f32.gmra.mxu1 %vm1019_vm2, %v5405_v62  ;;  %7145 = vst [vmem:[#allocation36_spill] sm:$0xff] %v5793_v2  ;;  %v1679_v28 = vrot.slane %v5556_v16, 2  ;;  %v1684_v16 = vrot.slane %v5604_v60, 2 }
  0xf7   : > { %4512 = vmatprep.mubr.msk.f32.mxu1 %vm1019_vm2, %v5456_v33  ;;  %4557 = vmatmul.mubr.msk.f32.gmra.mxu0 %vm1019_vm2, %v5702_v23 }
  0xf8   : > { %4559 = vmatprep.mubr.msk.f32.mxu0 %vm1019_vm2, %v5709_v43 }
  0xfa   : > { %4513 = vmatmul.mubr.msk.f32.gmra.mxu1 %vm1019_vm2, %v5461_v46 }
  0xfb   : > { %4515 = vmatprep.mubr.msk.f32.mxu1 %vm1019_vm2, %v5512_v17  ;;  %4560 = vmatmul.mubr.msk.f32.gmra.mxu0 %vm1019_vm2, %v5719_v54 }
  0xfc   : > { %4562 = vmatprep.mubr.msk.f32.mxu0 %vm1019_vm2, %v5726_v27 }
  0xfe   : > { %4516 = vmatmul.mubr.msk.f32.gmra.mxu1 %vm1019_vm2, %v5517_v50 }
  0xff   : > { %4518 = vmatprep.mubr.msk.f32.mxu1 %vm1019_vm2, %v5567_v5  ;;  %4563 = vmatmul.mubr.msk.f32.gmra.mxu0 %vm1019_vm2, %v5736_v15 }
 0x100   : > { %4565 = vmatprep.mubr.msk.f32.mxu0 %vm1019_vm2, %v5743_v55 }
 0x102   : > { %4519 = vmatmul.mubr.msk.f32.gmra.mxu1 %vm1019_vm2, %v5573_v21 }
 0x103   : > { %4521 = vmatprep.mubr.msk.f32.mxu1 %vm1019_vm2, %v5612_v26  ;;  %4566 = vmatmul.mubr.msk.f32.gmra.mxu0 %vm1019_vm2, %v5753_v53 }
 0x104   : > { %4568 = vmatprep.mubr.msk.f32.mxu0 %vm1019_vm2, %v5760_v63 }
 0x106   : > { %4522 = vmatmul.mubr.msk.f32.gmra.mxu1 %vm1019_vm2, %v5614_v6 }
 0x107   : > { %4524 = vmatprep.mubr.msk.f32.mxu1 %vm1019_vm2, %v5201_v25  ;;  %4569 = vmatmul.mubr.msk.f32.gmra.mxu0 %vm1019_vm2, %v5770_v56  ;;  %v1649_v56 = vrot.slane %v5199_v24, 2  ;;  %v1656_v24 = vrot.slane %v5313_v3, 2 }
 0x108   : > { %4571 = vmatprep.mubr.msk.f32.mxu0 %vm1019_vm2, %v5777_v44  ;;  %v1652_v44 = vrot.slane %v5252_v8, 2 }
 0x109   : > { %v5804_v19 = vsel %vm1605_vm3, %v1647_v48, %v1649_v56 }
 0x10a   : > { %4525 = vmatmul.mubr.msk.f32.gmra.mxu1 %vm1019_vm2, %v5208_v34  ;;  %v5811_v10 = vsel %vm1605_vm3, %v1651_v9, %v1652_v44  ;;  %v5821_v56 = vsel %vm1605_vm3, %v1652_v44, %v1654_v52  ;;  %v1661_v9 = vrot.slane %v5369_v11, 2 }
 0x10b   : > { %4527 = vmatprep.mubr.msk.f32.mxu1 %vm1019_vm2, %v5250_v7  ;;  %4572 = vmatmul.mubr.msk.f32.gmra.mxu0 %vm1019_vm2, %v5786_v41  ;;  %7146 = vst [vmem:[#allocation37_spill] sm:$0xff] %v5811_v10 }
 0x10c   : > { %4574 = vmatprep.mubr.msk.f32.mxu0 %vm1019_vm2, %v5793_v2  ;;  %v1657_v2 = vrot.slane %v5315_v4, 2 }
 0x10e   : > { %4528 = vmatmul.mubr.msk.f32.gmra.mxu1 %vm1019_vm2, %v5252_v8  ;;  %v5828_v48 = vsel %vm1605_vm3, %v1656_v24, %v1657_v2  ;;  %v5838_v44 = vsel %vm1605_vm3, %v1657_v2, %v1659_v22  ;;  %v1666_v24 = vrot.slane %v5425_v38, 2 }
 0x10f   : > { %4530 = vmatprep.mubr.msk.f32.mxu1 %vm1019_vm2, %v5313_v3  ;;  %4575 = vmatmul.mubr.msk.f32.gmra.mxu0 %vm1019_vm2, %v5804_v19  ;;  %7147 = vst [vmem:[#allocation38_spill] sm:$0xff] %v5828_v48  ;;  %7148 = vst [vmem:[#allocation39_spill] sm:$0xff] %v5838_v44 }
 0x110   : > { %4577 = vmatprep.mubr.msk.f32.mxu0 %vm1019_vm2, %v5811_v10  ;;  %v1662_v10 = vrot.slane %v5371_v12, 2 }
 0x112   : > { %4531 = vmatmul.mubr.msk.f32.gmra.mxu1 %vm1019_vm2, %v5315_v4  ;;  %v5845_v52 = vsel %vm1605_vm3, %v1661_v9, %v1662_v10  ;;  %v5855_v2 = vsel %vm1605_vm3, %v1662_v10, %v1664_v18  ;;  %v1671_v9 = vrot.slane %v5481_v37, 2  ;;  %v7152_v18 = vld [vmem:[#allocation22_spill] sm:$0xff] }
 0x113   : > { %4533 = vmatprep.mubr.msk.f32.mxu1 %vm1019_vm2, %v5369_v11  ;;  %4578 = vmatmul.mubr.msk.f32.gmra.mxu0 %vm1019_vm2, %v5821_v56  ;;  %7149 = vst [vmem:[#allocation40_spill] sm:$0xff] %v5845_v52  ;;  %7150 = vst [vmem:[#allocation41_spill] sm:$0xff] %v5855_v2 }
 0x114   : > { %4580 = vmatprep.mubr.msk.f32.mxu0 %vm1019_vm2, %v5828_v48  ;;  %v1667_v48 = vrot.slane %v5427_v47, 2 }
 0x116   : > { %4534 = vmatmul.mubr.msk.f32.gmra.mxu1 %vm1019_vm2, %v5371_v12  ;;  %v5862_v22 = vsel %vm1605_vm3, %v1666_v24, %v1667_v48  ;;  %v5872_v10 = vsel %vm1605_vm3, %v1667_v48, %v1669_v30 }
 0x117   : > { %4536 = vmatprep.mubr.msk.f32.mxu1 %vm1019_vm2, %v5425_v38  ;;  %4581 = vmatmul.mubr.msk.f32.gmra.mxu0 %vm1019_vm2, %v5838_v44  ;;  %7151 = vst [vmem:[#allocation42_spill] sm:$0xff] %v5862_v22 }
 0x118   : > { %4583 = vmatprep.mubr.msk.f32.mxu0 %vm1019_vm2, %v5845_v52  ;;  %v1672_v52 = vrot.slane %v5483_v45, 2 }
 0x11a   : > { %4537 = vmatmul.mubr.msk.f32.gmra.mxu1 %vm1019_vm2, %v5427_v47  ;;  %v5879_v24 = vsel %vm1605_vm3, %v1671_v9, %v1672_v52  ;;  %v5889_v48 = vsel %vm1605_vm3, %v1672_v52, %v1674_v20  ;;  %v1681_v9 = vrot.slane %v5588_v1, 2  ;;  %v7161_v20 = vld [vmem:[#allocation7_spill] sm:$0xff] }
 0x11b   : > { %4539 = vmatprep.mubr.msk.f32.mxu1 %vm1019_vm2, %v5481_v37  ;;  %4584 = vmatmul.mubr.msk.f32.gmra.mxu0 %vm1019_vm2, %v5855_v2  ;;  %7153 = vst [vmem:[#allocation22_spill] sm:$0xff] %v5879_v24  ;;  %v1676_v2 = vrot.slane %v7152_v18, 2 }
 0x11c   : > { %4586 = vmatprep.mubr.msk.f32.mxu0 %vm1019_vm2, %v5862_v22  ;;  %v7154_v22 = vld [vmem:[#allocation23_spill] sm:$0xff] }
 0x11d   : > { %v1677_v44 = vrot.slane %v7154_v22, 2  ;;  %7155 = vst [vmem:[#allocation23_spill] sm:$0xff] %v5889_v48 }
 0x11e   : > { %4540 = vmatmul.mubr.msk.f32.gmra.mxu1 %vm1019_vm2, %v5483_v45 }
 0x11f   : > { %4542 = vmatprep.mubr.msk.f32.mxu1 %vm1019_vm2, %v7152_v18  ;;  %4587 = vmatmul.mubr.msk.f32.gmra.mxu0 %vm1019_vm2, %v5872_v10  ;;  %v5896_v30 = vsel %vm1605_vm3, %v1676_v2, %v1677_v44  ;;  %v5906_v52 = vsel %vm1605_vm3, %v1677_v44, %v1679_v28  ;;  %v5925_v44 = vld [vmem:[%s7014_s1 + $0x1c] sm:$0xf]  ;;  %v7164_v28 = vld [vmem:[#allocation14_spill] sm:$0xff] }
 0x120   : > { %4589 = vmatprep.mubr.msk.f32.mxu0 %vm1019_vm2, %v5879_v24  ;;  %7156 = vst [vmem:[#allocation43_spill] sm:$0xff] %v5896_v30  ;;  %v1682_v24 = vrot.slane %v5590_v61, 2  ;;  %7157 = vst [vmem:[#allocation44_spill] sm:$0xff] %v5906_v52 }
 0x122   : > { %4543 = vmatmul.mubr.msk.f32.gmra.mxu1 %vm1019_vm2, %v7154_v22  ;;  %v5913_v2 = vsel %vm1605_vm3, %v1681_v9, %v1682_v24  ;;  %v5920_v60 = vsel %vm1605_vm3, %v1682_v24, %v1684_v16  ;;  %v7163_v24 = vld [vmem:[#allocation11_spill] sm:$0xff]  ;;  %v7166_v9 = vld [vmem:[#allocation18_spill] sm:$0xff] }
 0x123   : > { %4545 = vmatprep.mubr.msk.f32.mxu1 %vm1019_vm2, %v5588_v1  ;;  %4590 = vmatmul.mubr.msk.f32.gmra.mxu0 %vm1019_vm2, %v5889_v48  ;;  %7158 = vst [vmem:[#allocation45_spill] sm:$0xff] %v5913_v2  ;;  %7159 = vst [vmem:[#allocation46_spill] sm:$0xff] %v5920_v60  ;;  %v7167_v16 = vld [vmem:[#allocation19_spill] sm:$0xff] }
 0x124   : > { %4592 = vmatprep.mubr.msk.f32.mxu0 %vm1019_vm2, %v5896_v30 }
 0x126   : > { %4546 = vmatmul.mubr.msk.f32.gmra.mxu1 %vm1019_vm2, %v5590_v61 }
 0x127   : > { %4593 = vmatmul.mubr.msk.f32.gmra.mxu0 %vm1019_vm2, %v5906_v52  ;;  %4600 = vmatprep.mubr.msk.f32.mxu1 %vm1019_vm2, %v5288_v31  ;;  %v7160_v31 = vld [vmem:[#allocation6_spill] sm:$0xff] }
 0x128   : > { %4595 = vmatprep.mubr.msk.f32.mxu0 %vm1019_vm2, %v5913_v2  ;;  %v7180_v2 = vld [vmem:[#allocation20_spill] sm:$0xff] }
 0x12a   : > { %4601 = vmatmul.mubr.msk.f32.vlgmr.msra.gmra.mxu1 %vm1019_vm2, %v5294_v42  ;;  %v5942_v42 = vld [vmem:[%s7014_s1 + $0x20] sm:$0xf] }
 0x12b   : > { %4596 = vmatmul.mubr.msk.f32.gmra.mxu0 %vm1019_vm2, %v5920_v60  ;;  %4603 = vmatprep.mubr.msk.f32.mxu1 %vm1019_vm2, %v5344_v39 }
 0x12c   : > { %4650 = vmatprep.mubr.msk.f32.mxu0 %vm1019_vm2, %v7160_v31  ;;  %4699 = vmatpush3.msk.msra.mxu1 %vm1084_vm0, %v5644_v51  ;;  %v7162_v51 = vld [vmem:[#allocation10_spill] sm:$0xff]  ;;  %v7168_v31 = vld [vmem:[#allocation24_spill] sm:$0xff] }
 0x12d   : > { %4798 = vmatprep.subr.msk.mxu1 %vm1084_vm0, %v5925_v44 }
 0x12e   : > { %4604 = vmatmul.mubr.msk.f32.gmra.mxu1 %vm1019_vm2, %v5349_v40 }
 0x12f   : > { %4606 = vmatprep.mubr.msk.f32.mxu1 %vm1019_vm2, %v5400_v49  ;;  %4651 = vmatmul.mubr.msk.f32.vlgmr.msra.gmra.mxu0 %vm1019_vm2, %v7161_v20  ;;  %v7169_v20 = vld [vmem:[#allocation25_spill] sm:$0xff] }
 0x130   : > { %4749 = vmatpush3.msk.msra.mxu0 %vm1084_vm0, %v5665_v59  ;;  %4653 = vmatprep.mubr.msk.f32.mxu0 %vm1019_vm2, %v7162_v51  ;;  %v7165_v59 = vld [vmem:[#allocation15_spill] sm:$0xff] }
 0x131   : > { %4848 = vmatprep.subr.msk.mxu0 %vm1084_vm0, %v5942_v42 }
 0x132   : > { %4607 = vmatmul.mubr.msk.f32.gmra.mxu1 %vm1019_vm2, %v5405_v62 }
 0x133   : > { %4609 = vmatprep.mubr.msk.f32.mxu1 %vm1019_vm2, %v5456_v33  ;;  %4654 = vmatmul.mubr.msk.f32.gmra.mxu0 %vm1019_vm2, %v7163_v24 }
 0x134   : > { %4656 = vmatprep.mubr.msk.f32.mxu0 %vm1019_vm2, %v7164_v28 }
 0x136   : > { %4610 = vmatmul.mubr.msk.f32.gmra.mxu1 %vm1019_vm2, %v5461_v46 }
 0x137   : > { %4612 = vmatprep.mubr.msk.f32.mxu1 %vm1019_vm2, %v5512_v17  ;;  %4657 = vmatmul.mubr.msk.f32.gmra.mxu0 %vm1019_vm2, %v7165_v59 }
 0x138   : > { %4659 = vmatprep.mubr.msk.f32.mxu0 %vm1019_vm2, %v7166_v9  ;;  %v329_v9 = vld [vmem:[%s5164_s15 + $0x190] sm:$0x3] }
 0x13a   : > { %4613 = vmatmul.mubr.msk.f32.gmra.mxu1 %vm1019_vm2, %v5517_v50 }
 0x13b   : > { %4615 = vmatprep.mubr.msk.f32.mxu1 %vm1019_vm2, %v5567_v5  ;;  %4660 = vmatmul.mubr.msk.f32.gmra.mxu0 %vm1019_vm2, %v7167_v16 }
 0x13c   : > { %4662 = vmatprep.mubr.msk.f32.mxu0 %vm1019_vm2, %v7168_v31  ;;  %v7174_v31 = vld [vmem:[#allocation8_spill] sm:$0xff] }
 0x13e   : > { %4616 = vmatmul.mubr.msk.f32.gmra.mxu1 %vm1019_vm2, %v5573_v21 }
 0x13f   : > { %4618 = vmatprep.mubr.msk.f32.mxu1 %vm1019_vm2, %v5612_v26  ;;  %4663 = vmatmul.mubr.msk.f32.gmra.mxu0 %vm1019_vm2, %v7169_v20  ;;  %v328_v20 = vld [vmem:[%s5164_s15 + $0x188] sm:$0xff] }
 0x140   : > { %4665 = vmatprep.mubr.msk.f32.mxu0 %vm1019_vm2, %v5593_v35  ;;  %v7170_v35 = vld [vmem:[#allocation2_spill] sm:$0xff] }
 0x142   : > { %4619 = vmatmul.mubr.msk.f32.gmra.mxu1 %vm1019_vm2, %v5614_v6 }
 0x143   : > { %4621 = vmatprep.mubr.msk.f32.mxu1 %vm1019_vm2, %v5201_v25  ;;  %4666 = vmatmul.mubr.msk.f32.gmra.mxu0 %vm1019_vm2, %v5596_v57  ;;  %v7172_v57 = vld [vmem:[#allocation4_spill] sm:$0xff] }
 0x144   : > { %4668 = vmatprep.mubr.msk.f32.mxu0 %vm1019_vm2, %v5631_v14  ;;  %v7171_v14 = vld [vmem:[#allocation3_spill] sm:$0xff] }
 0x146   : > { %4622 = vmatmul.mubr.msk.f32.gmra.mxu1 %vm1019_vm2, %v5208_v34 }
 0x147   : > { %4624 = vmatprep.mubr.msk.f32.mxu1 %vm1019_vm2, %v5250_v7  ;;  %4669 = vmatmul.mubr.msk.f32.gmra.mxu0 %vm1019_vm2, %v5634_v0  ;;  %v7173_v0 = vld [vmem:[#allocation5_spill] sm:$0xff] }
 0x148   : > { %4671 = vmatprep.mubr.msk.f32.mxu0 %vm1019_vm2, %v7170_v35  ;;  %v327_v35 = vld [vmem:[%s5164_s15 + $0x180] sm:$0xff] }
 0x14a   : > { %4625 = vmatmul.mubr.msk.f32.gmra.mxu1 %vm1019_vm2, %v5252_v8 }
 0x14b   : > { %4627 = vmatprep.mubr.msk.f32.mxu1 %vm1019_vm2, %v5313_v3  ;;  %4672 = vmatmul.mubr.msk.f32.gmra.mxu0 %vm1019_vm2, %v7171_v14 }
 0x14c   : > { %4674 = vmatprep.mubr.msk.f32.mxu0 %vm1019_vm2, %v7172_v57  ;;  %v6025_v57 = vld [vmem:[%s7015_s2] ss:$0 sm:$0xff] }
 0x14d   : > { %v388_v14 = vmul.f32 %v6025_v57, %v327_v35  ;;  %v389_v16 = vmul.f32 %v6025_v57, %v328_v20  ;;  %v390_v59 = vmul.f32 %v6025_v57, %v329_v9  ;;  %v6042_v35 = vld [vmem:[%s7016_s3] ss:$0 sm:$0xff]  ;;  %v806_v9 = vpop.permute.xlu0 %805 }
 0x14e   : > { %4628 = vmatmul.mubr.msk.f32.gmra.mxu1 %vm1019_vm2, %v5315_v4 }
 0x14f   : > { %4630 = vmatprep.mubr.msk.f32.mxu1 %vm1019_vm2, %v5369_v11  ;;  %4675 = vmatmul.mubr.msk.f32.gmra.mxu0 %vm1019_vm2, %v7173_v0  ;;  %v7175_v0 = vld [vmem:[#allocation9_spill] sm:$0xff]  ;;  %v449_v20 = vadd.f32 %v6042_v35, %v388_v14  ;;  %v450_v28 = vadd.f32 %v6042_v35, %v389_v16  ;;  %v451_v24 = vadd.f32 %v6042_v35, %v390_v59  ;;  %v811_v16 = vpop.permute.xlu1 %810 }
 0x150   : > { %4677 = vmatprep.mubr.msk.f32.mxu0 %vm1019_vm2, %v7174_v31  ;;  %v7176_v31 = vld [vmem:[#allocation12_spill] sm:$0xff]  ;;  %v7179_v14 = vld [vmem:[#allocation17_spill] sm:$0xff] }
 0x151   : > { %v503_v51 = vmax.f32 %v449_v20, 0.0  ;;  %v504_v60 = vmax.f32 %v450_v28, 0.0  ;;  %v816_v20 = vpop.permute.xlu0 %815  ;;  %v7181_v28 = vld [vmem:[#allocation21_spill] sm:$0xff] }
 0x152   : > { %4631 = vmatmul.mubr.msk.f32.gmra.mxu1 %vm1019_vm2, %v5371_v12 }
 0x153   : > { %4633 = vmatprep.mubr.msk.f32.mxu1 %vm1019_vm2, %v5425_v38  ;;  %4678 = vmatmul.mubr.msk.f32.gmra.mxu0 %vm1019_vm2, %v7175_v0  ;;  %v7177_v0 = vld [vmem:[#allocation13_spill] sm:$0xff]  ;;  %v6063_v59 = vmul.f32 %v806_v9, %v503_v51 }
 0x154   : > { %4680 = vmatprep.mubr.msk.f32.mxu0 %vm1019_vm2, %v7176_v31  ;;  %v7178_v31 = vld [vmem:[#allocation16_spill] sm:$0xff] }
 0x155   : > { %v2281_v51 = vrot.slane %v6063_v59, 1 }
 0x156   : > { %4634 = vmatmul.mubr.msk.f32.gmra.mxu1 %vm1019_vm2, %v5427_v47 }
 0x157   : > { %4636 = vmatprep.mubr.msk.f32.mxu1 %vm1019_vm2, %v5481_v37  ;;  %4681 = vmatmul.mubr.msk.f32.gmra.mxu0 %vm1019_vm2, %v7177_v0  ;;  %v505_v0 = vmax.f32 %v451_v24, 0.0 }
 0x158   : > { %4683 = vmatprep.mubr.msk.f32.mxu0 %vm1019_vm2, %v7178_v31  ;;  %v6065_v31 = vmul.f32 %v811_v16, %v504_v60  ;;  %v7183_v60 = vld [vmem:[#allocation27_spill] sm:$0xff] }
 0x159   : > { %v6073_v52 = vmul.f32 %v816_v20, %v505_v0  ;;  %v7194_v20 = vld [vmem:[#allocation41_spill] sm:$0xff] }
 0x15a   : > { %4637 = vmatmul.mubr.msk.f32.gmra.mxu1 %vm1019_vm2, %v5483_v45  ;;  %v2282_v24 = vrot.slane %v6065_v31, 1 }
 0x15b   : > { %4639 = vmatprep.mubr.msk.f32.mxu1 %vm1019_vm2, %v7152_v18  ;;  %4684 = vmatmul.mubr.msk.f32.gmra.mxu0 %vm1019_vm2, %v7179_v14  ;;  %v7182_v14 = vld [vmem:[#allocation26_spill] sm:$0xff]  ;;  %v2284_v9 = vrot.slane %v6073_v52, 1 }
 0x15c   : > { %4686 = vmatprep.mubr.msk.f32.mxu0 %vm1019_vm2, %v7180_v2  ;;  %v6093_v0 = vsel %vm936_vm1, %v2281_v51, %v2282_v24 }
 0x15d   : > { %7184 = vst [vmem:[#allocation6_spill] sm:$0xff] %v6093_v0  ;;  %v6100_v16 = vsel %vm936_vm1, %v2282_v24, %v2284_v9  ;;  %v7195_v24 = vld [vmem:[#allocation42_spill] sm:$0xff] }
 0x15e   : > { %4640 = vmatmul.mubr.msk.f32.gmra.mxu1 %vm1019_vm2, %v7154_v22  ;;  %7185 = vst [vmem:[#allocation7_spill] sm:$0xff] %v6100_v16 }
 0x15f   : > { %4642 = vmatprep.mubr.msk.f32.mxu1 %vm1019_vm2, %v5588_v1  ;;  %4687 = vmatmul.mubr.msk.f32.gmra.mxu0 %vm1019_vm2, %v7181_v28 }
 0x160   : > { %4689 = vmatprep.mubr.msk.f32.mxu0 %vm1019_vm2, %v7182_v14 }
 0x162   : > { %4643 = vmatmul.mubr.msk.f32.gmra.mxu1 %vm1019_vm2, %v5590_v61 }
 0x163   : > { %4645 = vmatprep.mubr.msk.f32.mxu1 %vm1019_vm2, %v6063_v59  ;;  %4690 = vmatmul.mubr.msk.f32.gmra.mxu0 %vm1019_vm2, %v7183_v60 }
 0x164   : > { %4692 = vmatprep.mubr.msk.f32.mxu0 %vm1019_vm2, %v5607_v29 }
 0x166   : > { %4646 = vmatmul.mubr.msk.f32.gmra.mxu1 %vm1019_vm2, %v6065_v31 }
 0x167   : > { %4693 = vmatmul.mubr.msk.f32.gmra.mxu0 %vm1019_vm2, %v5619_v32  ;;  %4700 = vmatprep.mubr.msk.f32.mxu1 %vm1019_vm2, %v5671_v58  ;;  %v331_v32 = vld [vmem:[%s5164_s15 + $0x1a0] sm:$0xff] }
 0x168   : > { %4695 = vmatprep.mubr.msk.f32.mxu0 %vm1019_vm2, %v6093_v0 }
 0x16a   : > { %4701 = vmatmul.mubr.msk.f32.vlgmr.msra.gmra.mxu1 %vm1019_vm2, %v5685_v13 }
 0x16b   : > { %4696 = vmatmul.mubr.msk.f32.gmra.mxu0 %vm1019_vm2, %v6100_v16  ;;  %4703 = vmatprep.mubr.msk.f32.mxu1 %vm1019_vm2, %v5692_v36  ;;  %v7197_v16 = vld [vmem:[#allocation22_spill] sm:$0xff] }
 0x16c   : > { %4750 = vmatprep.mubr.msk.f32.mxu0 %vm1019_vm2, %v5344_v39  ;;  %4799 = vmatpush3.msk.msra.mxu1 %vm1084_vm0, %v5925_v44  ;;  %v6142_v39 = vpop.f32.mrf.mxu1  ;;  %v7191_v44 = vld [vmem:[#allocation39_spill] sm:$0xff] }
 0x16e   : > { %4704 = vmatmul.mubr.msk.f32.gmra.mxu1 %vm1019_vm2, %v5702_v23 }
 0x16f   : > { %4706 = vmatprep.mubr.msk.f32.mxu1 %vm1019_vm2, %v5709_v43  ;;  %4751 = vmatmul.mubr.msk.f32.vlgmr.msra.gmra.mxu0 %vm1019_vm2, %v5349_v40  ;;  %v7186_v40 = vld [vmem:[#allocation34_spill] sm:$0xff] }
 0x170   : > { %4849 = vmatpush3.msk.msra.mxu0 %vm1084_vm0, %v5942_v42  ;;  %4753 = vmatprep.mubr.msk.f32.mxu0 %vm1019_vm2, %v5400_v49  ;;  %v6152_v49 = vpop.f32.mrf.mxu1  ;;  %v7192_v42 = vld [vmem:[#allocation40_spill] sm:$0xff] }
 0x172   : > { %4707 = vmatmul.mubr.msk.f32.gmra.mxu1 %vm1019_vm2, %v5719_v54 }
 0x173   : > { %4709 = vmatprep.mubr.msk.f32.mxu1 %vm1019_vm2, %v5726_v27  ;;  %4754 = vmatmul.mubr.msk.f32.gmra.mxu0 %vm1019_vm2, %v5405_v62  ;;  %v6156_v62 = vpop.f32.mrf.mxu0 }
 0x174   : > { %4756 = vmatprep.mubr.msk.f32.mxu0 %vm1019_vm2, %v5456_v33 }
 0x175   : > { %v6168_v33 = vpop.f32.mrf.mxu0 }
 0x176   : > { %4710 = vmatmul.mubr.msk.f32.gmra.mxu1 %vm1019_vm2, %v5736_v15 }
 0x177   : > { %4712 = vmatprep.mubr.msk.f32.mxu1 %vm1019_vm2, %v5743_v55  ;;  %4757 = vmatmul.mubr.msk.f32.gmra.mxu0 %vm1019_vm2, %v5461_v46  ;;  %v7187_v46 = vld [vmem:[#allocation35_spill] sm:$0xff] }
 0x178   : > { %4759 = vmatprep.mubr.msk.f32.mxu0 %vm1019_vm2, %v5512_v17 }
 0x17a   : > { %4713 = vmatmul.mubr.msk.f32.gmra.mxu1 %vm1019_vm2, %v5753_v53 }
 0x17b   : > { %4715 = vmatprep.mubr.msk.f32.mxu1 %vm1019_vm2, %v5760_v63  ;;  %4760 = vmatmul.mubr.msk.f32.gmra.mxu0 %vm1019_vm2, %v5517_v50  ;;  %v6158_v50 = vpop.f32.mrf.mxu1 }
 0x17c   : > { %4762 = vmatprep.mubr.msk.f32.mxu0 %vm1019_vm2, %v5567_v5  ;;  %v7188_v5 = vld [vmem:[#allocation36_spill] sm:$0xff] }
 0x17d   : > { %v6170_v17 = vpop.f32.mrf.mxu1 }
 0x17e   : > { %4716 = vmatmul.mubr.msk.f32.gmra.mxu1 %vm1019_vm2, %v7186_v40 }
 0x17f   : > { %4718 = vmatprep.mubr.msk.f32.mxu1 %vm1019_vm2, %v7187_v46  ;;  %4763 = vmatmul.mubr.msk.f32.gmra.mxu0 %vm1019_vm2, %v5573_v21  ;;  %v6174_v21 = vpop.f32.mrf.mxu0  ;;  %v6180_v58 = vpop.f32.mrf.mxu1 }
 0x180   : > { %4765 = vmatprep.mubr.msk.f32.mxu0 %vm1019_vm2, %v5612_v26  ;;  %v7189_v26 = vld [vmem:[#allocation37_spill] sm:$0xff] }
 0x181   : > { %v6192_v13 = vpop.f32.mrf.mxu1 }
 0x182   : > { %4719 = vmatmul.mubr.msk.f32.gmra.mxu1 %vm1019_vm2, %v5786_v41 }
 0x183   : > { %4721 = vmatprep.mubr.msk.f32.mxu1 %vm1019_vm2, %v7188_v5  ;;  %4766 = vmatmul.mubr.msk.f32.gmra.mxu0 %vm1019_vm2, %v5614_v6  ;;  %v7190_v6 = vld [vmem:[#allocation38_spill] sm:$0xff] }
 0x184   : > { %4768 = vmatprep.mubr.msk.f32.mxu0 %vm1019_vm2, %v5201_v25  ;;  %v6186_v25 = vpop.f32.mrf.mxu0 }
 0x186   : > { %4722 = vmatmul.mubr.msk.f32.gmra.mxu1 %vm1019_vm2, %v5804_v19 }
 0x187   : > { %4724 = vmatprep.mubr.msk.f32.mxu1 %vm1019_vm2, %v7189_v26  ;;  %4769 = vmatmul.mubr.msk.f32.gmra.mxu0 %vm1019_vm2, %v5208_v34  ;;  %v6196_v34 = vpop.f32.mrf.mxu0 }
 0x188   : > { %4771 = vmatprep.mubr.msk.f32.mxu0 %vm1019_vm2, %v5250_v7  ;;  %v6198_v7 = vpop.f32.mrf.mxu1 }
 0x18a   : > { %4725 = vmatmul.mubr.msk.f32.gmra.mxu1 %vm1019_vm2, %v5821_v56 }
 0x18b   : > { %4727 = vmatprep.mubr.msk.f32.mxu1 %vm1019_vm2, %v7190_v6  ;;  %4772 = vmatmul.mubr.msk.f32.gmra.mxu0 %vm1019_vm2, %v5252_v8  ;;  %v6208_v8 = vpop.f32.mrf.mxu0 }
 0x18c   : > { %4774 = vmatprep.mubr.msk.f32.mxu0 %vm1019_vm2, %v5313_v3  ;;  %v6210_v3 = vpop.f32.mrf.mxu1 }
 0x18d   : > { %7193 = vst [vmem:[#allocation20_spill] sm:$0xff] %v6210_v3  ;;  %v6214_v51 = vpop.f32.mrf.mxu0  ;;  %v2552_v3 = vrot.slane %v6063_v59, 2 }
 0x18e   : > { %4728 = vmatmul.mubr.msk.f32.gmra.mxu1 %vm1019_vm2, %v7191_v44 }
 0x18f   : > { %4730 = vmatprep.mubr.msk.f32.mxu1 %vm1019_vm2, %v7192_v42  ;;  %4775 = vmatmul.mubr.msk.f32.gmra.mxu0 %vm1019_vm2, %v5315_v4  ;;  %v6220_v4 = vpop.f32.mrf.mxu1  ;;  %v6227_v9 = vpop.f32.mrf.mxu0 }
 0x190   : > { %4777 = vmatprep.mubr.msk.f32.mxu0 %vm1019_vm2, %v5369_v11  ;;  %7196 = vst [vmem:[#allocation21_spill] sm:$0xff] %v6220_v4  ;;  %v330_v11 = vld [vmem:[%s5164_s15 + $0x198] sm:$0xff] }
 0x191   : > { %v6233_v0 = vpop.f32.mrf.mxu1 }
 0x192   : > { %4731 = vmatmul.mubr.msk.f32.gmra.mxu1 %vm1019_vm2, %v7194_v20  ;;  %7198 = vst [vmem:[#allocation26_spill] sm:$0xff] %v6233_v0 }
 0x193   : > { %4733 = vmatprep.mubr.msk.f32.mxu1 %vm1019_vm2, %v7195_v24  ;;  %4778 = vmatmul.mubr.msk.f32.gmra.mxu0 %vm1019_vm2, %v5371_v12  ;;  %v6237_v12 = vpop.f32.mrf.mxu0  ;;  %v6241_v4 = vpop.f32.mrf.mxu1 }
 0x194   : > { %4780 = vmatprep.mubr.msk.f32.mxu0 %vm1019_vm2, %v5425_v38  ;;  %v391_v38 = vmul.f32 %v6025_v57, %v330_v11  ;;  %7199 = vst [vmem:[#allocation34_spill] sm:$0xff] %v6241_v4  ;;  %v7201_v4 = vld [vmem:[#allocation44_spill] sm:$0xff] }
 0x195   : > { %v6255_v0 = vpop.f32.mrf.mxu1 }
 0x196   : > { %4734 = vmatmul.mubr.msk.f32.gmra.mxu1 %vm1019_vm2, %v5872_v10  ;;  %v452_v11 = vadd.f32 %v6042_v35, %v391_v38  ;;  %7200 = vst [vmem:[#allocation35_spill] sm:$0xff] %v6255_v0 }
 0x197   : > { %4736 = vmatprep.mubr.msk.f32.mxu1 %vm1019_vm2, %v7197_v16  ;;  %4781 = vmatmul.mubr.msk.f32.gmra.mxu0 %vm1019_vm2, %v5427_v47  ;;  %v392_v47 = vmul.f32 %v6025_v57, %v331_v32 }
 0x198   : > { %4783 = vmatprep.mubr.msk.f32.mxu0 %vm1019_vm2, %v5481_v37  ;;  %v6252_v37 = vpop.f32.mrf.mxu0  ;;  %v506_v0 = vmax.f32 %v452_v11, 0.0  ;;  %v826_v11 = vpop.permute.xlu0 %825 }
 0x199   : > { %v453_v38 = vadd.f32 %v6042_v35, %v392_v47 }
 0x19a   : > { %4737 = vmatmul.mubr.msk.f32.gmra.mxu1 %vm1019_vm2, %v5889_v48  ;;  %v6261_v48 = vpop.f32.mrf.mxu0  ;;  %v6267_v32 = vpop.f32.mrf.mxu1 }
 0x19b   : > { %4739 = vmatprep.mubr.msk.f32.mxu1 %vm1019_vm2, %v5896_v30  ;;  %4784 = vmatmul.mubr.msk.f32.gmra.mxu0 %vm1019_vm2, %v5483_v45  ;;  %v2553_v30 = vrot.slane %v6065_v31, 2  ;;  %v7202_v45 = vld [vmem:[#allocation45_spill] sm:$0xff]  ;;  %7203 = vst [vmem:[#allocation36_spill] sm:$0xff] %v6267_v32 }
 0x19c   : > { %4786 = vmatprep.mubr.msk.f32.mxu0 %vm1019_vm2, %v7152_v18  ;;  %v2555_v18 = vrot.slane %v6073_v52, 2  ;;  %v6278_v60 = vpop.f32.mrf.mxu0 }
 0x19d   : > { %v6276_v29 = vsel %vm1605_vm3, %v2552_v3, %v2553_v30 }
 0x19e   : > { %4740 = vmatmul.mubr.msk.f32.gmra.mxu1 %vm1019_vm2, %v7201_v4  ;;  %v7204_v4 = vld [vmem:[#allocation46_spill] sm:$0xff]  ;;  %7205 = vst [vmem:[#allocation37_spill] sm:$0xff] %v6276_v29  ;;  %v6291_v3 = vsel %vm1605_vm3, %v2553_v30, %v2555_v18  ;;  %v7212_v18 = vld [vmem:[#allocation11_spill] sm:$0xff] }
 0x19f   : > { %4742 = vmatprep.mubr.msk.f32.mxu1 %vm1019_vm2, %v7202_v45  ;;  %4787 = vmatmul.mubr.msk.f32.gmra.mxu0 %vm1019_vm2, %v7154_v22  ;;  %v821_v45 = vpop.permute.xlu1 %820  ;;  %v507_v22 = vmax.f32 %v453_v38, 0.0  ;;  %v6288_v52 = vpop.f32.mrf.mxu0  ;;  %7207 = vst [vmem:[#allocation39_spill] sm:$0xff] %v6291_v3 }
 0x1a0   : > { %4789 = vmatprep.mubr.msk.f32.mxu0 %vm1019_vm2, %v5588_v1  ;;  %v6284_v1 = vpop.f32.mrf.mxu1  ;;  %v6293_v47 = vmul.f32 %v821_v45, %v506_v0 }
 0x1a1   : > { %7206 = vst [vmem:[#allocation38_spill] sm:$0xff] %v6284_v1  ;;  %v6307_v30 = vmul.f32 %v826_v11, %v507_v22  ;;  %v6309_v0 = vpop.f32.mrf.mxu0 }
 0x1a2   : > { %4743 = vmatmul.mubr.msk.f32.gmra.mxu1 %vm1019_vm2, %v7204_v4  ;;  %7208 = vst [vmem:[#allocation40_spill] sm:$0xff] %v6293_v47  ;;  %v7216_v4 = vld [vmem:[#allocation19_spill] sm:$0xff] }
 0x1a3   : > { %4745 = vmatprep.mubr.msk.f32.mxu1 %vm1019_vm2, %v6276_v29  ;;  %4790 = vmatmul.mubr.msk.f32.gmra.mxu0 %vm1019_vm2, %v5590_v61  ;;  %v7210_v61 = vld [vmem:[#allocation10_spill] sm:$0xff] }
 0x1a4   : > { %4792 = vmatprep.mubr.msk.f32.mxu0 %vm1019_vm2, %v6063_v59 }
 0x1a6   : > { %v6295_v32 = vpop.f32.mrf.mxu1  ;;  %4746 = vmatmul.mubr.msk.f32.gmra.mxu1 %vm1019_vm2, %v6291_v3  ;;  %v7214_v3 = vld [vmem:[#allocation15_spill] sm:$0xff] }
 0x1a7   : > { %7209 = vst [vmem:[#allocation41_spill] sm:$0xff] %v6295_v32  ;;  %4793 = vmatmul.mubr.msk.f32.gmra.mxu0 %vm1019_vm2, %v6065_v31  ;;  %4800 = vmatprep.mubr.msk.f32.mxu1 %vm1019_vm2, %v7210_v61  ;;  %v7213_v31 = vld [vmem:[#allocation14_spill] sm:$0xff] }
 0x1a8   : > { %v6303_v59 = vpop.f32.mrf.mxu1  ;;  %4795 = vmatprep.mubr.msk.f32.mxu0 %vm1019_vm2, %v6293_v47  ;;  %v7215_v32 = vld [vmem:[#allocation18_spill] sm:$0xff]  ;;  %v7217_v47 = vld [vmem:[#allocation24_spill] sm:$0xff] }
 0x1a9   : > { %7211 = vst [vmem:[#allocation42_spill] sm:$0xff] %v6303_v59 }
 0x1aa   : > { %v4502_v45 = vpop.f32.mrf.mxu1  ;;  %4801 = vmatmul.mubr.msk.f32.vlgmr.msra.gmra.mxu1 %vm1019_vm2, %v7212_v18 }
 0x1ab   : > { %v6313_v38 = vpop.f32.mrf.mxu0  ;;  %4796 = vmatmul.mubr.msk.f32.gmra.mxu0 %vm1019_vm2, %v6307_v30  ;;  %4803 = vmatprep.mubr.msk.f32.mxu1 %vm1019_vm2, %v7213_v31  ;;  %v1452_v11 = vadd.f32 %v4502_v45, %v6156_v62 }
 0x1ac   : > { %v1446_v61 = vpop.f32.mrf.mxu1  ;;  %4850 = vmatprep.mubr.msk.f32.mxu0 %vm1019_vm2, %v5692_v36 }
 0x1ad   : > { %v6321_v22 = vpop.f32.mrf.mxu0  ;;  %v1447_v31 = vadd.f32 %v1446_v61, %v6168_v33 }
 0x1ae   : > { %v4505_v59 = vpop.f32.mrf.mxu1  ;;  %4804 = vmatmul.mubr.msk.f32.gmra.mxu1 %vm1019_vm2, %v7214_v3 }
 0x1af   : > { %v4552_v18 = vpop.f32.mrf.mxu0  ;;  %4806 = vmatprep.mubr.msk.f32.mxu1 %vm1019_vm2, %v7215_v32  ;;  %4851 = vmatmul.mubr.msk.f32.vlgmr.msra.gmra.mxu0 %vm1019_vm2, %v5702_v23  ;;  %v1462_v45 = vadd.f32 %v4505_v59, %v6174_v21 }
 0x1b0   : > { %v6331_v1 = vadd.f32 %v4552_v18, %v1452_v11  ;;  %v1456_v36 = vpop.f32.mrf.mxu1  ;;  %4853 = vmatprep.mubr.msk.f32.mxu0 %vm1019_vm2, %v5709_v43  ;;  %v7219_v18 = vld [vmem:[#allocation28_spill] sm:$0xff] }
 0x1b1   : > { %v1821_v62 = vpop.f32.mrf.mxu0  ;;  %v1457_v23 = vadd.f32 %v1456_v36, %v6186_v25 }
 0x1b2   : > { %v6336_v29 = vadd.f32 %v1821_v62, %v1447_v31  ;;  %v4508_v3 = vpop.f32.mrf.mxu1  ;;  %4807 = vmatmul.mubr.msk.f32.gmra.mxu1 %vm1019_vm2, %v7216_v4 }
 0x1b3   : > { %v4555_v32 = vpop.f32.mrf.mxu0  ;;  %4809 = vmatprep.mubr.msk.f32.mxu1 %vm1019_vm2, %v7217_v47  ;;  %4854 = vmatmul.mubr.msk.f32.gmra.mxu0 %vm1019_vm2, %v5719_v54  ;;  %v1472_v4 = vadd.f32 %v4508_v3, %v6196_v34  ;;  %v7218_v47 = vld [vmem:[#allocation25_spill] sm:$0xff] }
 0x1b4   : > { %v6345_v33 = vadd.f32 %v4555_v32, %v1462_v45  ;;  %v1466_v43 = vpop.f32.mrf.mxu1  ;;  %4856 = vmatprep.mubr.msk.f32.mxu0 %vm1019_vm2, %v5726_v27  ;;  %v7221_v32 = vld [vmem:[#allocation32_spill] sm:$0xff] }
 0x1b5   : > { %v1467_v21 = vadd.f32 %v1466_v43, %v6208_v8  ;;  %v1831_v59 = vpop.f32.mrf.mxu0 }
 0x1b6   : > { %v6351_v61 = vadd.f32 %v1831_v59, %v1457_v23  ;;  %v4511_v11 = vpop.f32.mrf.mxu1  ;;  %4810 = vmatmul.mubr.msk.f32.gmra.mxu1 %vm1019_vm2, %v7218_v47 }
 0x1b7   : > { %v1482_v54 = vadd.f32 %v4511_v11, %v6214_v51  ;;  %v4558_v25 = vpop.f32.mrf.mxu0  ;;  %4812 = vmatprep.mubr.msk.f32.mxu1 %vm1019_vm2, %v7219_v18  ;;  %4857 = vmatmul.mubr.msk.f32.gmra.mxu0 %vm1019_vm2, %v5736_v15  ;;  %v7220_v51 = vld [vmem:[#allocation29_spill] sm:$0xff]  ;;  %v7223_v11 = vld [vmem:[#allocation2_spill] sm:$0xff] }
 0x1b8   : > { %v6360_v27 = vadd.f32 %v4558_v25, %v1472_v4  ;;  %v1476_v8 = vpop.f32.mrf.mxu1  ;;  %4859 = vmatprep.mubr.msk.f32.mxu0 %vm1019_vm2, %v5743_v55 }
 0x1b9   : > { %v1477_v34 = vadd.f32 %v1476_v8, %v6227_v9  ;;  %v1841_v31 = vpop.f32.mrf.mxu0 }
 0x1ba   : > { %v6365_v36 = vadd.f32 %v1841_v31, %v1467_v21  ;;  %v4514_v62 = vpop.f32.mrf.mxu1  ;;  %4813 = vmatmul.mubr.msk.f32.gmra.mxu1 %vm1019_vm2, %v7220_v51 }
 0x1bb   : > { %v1492_v45 = vadd.f32 %v4514_v62, %v6237_v12  ;;  %v4561_v3 = vpop.f32.mrf.mxu0  ;;  %4815 = vmatprep.mubr.msk.f32.mxu1 %vm1019_vm2, %v7221_v32  ;;  %4860 = vmatmul.mubr.msk.f32.gmra.mxu0 %vm1019_vm2, %v5753_v53  ;;  %v7222_v12 = vld [vmem:[#allocation33_spill] sm:$0xff]  ;;  %v7227_v32 = vld [vmem:[#allocation8_spill] sm:$0xff] }
 0x1bc   : > { %v6374_v15 = vadd.f32 %v4561_v3, %v1482_v54  ;;  %v1486_v55 = vpop.f32.mrf.mxu1  ;;  %4862 = vmatprep.mubr.msk.f32.mxu0 %vm1019_vm2, %v5760_v63 }
 0x1bd   : > { %v1487_v9 = vadd.f32 %v1486_v55, %v6252_v37  ;;  %v1851_v23 = vpop.f32.mrf.mxu0 }
 0x1be   : > { %v6379_v43 = vadd.f32 %v1851_v23, %v1477_v34  ;;  %v4517_v21 = vpop.f32.mrf.mxu1  ;;  %4816 = vmatmul.mubr.msk.f32.gmra.mxu1 %vm1019_vm2, %v7222_v12  ;;  %v7225_v34 = vld [vmem:[#allocation4_spill] sm:$0xff]  ;;  %v7228_v23 = vld [vmem:[#allocation9_spill] sm:$0xff] }
 0x1bf   : > { %v1502_v59 = vadd.f32 %v4517_v21, %v6261_v48  ;;  %v4564_v4 = vpop.f32.mrf.mxu0  ;;  %4818 = vmatprep.mubr.msk.f32.mxu1 %vm1019_vm2, %v7223_v11  ;;  %4863 = vmatmul.mubr.msk.f32.gmra.mxu0 %vm1019_vm2, %v7186_v40  ;;  %v7224_v48 = vld [vmem:[#allocation3_spill] sm:$0xff]  ;;  %v7229_v12 = vld [vmem:[#allocation12_spill] sm:$0xff] }
 0x1c0   : > { %v6388_v53 = vadd.f32 %v4564_v4, %v1492_v45  ;;  %v1496_v63 = vpop.f32.mrf.mxu1  ;;  %4865 = vmatprep.mubr.msk.f32.mxu0 %vm1019_vm2, %v7187_v46 }
 0x1c1   : > { %v1497_v37 = vadd.f32 %v1496_v63, %v6278_v60  ;;  %v1861_v47 = vpop.f32.mrf.mxu0 }
 0x1c2   : > { %v6393_v54 = vadd.f32 %v1861_v47, %v1487_v9  ;;  %v4520_v25 = vpop.f32.mrf.mxu1  ;;  %4819 = vmatmul.mubr.msk.f32.gmra.mxu1 %vm1019_vm2, %v7224_v48 }
 0x1c3   : > { %v1512_v18 = vadd.f32 %v4520_v25, %v6288_v52  ;;  %v4567_v8 = vpop.f32.mrf.mxu0  ;;  %4821 = vmatprep.mubr.msk.f32.mxu1 %vm1019_vm2, %v7225_v34  ;;  %4866 = vmatmul.mubr.msk.f32.gmra.mxu0 %vm1019_vm2, %v5786_v41  ;;  %v7226_v52 = vld [vmem:[#allocation5_spill] sm:$0xff]  ;;  %v7231_v25 = vld [vmem:[#allocation16_spill] sm:$0xff] }
 0x1c4   : > { %v6402_v40 = vadd.f32 %v4567_v8, %v1502_v59  ;;  %v1506_v46 = vpop.f32.mrf.mxu1  ;;  %4868 = vmatprep.mubr.msk.f32.mxu0 %vm1019_vm2, %v7188_v5 }
 0x1c5   : > { %v1507_v60 = vadd.f32 %v1506_v46, %v6309_v0  ;;  %v1871_v31 = vpop.f32.mrf.mxu0 }
 0x1c6   : > { %v6407_v62 = vadd.f32 %v1871_v31, %v1497_v37  ;;  %v4523_v51 = vpop.f32.mrf.mxu1  ;;  %4822 = vmatmul.mubr.msk.f32.gmra.mxu1 %vm1019_vm2, %v7226_v52  ;;  %v7230_v37 = vld [vmem:[#allocation13_spill] sm:$0xff] }
 0x1c7   : > { %v1522_v45 = vadd.f32 %v4523_v51, %v6313_v38  ;;  %v4570_v3 = vpop.f32.mrf.mxu0  ;;  %4824 = vmatprep.mubr.msk.f32.mxu1 %vm1019_vm2, %v7227_v32  ;;  %4869 = vmatmul.mubr.msk.f32.gmra.mxu0 %vm1019_vm2, %v5804_v19 }
 0x1c8   : > { %v6416_v41 = vadd.f32 %v4570_v3, %v1512_v18  ;;  %v1516_v5 = vpop.f32.mrf.mxu1  ;;  %4871 = vmatprep.mubr.msk.f32.mxu0 %vm1019_vm2, %v7189_v26  ;;  %v831_v3 = vpop.permute.xlu1 %830 }
 0x1c9   : > { %v1517_v0 = vadd.f32 %v1516_v5, %v6321_v22  ;;  %v1881_v55 = vpop.f32.mrf.mxu0  ;;  %v332_v22 = vld [vmem:[%s5164_s15 + $0x1a8] sm:$0x3] }
 0x1ca   : > { %v6421_v9 = vadd.f32 %v1881_v55, %v1507_v60  ;;  %v4526_v38 = vpop.f32.mrf.mxu1  ;;  %4825 = vmatmul.mubr.msk.f32.gmra.mxu1 %vm1019_vm2, %v7228_v23  ;;  %v7232_v60 = vld [vmem:[#allocation17_spill] sm:$0xff]  ;;  %v7236_v55 = vld [vmem:[#allocation20_spill] sm:$0xff] }
 0x1cb   : > { %v4573_v21 = vpop.f32.mrf.mxu0  ;;  %4827 = vmatprep.mubr.msk.f32.mxu1 %vm1019_vm2, %v7229_v12  ;;  %4872 = vmatmul.mubr.msk.f32.gmra.mxu0 %vm1019_vm2, %v5821_v56  ;;  %v1532_v4 = vadd.f32 %v4526_v38, %v6142_v39  ;;  %v393_v39 = vmul.f32 %v6025_v57, %v332_v22 }
 0x1cc   : > { %v6429_v19 = vadd.f32 %v4573_v21, %v1522_v45  ;;  %v1526_v59 = vpop.f32.mrf.mxu1  ;;  %4874 = vmatprep.mubr.msk.f32.mxu0 %vm1019_vm2, %v7190_v6  ;;  %v7237_v21 = vld [vmem:[#allocation43_spill] sm:$0xff] }
 0x1cd   : > { %v1891_v26 = vpop.f32.mrf.mxu0  ;;  %v1527_v56 = vadd.f32 %v1526_v59, %v6152_v49  ;;  %v3093_v59 = vrot.slane %v6307_v30, 1 }
 0x1ce   : > { %v6435_v11 = vadd.f32 %v1891_v26, %v1517_v0  ;;  %v4529_v63 = vpop.f32.mrf.mxu1  ;;  %4828 = vmatmul.mubr.msk.f32.gmra.mxu1 %vm1019_vm2, %v7230_v37  ;;  %v7234_v0 = vld [vmem:[#allocation30_spill] sm:$0xff]  ;;  %v7238_v26 = vld [vmem:[#allocation21_spill] sm:$0xff]  ;;  %v7239_v37 = vld [vmem:[#allocation31_spill] sm:$0xff] }
 0x1cf   : > { %v4576_v47 = vpop.f32.mrf.mxu0  ;;  %4830 = vmatprep.mubr.msk.f32.mxu1 %vm1019_vm2, %v7231_v25  ;;  %4875 = vmatmul.mubr.msk.f32.gmra.mxu0 %vm1019_vm2, %v7191_v44  ;;  %v1542_v8 = vadd.f32 %v4529_v63, %v6158_v50  ;;  %v454_v50 = vadd.f32 %v6042_v35, %v393_v39  ;;  %v7240_v25 = vld [vmem:[#allocation6_spill] sm:$0xff] }
 0x1d0   : > { %v6444_v6 = vadd.f32 %v4576_v47, %v1532_v4  ;;  %v1536_v48 = vpop.f32.mrf.mxu1  ;;  %4877 = vmatprep.mubr.msk.f32.mxu0 %vm1019_vm2, %v7192_v42 }
 0x1d1   : > { %v1901_v18 = vpop.f32.mrf.mxu0  ;;  %v1537_v49 = vadd.f32 %v1536_v48, %v6170_v17  ;;  %v7242_v48 = vld [vmem:[#allocation40_spill] sm:$0xff] }
 0x1d2   : > { %v6450_v34 = vadd.f32 %v1901_v18, %v1527_v56  ;;  %v4532_v46 = vpop.f32.mrf.mxu1  ;;  %4831 = vmatmul.mubr.msk.f32.gmra.mxu1 %vm1019_vm2, %v7232_v60  ;;  %v7241_v56 = vld [vmem:[#allocation44_spill] sm:$0xff]  ;;  %v3092_v39 = vrot.slane %v7242_v48, 1  ;;  %v7243_v18 = vld [vmem:[#allocation26_spill] sm:$0xff] }
 0x1d3   : > { %v4579_v44 = vpop.f32.mrf.mxu0  ;;  %4833 = vmatprep.mubr.msk.f32.mxu1 %vm1019_vm2, %v7180_v2  ;;  %4878 = vmatmul.mubr.msk.f32.gmra.mxu0 %vm1019_vm2, %v7194_v20  ;;  %v1552_v51 = vadd.f32 %v4532_v46, %v6180_v58  ;;  %v508_v58 = vmax.f32 %v454_v50, 0.0  ;;  %v7245_v50 = vld [vmem:[#allocation34_spill] sm:$0xff] }
 0x1d4   : > { %v6459_v42 = vadd.f32 %v4579_v44, %v1542_v8  ;;  %v1546_v57 = vpop.f32.mrf.mxu1  ;;  %4880 = vmatprep.mubr.msk.f32.mxu0 %vm1019_vm2, %v7195_v24  ;;  %v7244_v44 = vld [vmem:[#allocation45_spill] sm:$0xff] }
 0x1d5   : > { %v1911_v31 = vpop.f32.mrf.mxu0  ;;  %v1547_v17 = vadd.f32 %v1546_v57, %v6192_v13  ;;  %v7235_v13 = vld [vmem:[#allocation23_spill] sm:$0xff] }
 0x1d6   : > { %v6465_v52 = vadd.f32 %v1911_v31, %v1537_v49  ;;  %v4535_v45 = vpop.f32.mrf.mxu1  ;;  %4834 = vmatmul.mubr.msk.f32.gmra.mxu1 %vm1019_vm2, %v7181_v28 }
 0x1d7   : > { %v4582_v2 = vpop.f32.mrf.mxu0  ;;  %4836 = vmatprep.mubr.msk.f32.mxu1 %vm1019_vm2, %v7182_v14  ;;  %4881 = vmatmul.mubr.msk.f32.gmra.mxu0 %vm1019_vm2, %v5872_v10  ;;  %v1562_v28 = vadd.f32 %v4535_v45, %v6198_v7  ;;  %v7233_v14 = vld [vmem:[#allocation27_spill] sm:$0xff]  ;;  %v886_v7 = vmul.f32 %v831_v3, %v508_v58 }
 0x1d8   : > { %v6474_v20 = vadd.f32 %v4582_v2, %v1552_v51  ;;  %v1556_v35 = vpop.f32.mrf.mxu1  ;;  %4883 = vmatprep.mubr.msk.f32.mxu0 %vm1019_vm2, %v7197_v16  ;;  %v7246_v2 = vld [vmem:[#allocation7_spill] sm:$0xff] }
 0x1d9   : > { %v1921_v24 = vpop.f32.mrf.mxu0  ;;  %v1557_v16 = vadd.f32 %v1556_v35, %v7236_v55  ;;  %v3095_v49 = vrot.slane %v886_v7, 1  ;;  %v3364_v35 = vrot.slane %v6307_v30, 2  ;;  %v7248_v3 = vld [vmem:[#allocation35_spill] sm:$0xff] }
 0x1da   : > { %v6479_v32 = vadd.f32 %v1921_v24, %v1547_v17  ;;  %v4538_v5 = vpop.f32.mrf.mxu1  ;;  %4837 = vmatmul.mubr.msk.f32.gmra.mxu1 %vm1019_vm2, %v7233_v14  ;;  %v3094_v17 = vsel %vm936_vm1, %v3092_v39, %v3093_v59  ;;  %v7247_v24 = vld [vmem:[#allocation46_spill] sm:$0xff] }
 0x1db   : > { %v4585_v10 = vpop.f32.mrf.mxu0  ;;  %4839 = vmatprep.mubr.msk.f32.mxu1 %vm1019_vm2, %v7234_v0  ;;  %4884 = vmatmul.mubr.msk.f32.gmra.mxu0 %vm1019_vm2, %v7235_v13  ;;  %v1572_v22 = vadd.f32 %v4538_v5, %v7238_v26  ;;  %v3363_v0 = vrot.slane %v7242_v48, 2  ;;  %v7250_v13 = vld [vmem:[#allocation38_spill] sm:$0xff]  ;;  %v3096_v30 = vsel %vm936_vm1, %v3093_v59, %v3095_v49 }
 0x1dc   : > { %v6488_v38 = vadd.f32 %v4585_v10, %v1562_v28  ;;  %v1566_v23 = vpop.f32.mrf.mxu1  ;;  %4886 = vmatprep.mubr.msk.f32.mxu0 %vm1019_vm2, %v7237_v21  ;;  %v7249_v10 = vld [vmem:[#allocation37_spill] sm:$0xff]  ;;  %v7251_v21 = vld [vmem:[#allocation36_spill] sm:$0xff] }
 0x1dd   : > { %v1931_v12 = vpop.f32.mrf.mxu0  ;;  %v1567_v8 = vadd.f32 %v1566_v23, %v7243_v18  ;;  %v3366_v23 = vrot.slane %v886_v7, 2  ;;  %v7254_v7 = vld [vmem:[#allocation42_spill] sm:$0xff] }
 0x1de   : > { %v6494_v4 = vadd.f32 %v1931_v12, %v1557_v16  ;;  %v4541_v63 = vpop.f32.mrf.mxu1  ;;  %4840 = vmatmul.mubr.msk.f32.gmra.mxu1 %vm1019_vm2, %v7239_v37 }
 0x1df   : > { %v4588_v47 = vpop.f32.mrf.mxu0  ;;  %4842 = vmatprep.mubr.msk.f32.mxu1 %vm1019_vm2, %v7240_v25  ;;  %4887 = vmatmul.mubr.msk.f32.gmra.mxu0 %vm1019_vm2, %v7241_v56  ;;  %v1582_v31 = vadd.f32 %v4541_v63, %v7245_v50  ;;  %v7252_v63 = vld [vmem:[#allocation41_spill] sm:$0xff]  ;;  %v7253_v25 = vld [vmem:[#allocation39_spill] sm:$0xff]  ;;  %v3365_v56 = vsel %vm1605_vm3, %v3363_v0, %v3364_v35 }
 0x1e0   : > { %v6504_v46 = vadd.f32 %v4588_v47, %v1572_v22  ;;  %v1576_v60 = vpop.f32.mrf.mxu1  ;;  %4889 = vmatprep.mubr.msk.f32.mxu0 %vm1019_vm2, %v7244_v44  ;;  %v3367_v44 = vsel %vm1605_vm3, %v3364_v35, %v3366_v23 }
 0x1e1   : > { %v1941_v57 = vpop.f32.mrf.mxu0  ;;  %v1577_v28 = vadd.f32 %v1576_v60, %v7248_v3 }
 0x1e2   : > { %v6509_v51 = vadd.f32 %v1941_v57, %v1567_v8  ;;  %v4544_v45 = vpop.f32.mrf.mxu1  ;;  %4843 = vmatmul.mubr.msk.f32.gmra.mxu1 %vm1019_vm2, %v7246_v2 }
 0x1e3   : > { %v4591_v58 = vpop.f32.mrf.mxu0  ;;  %4845 = vmatprep.mubr.msk.f32.mxu1 %vm1019_vm2, %v3094_v17  ;;  %4890 = vmatmul.mubr.msk.f32.gmra.mxu0 %vm1019_vm2, %v7247_v24  ;;  %v1592_v12 = vadd.f32 %v4544_v45, %v7251_v21 }
 0x1e4   : > { %v6519_v5 = vadd.f32 %v4591_v58, %v1582_v31  ;;  %v1586_v14 = vpop.f32.mrf.mxu1  ;;  %4892 = vmatprep.mubr.msk.f32.mxu0 %vm1019_vm2, %v7249_v10 }
 0x1e5   : > { %v1587_v55 = vadd.f32 %v1586_v14, %v7250_v13  ;;  %v1951_v16 = vpop.f32.mrf.mxu0 }
 0x1e6   : > { %v6527_v26 = vadd.f32 %v1951_v16, %v1577_v28  ;;  %v4547_v22 = vpop.f32.mrf.mxu1  ;;  %4846 = vmatmul.mubr.msk.f32.gmra.mxu1 %vm1019_vm2, %v3096_v30 }
 0x1e7   : > { %v1602_v37 = vadd.f32 %v4547_v22, %v7252_v63  ;;  %v4594_v47 = vpop.f32.mrf.mxu0  ;;  %4893 = vmatmul.mubr.msk.f32.gmra.mxu0 %vm1019_vm2, %v7253_v25 }
 0x1e8   : > { %v6534_v48 = vadd.f32 %v4594_v47, %v1592_v12  ;;  %v1596_v39 = vpop.f32.mrf.mxu1  ;;  %4895 = vmatprep.mubr.msk.f32.mxu0 %vm1019_vm2, %v3365_v56 }
 0x1e9   : > { %v1597_v59 = vadd.f32 %v1596_v39, %v7254_v7  ;;  %v1961_v18 = vpop.f32.mrf.mxu0 }
 0x1ea   : > { %v6538_v8 = vadd.f32 %v1961_v18, %v1587_v55  ;;  %v4602_v60 = vpop.f32.mrf.mxu1 }
 0x1eb   : > { %v2249_v49 = vadd.f32 %v4602_v60, %v6331_v1  ;;  %v4597_v57 = vpop.f32.mrf.mxu0  ;;  %4896 = vmatmul.mubr.msk.f32.gmra.mxu0 %vm1019_vm2, %v3367_v44 }
 0x1ec   : > { %v6543_v50 = vadd.f32 %v4597_v57, %v1602_v37  ;;  %v2089_v31 = vpop.f32.mrf.mxu1 }
 0x1ed   : > { %v2248_v45 = vadd.f32 %v2089_v31, %v6336_v29  ;;  %v1971_v2 = vpop.f32.mrf.mxu0 }
 0x1ee   : > { %v6546_v17 = vadd.f32 %v1971_v2, %v1597_v59  ;;  %v4605_v58 = vpop.f32.mrf.mxu1 }
 0x1ef   : > { %v2251_v24 = vadd.f32 %v4605_v58, %v6345_v33  ;;  %v4652_v3 = vpop.f32.mrf.mxu0 }
 0x1f0   : > { %v6549_v28 = vadd.f32 %v4652_v3, %v2249_v49  ;;  %v2099_v35 = vpop.f32.mrf.mxu1 }
 0x1f1   : > { %v2250_v1 = vadd.f32 %v2099_v35, %v6351_v61  ;;  %v2361_v14 = vpop.f32.mrf.mxu0 }
 0x1f2   : > { %v6552_v10 = vadd.f32 %v2361_v14, %v2248_v45  ;;  %v4608_v0 = vpop.f32.mrf.mxu1 }
 0x1f3   : > { %v2253_v13 = vadd.f32 %v4608_v0, %v6360_v27  ;;  %v4655_v55 = vpop.f32.mrf.mxu0 }
 0x1f4   : > { %v6555_v29 = vadd.f32 %v4655_v55, %v2251_v24  ;;  %v2109_v16 = vpop.f32.mrf.mxu1 }
 0x1f5   : > { %v2252_v30 = vadd.f32 %v2109_v16, %v6365_v36  ;;  %v2371_v23 = vpop.f32.mrf.mxu0 }
 0x1f6   : > { %v6558_v33 = vadd.f32 %v2371_v23, %v2250_v1  ;;  %v4611_v21 = vpop.f32.mrf.mxu1 }
 0x1f7   : > { %v2255_v12 = vadd.f32 %v4611_v21, %v6374_v15  ;;  %v4658_v22 = vpop.f32.mrf.mxu0 }
 0x1f8   : > { %v6561_v61 = vadd.f32 %v4658_v22, %v2253_v13  ;;  %v2119_v63 = vpop.f32.mrf.mxu1 }
 0x1f9   : > { %v2254_v37 = vadd.f32 %v2119_v63, %v6379_v43  ;;  %v2381_v47 = vpop.f32.mrf.mxu0 }
 0x1fa   : > { %v6564_v27 = vadd.f32 %v2381_v47, %v2252_v30  ;;  %v4614_v25 = vpop.f32.mrf.mxu1 }
 0x1fb   : > { %v2257_v56 = vadd.f32 %v4614_v25, %v6388_v53  ;;  %v4661_v39 = vpop.f32.mrf.mxu0 }
 0x1fc   : > { %v6567_v36 = vadd.f32 %v4661_v39, %v2255_v12  ;;  %v2129_v7 = vpop.f32.mrf.mxu1 }
 0x1fd   : > { %v2256_v59 = vadd.f32 %v2129_v7, %v6393_v54  ;;  %v2391_v18 = vpop.f32.mrf.mxu0 }
 0x1fe   : > { %v6570_v15 = vadd.f32 %v2391_v18, %v2254_v37  ;;  %v4617_v60 = vpop.f32.mrf.mxu1 }
 0x1ff   : > { %v2259_v44 = vadd.f32 %v4617_v60, %v6402_v40  ;;  %v4664_v49 = vpop.f32.mrf.mxu0 }
 0x200   : > { %v6573_v43 = vadd.f32 %v4664_v49, %v2257_v56  ;;  %v2139_v57 = vpop.f32.mrf.mxu1 }
 0x201   : > { %v2258_v31 = vadd.f32 %v2139_v57, %v6407_v62  ;;  %v2401_v45 = vpop.f32.mrf.mxu0 }
 0x202   : > { %v6576_v53 = vadd.f32 %v2401_v45, %v2256_v59  ;;  %v4620_v2 = vpop.f32.mrf.mxu1 }
 0x203   : > { %v2261_v58 = vadd.f32 %v4620_v2, %v6416_v41  ;;  %v4667_v24 = vpop.f32.mrf.mxu0 }
 0x204   : > { %v6579_v54 = vadd.f32 %v4667_v24, %v2259_v44  ;;  %v2149_v3 = vpop.f32.mrf.mxu1 }
 0x205   : > { %v2260_v35 = vadd.f32 %v2149_v3, %v6421_v9  ;;  %v2411_v1 = vpop.f32.mrf.mxu0 }
 0x206   : > { %v6582_v40 = vadd.f32 %v2411_v1, %v2258_v31  ;;  %v4623_v14 = vpop.f32.mrf.mxu1 }
 0x207   : > { %v2263_v0 = vadd.f32 %v4623_v14, %v6429_v19  ;;  %v4670_v13 = vpop.f32.mrf.mxu0 }
 0x208   : > { %v6585_v62 = vadd.f32 %v4670_v13, %v2261_v58  ;;  %v2159_v55 = vpop.f32.mrf.mxu1 }
 0x209   : > { %v2262_v16 = vadd.f32 %v2159_v55, %v6435_v11  ;;  %v2421_v30 = vpop.f32.mrf.mxu0 }
 0x20a   : > { %v6588_v41 = vadd.f32 %v2421_v30, %v2260_v35  ;;  %v4626_v23 = vpop.f32.mrf.mxu1 }
 0x20b   : > { %v2265_v21 = vadd.f32 %v4626_v23, %v6444_v6  ;;  %v4673_v12 = vpop.f32.mrf.mxu0 }
 0x20c   : > { %v6591_v9 = vadd.f32 %v4673_v12, %v2263_v0  ;;  %v2169_v22 = vpop.f32.mrf.mxu1 }
 0x20d   : > { %v2264_v63 = vadd.f32 %v2169_v22, %v6450_v34  ;;  %v2431_v37 = vpop.f32.mrf.mxu0 }
 0x20e   : > { %v6594_v19 = vadd.f32 %v2431_v37, %v2262_v16  ;;  %v4629_v47 = vpop.f32.mrf.mxu1 }
 0x20f   : > { %v2267_v25 = vadd.f32 %v4629_v47, %v6459_v42  ;;  %v4676_v56 = vpop.f32.mrf.mxu0 }
 0x210   : > { %v6597_v11 = vadd.f32 %v4676_v56, %v2265_v21  ;;  %v2179_v39 = vpop.f32.mrf.mxu1 }
 0x211   : > { %v2266_v7 = vadd.f32 %v2179_v39, %v6465_v52  ;;  %v2441_v59 = vpop.f32.mrf.mxu0 }
 0x212   : > { %v6600_v6 = vadd.f32 %v2441_v59, %v2264_v63  ;;  %v4632_v18 = vpop.f32.mrf.mxu1 }
 0x213   : > { %v2269_v60 = vadd.f32 %v4632_v18, %v6474_v20  ;;  %v4679_v44 = vpop.f32.mrf.mxu0 }
 0x214   : > { %v6603_v34 = vadd.f32 %v4679_v44, %v2267_v25  ;;  %v2189_v49 = vpop.f32.mrf.mxu1 }
 0x215   : > { %v2268_v57 = vadd.f32 %v2189_v49, %v6479_v32  ;;  %v2451_v31 = vpop.f32.mrf.mxu0 }
 0x216   : > { %7255 = vst [vmem:[#allocation22_spill] sm:$0xff] %v6603_v34  ;;  %v6606_v42 = vadd.f32 %v2451_v31, %v2266_v7  ;;  %v4635_v45 = vpop.f32.mrf.mxu1 }
 0x217   : > { %v2271_v2 = vadd.f32 %v4635_v45, %v6488_v38  ;;  %v4682_v58 = vpop.f32.mrf.mxu0 }
 0x218   : > { %7256 = vst [vmem:[#allocation10_spill] sm:$0xff] %v6606_v42  ;;  %v6609_v52 = vadd.f32 %v4682_v58, %v2269_v60  ;;  %v2199_v24 = vpop.f32.mrf.mxu1 }
 0x219   : > { %v2270_v3 = vadd.f32 %v2199_v24, %v6494_v4  ;;  %v2461_v35 = vpop.f32.mrf.mxu0 }
 0x21a   : > { %7257 = vst [vmem:[#allocation11_spill] sm:$0xff] %v6609_v52  ;;  %v6612_v20 = vadd.f32 %v2461_v35, %v2268_v57  ;;  %v4638_v1 = vpop.f32.mrf.mxu1 }
 0x21b   : > { %v2273_v14 = vadd.f32 %v4638_v1, %v6504_v46  ;;  %v4685_v0 = vpop.f32.mrf.mxu0 }
 0x21c   : > { %7258 = vst [vmem:[#allocation14_spill] sm:$0xff] %v6612_v20  ;;  %v6615_v32 = vadd.f32 %v4685_v0, %v2271_v2  ;;  %v2209_v13 = vpop.f32.mrf.mxu1 }
 0x21d   : > { %v2272_v55 = vadd.f32 %v2209_v13, %v6509_v51  ;;  %v2471_v16 = vpop.f32.mrf.mxu0 }
 0x21e   : > { %7259 = vst [vmem:[#allocation15_spill] sm:$0xff] %v6615_v32  ;;  %v6618_v38 = vadd.f32 %v2471_v16, %v2270_v3  ;;  %v4641_v30 = vpop.f32.mrf.mxu1 }
 0x21f   : > { %v2275_v23 = vadd.f32 %v4641_v30, %v6519_v5  ;;  %v4688_v21 = vpop.f32.mrf.mxu0 }
 0x220   : > { %7260 = vst [vmem:[#allocation18_spill] sm:$0xff] %v6618_v38  ;;  %v6621_v4 = vadd.f32 %v4688_v21, %v2273_v14  ;;  %v2219_v12 = vpop.f32.mrf.mxu1 }
 0x221   : > { %v2274_v22 = vadd.f32 %v2219_v12, %v6527_v26  ;;  %v2481_v63 = vpop.f32.mrf.mxu0 }
 0x222   : > { %7261 = vst [vmem:[#allocation19_spill] sm:$0xff] %v6621_v4  ;;  %v6624_v46 = vadd.f32 %v2481_v63, %v2272_v55  ;;  %v4644_v37 = vpop.f32.mrf.mxu1 }
 0x223   : > { %v2277_v47 = vadd.f32 %v4644_v37, %v6534_v48  ;;  %v4691_v25 = vpop.f32.mrf.mxu0 }
 0x224   : > { %7262 = vst [vmem:[#allocation24_spill] sm:$0xff] %v6624_v46  ;;  %v6627_v51 = vadd.f32 %v4691_v25, %v2275_v23  ;;  %v2229_v56 = vpop.f32.mrf.mxu1 }
 0x225   : > { %v2276_v39 = vadd.f32 %v2229_v56, %v6538_v8  ;;  %v2491_v7 = vpop.f32.mrf.mxu0 }
 0x226   : > { %7263 = vst [vmem:[#allocation25_spill] sm:$0xff] %v6627_v51  ;;  %v6630_v5 = vadd.f32 %v2491_v7, %v2274_v22  ;;  %v4647_v59 = vpop.f32.mrf.mxu1 }
 0x227   : > { %v2279_v18 = vadd.f32 %v4647_v59, %v6543_v50  ;;  %v4694_v60 = vpop.f32.mrf.mxu0 }
 0x228   : > { %7264 = vst [vmem:[#allocation28_spill] sm:$0xff] %v6630_v5  ;;  %v6633_v26 = vadd.f32 %v4694_v60, %v2277_v47  ;;  %v2239_v44 = vpop.f32.mrf.mxu1 }
 0x229   : > { %v2278_v49 = vadd.f32 %v2239_v44, %v6546_v17  ;;  %v2501_v57 = vpop.f32.mrf.mxu0 }
 0x22a   : > { %7265 = vst [vmem:[#allocation29_spill] sm:$0xff] %v6633_v26  ;;  %v6636_v48 = vadd.f32 %v2501_v57, %v2276_v39  ;;  %v6638_v31 = vpop.f32.mrf.mxu1 }
 0x22b   : > { %v4697_v45 = vpop.f32.mrf.mxu0 }
 0x22c   : > { %7266 = vst [vmem:[#allocation32_spill] sm:$0xff] %v6636_v48  ;;  %v6640_v2 = vadd.f32 %v4697_v45, %v2279_v18  ;;  %v6642_v8 = vpop.f32.mrf.mxu1 }
 0x22d   : > { %v2511_v58 = vpop.f32.mrf.mxu0 }
 0x22e   : > { %7267 = vst [vmem:[#allocation33_spill] sm:$0xff] %v6640_v2  ;;  %v6644_v24 = vadd.f32 %v2511_v58, %v2278_v49  ;;  %v6646_v50 = vpop.f32.mrf.mxu1 }
 0x22f   : > { %v6648_v3 = vpop.f32.mrf.mxu0 }
 0x230   : > { %7268 = vst [vmem:[#allocation2_spill] sm:$0xff] %v6644_v24  ;;  %v6650_v35 = vpop.f32.mrf.mxu1 }
 0x231   : > { %v6652_v17 = vpop.f32.mrf.mxu0 }
 0x232   : > { %v6654_v1 = vpop.f32.mrf.mxu1 }
 0x233   : > { %v6656_v14 = vpop.f32.mrf.mxu0 }
 0x234   : > { %v6658_v0 = vpop.f32.mrf.mxu1 }
 0x235   : > { %v6660_v13 = vpop.f32.mrf.mxu0 }
 0x236   : > { %v6662_v55 = vpop.f32.mrf.mxu1 }
 0x237   : > { %v6664_v16 = vpop.f32.mrf.mxu0 }
 0x238   : > { %v6666_v30 = vpop.f32.mrf.mxu1 }
 0x239   : > { %v6668_v23 = vpop.f32.mrf.mxu0 }
 0x23a   : > { %v6670_v21 = vpop.f32.mrf.mxu1 }
 0x23b   : > { %v6672_v12 = vpop.f32.mrf.mxu0 }
 0x23c   : > { %v6674_v22 = vpop.f32.mrf.mxu1 }
 0x23d   : > { %v6676_v63 = vpop.f32.mrf.mxu0 }
 0x23e   : > { %v6678_v37 = vpop.f32.mrf.mxu1 }
 0x23f   : > { %v6680_v47 = vpop.f32.mrf.mxu0 }
 0x240   : > { %v6682_v25 = vpop.f32.mrf.mxu1 }
 0x241   : > { %v6684_v56 = vpop.f32.mrf.mxu0 }
 0x242   : > { %v6686_v39 = vpop.f32.mrf.mxu1 }
 0x243   : > { %v6688_v7 = vpop.f32.mrf.mxu0 }
 0x244   : > { %v6690_v59 = vpop.f32.mrf.mxu1 }
 0x245   : > { %v6692_v18 = vpop.f32.mrf.mxu0 }
 0x246   : > { %v6694_v60 = vpop.f32.mrf.mxu1 }
 0x247   : > { %v6696_v44 = vpop.f32.mrf.mxu0 }
 0x248   : > { %v6698_v49 = vpop.f32.mrf.mxu1 }
 0x249   : > { %v6700_v57 = vpop.f32.mrf.mxu0 }
 0x24a   : > { %v6702_v45 = vpop.f32.mrf.mxu1 }
 0x24b   : > { %v6704_v58 = vpop.f32.mrf.mxu0 }
 0x24c   : > { %v6706_v24 = vpop.f32.mrf.mxu1 }
 0x24d   : > { %v6708_v2 = vpop.f32.mrf.mxu0 }
 0x24e   : > { %v6710_v48 = vpop.f32.mrf.mxu1 }
 0x24f   : > { %7269 = vst [vmem:[#allocation3_spill] sm:$0xff] %v6710_v48  ;;  %v6712_v26 = vpop.f32.mrf.mxu0 }
 0x250   : > { %v6714_v5 = vpop.f32.mrf.mxu1 }
 0x251   : > { %7270 = vst [vmem:[#allocation4_spill] sm:$0xff] %v6714_v5  ;;  %v6716_v51 = vpop.f32.mrf.mxu0 }
 0x252   : > { %7271 = vst [vmem:[#allocation5_spill] sm:$0xff] %v6716_v51  ;;  %v6718_v46 = vpop.f32.mrf.mxu1 }
 0x253   : > { %7272 = vst [vmem:[#allocation8_spill] sm:$0xff] %v6718_v46  ;;  %v6720_v4 = vpop.f32.mrf.mxu0 }
 0x254   : > { %7273 = vst [vmem:[#allocation9_spill] sm:$0xff] %v6720_v4  ;;  %v6722_v38 = vpop.f32.mrf.mxu1 }
 0x255   : > { %7274 = vst [vmem:[#allocation12_spill] sm:$0xff] %v6722_v38  ;;  %v6724_v32 = vpop.f32.mrf.mxu0 }
 0x256   : > { %7275 = vst [vmem:[#allocation13_spill] sm:$0xff] %v6724_v32  ;;  %v6726_v20 = vpop.f32.mrf.mxu1 }
 0x257   : > { %7276 = vst [vmem:[#allocation16_spill] sm:$0xff] %v6726_v20  ;;  %v6728_v52 = vpop.f32.mrf.mxu0 }
 0x258   : > { %7277 = vst [vmem:[#allocation17_spill] sm:$0xff] %v6728_v52  ;;  %v6730_v42 = vpop.f32.mrf.mxu1 }
 0x259   : > { %7278 = vst [vmem:[#allocation27_spill] sm:$0xff] %v6730_v42  ;;  %v6732_v48 = vpop.f32.mrf.mxu0 }
 0x25a   : > { %7279 = vst [vmem:[#allocation30_spill] sm:$0xff] %v6732_v48  ;;  %v6734_v34 = vpop.f32.mrf.mxu1 }
 0x25b   : > { %7280 = vst [vmem:[#allocation23_spill] sm:$0xff] %v6734_v34  ;;  %v6736_v5 = vpop.f32.mrf.mxu0 }
 0x25c   : > { %7281 = vst [vmem:[#allocation20_spill] sm:$0xff] %v6736_v5  ;;  %v6738_v51 = vpop.f32.mrf.mxu1 }
 0x25d   : > { %7282 = vst [vmem:[#allocation43_spill] sm:$0xff] %v6738_v51  ;;  %v6740_v46 = vpop.f32.mrf.mxu0 }
 0x25e   : > { %7283 = vst [vmem:[#allocation21_spill] sm:$0xff] %v6740_v46  ;;  %v6742_v4 = vpop.f32.mrf.mxu1 }
 0x25f   : > { %7284 = vst [vmem:[#allocation31_spill] sm:$0xff] %v6742_v4  ;;  %v6744_v38 = vpop.f32.mrf.mxu0 }
 0x260   : > { %7285 = vst [vmem:[#allocation6_spill] sm:$0xff] %v6744_v38  ;;  %v6746_v32 = vpop.f32.mrf.mxu1 }
 0x261   : > { %7286 = vst [vmem:[#allocation44_spill] sm:$0xff] %v6746_v32  ;;  %v6748_v20 = vpop.f32.mrf.mxu0  ;;  %v2792_v32 = vadd.f32 %v6638_v31, %v6549_v28  ;;  %v6781_v31 = vld [vmem:[%s7018_s5] ss:$0 sm:$0xff] }
 0x262   : > { %7287 = vst [vmem:[#allocation40_spill] sm:$0xff] %v6748_v20  ;;  %v6750_v52 = vpop.f32.mrf.mxu1 }
 0x263   : > { %7288 = vst [vmem:[#allocation26_spill] sm:$0xff] %v6750_v52  ;;  %v6752_v42 = vpop.f32.mrf.mxu0  ;;  %v2791_v52 = vadd.f32 %v6642_v8, %v6552_v10  ;;  %v2793_v10 = vadd.f32 %v6650_v35, %v6558_v33 }
 0x264   : > { %7289 = vst [vmem:[#allocation45_spill] sm:$0xff] %v6752_v42  ;;  %v6754_v48 = vpop.f32.mrf.mxu1 }
 0x265   : > { %7290 = vst [vmem:[#allocation34_spill] sm:$0xff] %v6754_v48  ;;  %v6756_v34 = vpop.f32.mrf.mxu0  ;;  %v3060_v48 = vadd.f32 %v6648_v3, %v2792_v32 }
 0x266   : > { %7291 = vst [vmem:[#allocation7_spill] sm:$0xff] %v6756_v34  ;;  %v6758_v5 = vpop.f32.mrf.mxu1 }
 0x267   : > { %7292 = vst [vmem:[#allocation46_spill] sm:$0xff] %v6758_v5  ;;  %v6760_v51 = vpop.f32.mrf.mxu0  ;;  %v2794_v5 = vadd.f32 %v6646_v50, %v6555_v29  ;;  %v2796_v29 = vadd.f32 %v6654_v1, %v6561_v61 }
 0x268   : > { %7293 = vst [vmem:[#allocation35_spill] sm:$0xff] %v6760_v51  ;;  %v6762_v46 = vpop.f32.mrf.mxu1 }
 0x269   : > { %7294 = vst [vmem:[#allocation37_spill] sm:$0xff] %v6762_v46  ;;  %v6764_v4 = vpop.f32.mrf.mxu0  ;;  %v3059_v46 = vadd.f32 %v6652_v17, %v2791_v52  ;;  %v3062_v32 = vadd.f32 %v6656_v14, %v2794_v5  ;;  %v6791_v52 = vld [vmem:[%s7019_s6] ss:$0 sm:$0xff] }
 0x26a   : > { %7295 = vst [vmem:[#allocation38_spill] sm:$0xff] %v6764_v4  ;;  %v4802_v20 = vpop.f32.mrf.mxu1 }
 0x26b   : > { %v6768_v38 = vpop.f32.mrf.mxu0  ;;  %v3332_v4 = vadd.f32 %v4802_v20, %v3060_v48  ;;  %v3061_v48 = vadd.f32 %v6660_v13, %v2793_v10 }
 0x26c   : > { %v3172_v34 = vpop.f32.mrf.mxu1 }
 0x26d   : > { %v6773_v42 = vpop.f32.mrf.mxu0  ;;  %v3331_v8 = vadd.f32 %v3172_v34, %v3059_v46  ;;  %v2795_v34 = vadd.f32 %v6658_v0, %v6564_v27 }
 0x26e   : > { %7296 = vst [vmem:[#allocation36_spill] sm:$0xff] %v6773_v42  ;;  %v4805_v51 = vpop.f32.mrf.mxu1 }
 0x26f   : > { %v4852_v28 = vpop.f32.mrf.mxu0  ;;  %v3334_v50 = vadd.f32 %v4805_v51, %v3062_v32  ;;  %v2798_v51 = vadd.f32 %v6662_v55, %v6567_v36  ;;  %v3063_v13 = vadd.f32 %v6668_v23, %v2795_v34  ;;  %v2797_v36 = vadd.f32 %v6666_v30, %v6570_v15 }
 0x270   : > { %v3603_v3 = vadd.f32 %v4852_v28, %v3332_v4  ;;  %v3182_v42 = vpop.f32.mrf.mxu1  ;;  %v3064_v4 = vadd.f32 %v6664_v16, %v2796_v29 }
 0x271   : > { %v3443_v20 = vpop.f32.mrf.mxu0  ;;  %v3333_v17 = vadd.f32 %v3182_v42, %v3061_v48  ;;  %v3066_v55 = vadd.f32 %v6672_v12, %v2798_v51 }
 0x272   : > { %v3642_v33 = vmul.f32 %v6781_v31, %v3603_v3  ;;  %v3602_v35 = vadd.f32 %v3443_v20, %v3331_v8  ;;  %v4808_v5 = vpop.f32.mrf.mxu1 }
 0x273   : > { %v4855_v61 = vpop.f32.mrf.mxu0  ;;  %v3336_v27 = vadd.f32 %v4808_v5, %v3064_v4  ;;  %v3065_v5 = vadd.f32 %v6676_v63, %v2797_v36 }
 0x274   : > { %v3681_v46 = vadd.f32 %v6791_v52, %v3642_v33  ;;  %v3641_v1 = vmul.f32 %v6781_v31, %v3602_v35  ;;  %v3605_v14 = vadd.f32 %v4855_v61, %v3334_v50  ;;  %v3192_v28 = vpop.f32.mrf.mxu1  ;;  %v2800_v35 = vadd.f32 %v6670_v21, %v6573_v43 }
 0x275   : > { %v3453_v0 = vpop.f32.mrf.mxu0  ;;  %v3335_v23 = vadd.f32 %v3192_v28, %v3063_v13 }
 0x276   : > { %v3713_v16 = vmax.f32 %v3681_v46, 0.0  ;;  %v3680_v42 = vadd.f32 %v6791_v52, %v3641_v1  ;;  %v3644_v10 = vmul.f32 %v6781_v31, %v3605_v14  ;;  %v3604_v32 = vadd.f32 %v3453_v0, %v3333_v17  ;;  %v4811_v8 = vpop.f32.mrf.mxu1 }
 0x277   : > { %v4858_v3 = vpop.f32.mrf.mxu0  ;;  %v3338_v15 = vadd.f32 %v4811_v8, %v3066_v55  ;;  %v2799_v17 = vadd.f32 %v6674_v22, %v6576_v53  ;;  %v3068_v1 = vadd.f32 %v6680_v47, %v2800_v35  ;;  %v2801_v8 = vadd.f32 %v6682_v25, %v6582_v40 }
 0x278   : > { %3745 = vst.msk [vmem:[%s6807_s21 + $0x8] sm:$0xff] %vm1019_vm2, %v3713_v16  ;;  %v3712_v29 = vmax.f32 %v3680_v42, 0.0  ;;  %v3683_v20 = vadd.f32 %v6791_v52, %v3644_v10  ;;  %v3643_v48 = vmul.f32 %v6781_v31, %v3604_v32  ;;  %v3607_v50 = vadd.f32 %v4858_v3, %v3336_v27  ;;  %v3202_v33 = vpop.f32.mrf.mxu1 }
 0x279   : > { %v3463_v30 = vpop.f32.mrf.mxu0  ;;  %v3337_v43 = vadd.f32 %v3202_v33, %v3065_v5  ;;  %v2802_v27 = vadd.f32 %v6678_v37, %v6579_v54  ;;  %v3067_v0 = vadd.f32 %v6684_v56, %v2799_v17 }
 0x27a   : > { %3744 = vst.msk [vmem:[%s6807_s21] sm:$0xff] %vm1019_vm2, %v3712_v29  ;;  %v3715_v12 = vmax.f32 %v3683_v20, 0.0  ;;  %v3682_v34 = vadd.f32 %v6791_v52, %v3643_v48  ;;  %v3646_v4 = vmul.f32 %v6781_v31, %v3607_v50  ;;  %v3606_v61 = vadd.f32 %v3463_v30, %v3335_v23  ;;  %v4814_v46 = vpop.f32.mrf.mxu1 }
 0x27b   : > { %v4861_v21 = vpop.f32.mrf.mxu0  ;;  %v3340_v53 = vadd.f32 %v4814_v46, %v3068_v1  ;;  %v3070_v36 = vadd.f32 %v6688_v7, %v2802_v27  ;;  %v2804_v20 = vadd.f32 %v6686_v39, %v6585_v62  ;;  %v3069_v48 = vadd.f32 %v6692_v18, %v2801_v8 }
 0x27c   : > { %3747 = vst.msk [vmem:[%s6807_s21 + $0x18] sm:$0xff] %vm1019_vm2, %v3715_v12  ;;  %v3714_v63 = vmax.f32 %v3682_v34, 0.0  ;;  %v3685_v14 = vadd.f32 %v6791_v52, %v3646_v4  ;;  %v3645_v28 = vmul.f32 %v6781_v31, %v3606_v61  ;;  %v3609_v51 = vadd.f32 %v4861_v21, %v3338_v15  ;;  %v3212_v13 = vpop.f32.mrf.mxu1 }
 0x27d   : > { %v3473_v22 = vpop.f32.mrf.mxu0  ;;  %v3339_v54 = vadd.f32 %v3212_v13, %v3067_v0  ;;  %v2803_v15 = vadd.f32 %v6690_v59, %v6588_v41  ;;  %v3072_v30 = vadd.f32 %v6696_v44, %v2804_v20  ;;  %v2806_v46 = vadd.f32 %v6694_v60, %v6591_v9 }
 0x27e   : > { %3746 = vst.msk [vmem:[%s6807_s21 + $0x10] sm:$0xff] %vm1019_vm2, %v3714_v63  ;;  %v3717_v47 = vmax.f32 %v3685_v14, 0.0  ;;  %v3684_v16 = vadd.f32 %v6791_v52, %v3645_v28  ;;  %v3648_v42 = vmul.f32 %v6781_v31, %v3609_v51  ;;  %v3608_v10 = vadd.f32 %v3473_v22, %v3337_v43  ;;  %v4817_v32 = vpop.f32.mrf.mxu1 }
 0x27f   : > { %v4864_v37 = vpop.f32.mrf.mxu0  ;;  %v3342_v40 = vadd.f32 %v4817_v32, %v3070_v36  ;;  %v3071_v17 = vadd.f32 %v6700_v57, %v2803_v15  ;;  %v2805_v14 = vadd.f32 %v6698_v49, %v6594_v19  ;;  %v3074_v28 = vadd.f32 %v6704_v58, %v2806_v46  ;;  %v7304_v46 = vld [vmem:[#allocation8_spill] sm:$0xff] }
 0x280   : > { %3749 = vst.msk [vmem:[%s6807_s21 + $0x28] sm:$0xff] %vm1019_vm2, %v3717_v47  ;;  %v3716_v56 = vmax.f32 %v3684_v16, 0.0  ;;  %v3687_v55 = vadd.f32 %v6791_v52, %v3648_v42  ;;  %v3647_v23 = vmul.f32 %v6781_v31, %v3608_v10  ;;  %v3611_v3 = vadd.f32 %v4864_v37, %v3340_v53  ;;  %v3222_v29 = vpop.f32.mrf.mxu1 }
 0x281   : > { %v3483_v25 = vpop.f32.mrf.mxu0  ;;  %v3341_v62 = vadd.f32 %v3222_v29, %v3069_v48  ;;  %v2808_v53 = vadd.f32 %v6702_v45, %v6597_v11  ;;  %v3073_v22 = vadd.f32 %v6708_v2, %v2805_v14  ;;  %v2807_v32 = vadd.f32 %v6706_v24, %v6600_v6  ;;  %v7299_v29 = vld [vmem:[#allocation5_spill] sm:$0xff] }
 0x282   : > { %3748 = vst.msk [vmem:[%s6807_s21 + $0x20] sm:$0xff] %vm1019_vm2, %v3716_v56  ;;  %v3719_v7 = vmax.f32 %v3687_v55, 0.0  ;;  %v3686_v50 = vadd.f32 %v6791_v52, %v3647_v23  ;;  %v3650_v33 = vmul.f32 %v6781_v31, %v3611_v3  ;;  %v3610_v35 = vadd.f32 %v3483_v25, %v3339_v54  ;;  %v4820_v5 = vpop.f32.mrf.mxu1  ;;  %v7297_v55 = vld [vmem:[#allocation22_spill] sm:$0xff]  ;;  %v7298_v23 = vld [vmem:[#allocation3_spill] sm:$0xff] }
 0x283   : > { %v4867_v39 = vpop.f32.mrf.mxu0  ;;  %v3344_v41 = vadd.f32 %v4820_v5, %v3072_v30  ;;  %v3076_v8 = vadd.f32 %v6712_v26, %v2808_v53  ;;  %v2810_v3 = vadd.f32 %v7298_v23, %v7297_v55  ;;  %v3075_v20 = vadd.f32 %v7299_v29, %v2807_v32  ;;  %v7302_v5 = vld [vmem:[#allocation9_spill] sm:$0xff]  ;;  %v7313_v55 = vld [vmem:[#allocation27_spill] sm:$0xff] }
 0x284   : > { %3751 = vst.msk [vmem:[%s6807_s21 + $0x38] sm:$0xff] %vm1019_vm2, %v3719_v7  ;;  %v3718_v18 = vmax.f32 %v3686_v50, 0.0  ;;  %v3689_v12 = vadd.f32 %v6791_v52, %v3650_v33  ;;  %v3649_v34 = vmul.f32 %v6781_v31, %v3610_v35  ;;  %v3613_v4 = vadd.f32 %v4867_v39, %v3342_v40  ;;  %v3232_v61 = vpop.f32.mrf.mxu1  ;;  %v7300_v50 = vld [vmem:[#allocation10_spill] sm:$0xff]  ;;  %v7301_v33 = vld [vmem:[#allocation4_spill] sm:$0xff] }
 0x285   : > { %v3493_v59 = vpop.f32.mrf.mxu0  ;;  %v3343_v9 = vadd.f32 %v3232_v61, %v3071_v17  ;;  %v2809_v35 = vadd.f32 %v7301_v33, %v7300_v50  ;;  %v3078_v15 = vadd.f32 %v7302_v5, %v2810_v3  ;;  %v7303_v61 = vld [vmem:[#allocation11_spill] sm:$0xff]  ;;  %v7314_v3 = vld [vmem:[#allocation20_spill] sm:$0xff] }
 0x286   : > { %3750 = vst.msk [vmem:[%s6807_s21 + $0x30] sm:$0xff] %vm1019_vm2, %v3718_v18  ;;  %v3721_v44 = vmax.f32 %v3689_v12, 0.0  ;;  %v3688_v1 = vadd.f32 %v6791_v52, %v3649_v34  ;;  %v3652_v43 = vmul.f32 %v6781_v31, %v3613_v4  ;;  %v3612_v21 = vadd.f32 %v3493_v59, %v3341_v62  ;;  %v4823_v63 = vpop.f32.mrf.mxu1  ;;  %v7316_v50 = vld [vmem:[#allocation23_spill] sm:$0xff] }
 0x287   : > { %v4870_v60 = vpop.f32.mrf.mxu0  ;;  %v3346_v19 = vadd.f32 %v4823_v63, %v3074_v28  ;;  %v2812_v17 = vadd.f32 %v7304_v46, %v7303_v61  ;;  %v7319_v61 = vld [vmem:[#allocation43_spill] sm:$0xff] }
 0x288   : > { %3753 = vst.msk [vmem:[%s6807_s21 + $0x48] sm:$0xff] %vm1019_vm2, %v3721_v44  ;;  %v3720_v57 = vmax.f32 %v3688_v1, 0.0  ;;  %v3691_v51 = vadd.f32 %v6791_v52, %v3652_v43  ;;  %v3651_v13 = vmul.f32 %v6781_v31, %v3612_v21  ;;  %v3615_v27 = vadd.f32 %v4870_v60, %v3344_v41  ;;  %v3242_v0 = vpop.f32.mrf.mxu1  ;;  %v7305_v41 = vld [vmem:[#allocation13_spill] sm:$0xff]  ;;  %v7307_v60 = vld [vmem:[#allocation12_spill] sm:$0xff] }
 0x289   : > { %v3503_v49 = vpop.f32.mrf.mxu0  ;;  %v3345_v11 = vadd.f32 %v3242_v0, %v3073_v22  ;;  %v3077_v59 = vadd.f32 %v7305_v41, %v2809_v35  ;;  %v7317_v35 = vld [vmem:[#allocation21_spill] sm:$0xff] }
 0x28a   : > { %3752 = vst.msk [vmem:[%s6807_s21 + $0x40] sm:$0xff] %vm1019_vm2, %v3720_v57  ;;  %v3723_v58 = vmax.f32 %v3691_v51, 0.0  ;;  %v3690_v47 = vadd.f32 %v6791_v52, %v3651_v13  ;;  %v3654_v16 = vmul.f32 %v6781_v31, %v3615_v27  ;;  %v3614_v42 = vadd.f32 %v3503_v49, %v3343_v9  ;;  %v4826_v10 = vpop.f32.mrf.mxu1  ;;  %v7306_v9 = vld [vmem:[#allocation14_spill] sm:$0xff]  ;;  %v7308_v51 = vld [vmem:[#allocation17_spill] sm:$0xff] }
 0x28b   : > { %v4873_v45 = vpop.f32.mrf.mxu0  ;;  %v3348_v6 = vadd.f32 %v4826_v10, %v3076_v8  ;;  %v2811_v57 = vadd.f32 %v7307_v60, %v7306_v9  ;;  %v3080_v13 = vadd.f32 %v7308_v51, %v2812_v17  ;;  %v7311_v10 = vld [vmem:[#allocation30_spill] sm:$0xff]  ;;  %v7322_v9 = vld [vmem:[#allocation31_spill] sm:$0xff] }
 0x28c   : > { %3755 = vst.msk [vmem:[%s6807_s21 + $0x58] sm:$0xff] %vm1019_vm2, %v3723_v58  ;;  %v3722_v2 = vmax.f32 %v3690_v47, 0.0  ;;  %v3693_v36 = vadd.f32 %v6791_v52, %v3654_v16  ;;  %v3653_v54 = vmul.f32 %v6781_v31, %v3614_v42  ;;  %v3617_v37 = vadd.f32 %v4873_v45, %v3346_v19  ;;  %v3252_v56 = vpop.f32.mrf.mxu1  ;;  %v7309_v47 = vld [vmem:[#allocation15_spill] sm:$0xff]  ;;  %v7310_v16 = vld [vmem:[#allocation16_spill] sm:$0xff]  ;;  %v7320_v17 = vld [vmem:[#allocation6_spill] sm:$0xff] }
 0x28d   : > { %v3513_v24 = vpop.f32.mrf.mxu0  ;;  %v3347_v30 = vadd.f32 %v3252_v56, %v3075_v20  ;;  %v2814_v42 = vadd.f32 %v7310_v16, %v7309_v47  ;;  %v3079_v32 = vadd.f32 %v7311_v10, %v2811_v57  ;;  %v7312_v56 = vld [vmem:[#allocation18_spill] sm:$0xff]  ;;  %v7323_v57 = vld [vmem:[#allocation40_spill] sm:$0xff] }
 0x28e   : > { %3754 = vst.msk [vmem:[%s6807_s21 + $0x50] sm:$0xff] %vm1019_vm2, %v3722_v2  ;;  %v3725_v26 = vmax.f32 %v3693_v36, 0.0  ;;  %v3692_v48 = vadd.f32 %v6791_v52, %v3653_v54  ;;  %v3656_v40 = vmul.f32 %v6781_v31, %v3617_v37  ;;  %v3616_v25 = vadd.f32 %v3513_v24, %v3345_v11  ;;  %v4829_v7 = vpop.f32.mrf.mxu1  ;;  %v7325_v47 = vld [vmem:[#allocation44_spill] sm:$0xff] }
 0x28f   : > { %v4876_v62 = vpop.f32.mrf.mxu0  ;;  %v3350_v44 = vadd.f32 %v4829_v7, %v3078_v15  ;;  %v2813_v23 = vadd.f32 %v7313_v55, %v7312_v56  ;;  %v3082_v29 = vadd.f32 %v7314_v3, %v2814_v42  ;;  %v7315_v7 = vld [vmem:[#allocation19_spill] sm:$0xff]  ;;  %v7326_v42 = vld [vmem:[#allocation45_spill] sm:$0xff]  ;;  %v7328_v56 = vld [vmem:[#allocation26_spill] sm:$0xff] }
 0x290   : > { %3757 = vst.msk [vmem:[%s6807_s21 + $0x68] sm:$0xff] %vm1019_vm2, %v3725_v26  ;;  %v3724_v39 = vmax.f32 %v3692_v48, 0.0  ;;  %v3695_v18 = vadd.f32 %v6791_v52, %v3656_v40  ;;  %v3655_v12 = vmul.f32 %v6781_v31, %v3616_v25  ;;  %v3619_v34 = vadd.f32 %v4876_v62, %v3348_v6  ;;  %v3262_v4 = vpop.f32.mrf.mxu1 }
 0x291   : > { %v3523_v1 = vpop.f32.mrf.mxu0  ;;  %v3349_v27 = vadd.f32 %v3262_v4, %v3077_v59  ;;  %v2816_v33 = vadd.f32 %v7316_v50, %v7315_v7  ;;  %v3081_v5 = vadd.f32 %v7317_v35, %v2813_v23  ;;  %v7318_v4 = vld [vmem:[#allocation24_spill] sm:$0xff]  ;;  %v7329_v23 = vld [vmem:[#allocation7_spill] sm:$0xff]  ;;  %v7331_v7 = vld [vmem:[#allocation34_spill] sm:$0xff] }
 0x292   : > { %3756 = vst.msk [vmem:[%s6807_s21 + $0x60] sm:$0xff] %vm1019_vm2, %v3724_v39  ;;  %v3727_v43 = vmax.f32 %v3695_v18, 0.0  ;;  %v3694_v21 = vadd.f32 %v6791_v52, %v3655_v12  ;;  %v3658_v63 = vmul.f32 %v6781_v31, %v3619_v34  ;;  %v3618_v14 = vadd.f32 %v3523_v1, %v3347_v30  ;;  %v4832_v28 = vpop.f32.mrf.mxu1 }
 0x293   : > { %v4879_v0 = vpop.f32.mrf.mxu0  ;;  %v3352_v8 = vadd.f32 %v4832_v28, %v3080_v13  ;;  %v2815_v46 = vadd.f32 %v7319_v61, %v7318_v4  ;;  %v3084_v41 = vadd.f32 %v7320_v17, %v2816_v33  ;;  %v7321_v28 = vld [vmem:[#allocation25_spill] sm:$0xff]  ;;  %v7332_v33 = vld [vmem:[#allocation35_spill] sm:$0xff]  ;;  %v7334_v4 = vld [vmem:[#allocation46_spill] sm:$0xff] }
 0x294   : > { %3759 = vst.msk [vmem:[%s6807_s21 + $0x78] sm:$0xff] %vm1019_vm2, %v3727_v43  ;;  %v3726_v53 = vmax.f32 %v3694_v21, 0.0  ;;  %v3697_v22 = vadd.f32 %v6791_v52, %v3658_v63  ;;  %v3657_v19 = vmul.f32 %v6781_v31, %v3618_v14  ;;  %v3621_v49 = vadd.f32 %v4879_v0, %v3350_v44  ;;  %v3272_v58 = vpop.f32.mrf.mxu1 }
 0x295   : > { %v3533_v11 = vpop.f32.mrf.mxu0  ;;  %v3351_v20 = vadd.f32 %v3272_v58, %v3079_v32  ;;  %v2818_v60 = vadd.f32 %v7322_v9, %v7321_v28  ;;  %v3083_v51 = vadd.f32 %v7323_v57, %v2815_v46  ;;  %v7324_v58 = vld [vmem:[#allocation28_spill] sm:$0xff]  ;;  %v7335_v46 = vld [vmem:[#allocation38_spill] sm:$0xff]  ;;  %v7337_v28 = vld [vmem:[#allocation37_spill] sm:$0xff] }
 0x296   : > { %3758 = vst.msk [vmem:[%s6807_s21 + $0x70] sm:$0xff] %vm1019_vm2, %v3726_v53  ;;  %v3729_v45 = vmax.f32 %v3697_v22, 0.0  ;;  %v3696_v2 = vadd.f32 %v6791_v52, %v3657_v19  ;;  %v3660_v36 = vmul.f32 %v6781_v31, %v3621_v49  ;;  %v3620_v54 = vadd.f32 %v3533_v11, %v3349_v27  ;;  %v4835_v37 = vpop.f32.mrf.mxu1 }
 0x297   : > { %v4882_v6 = vpop.f32.mrf.mxu0  ;;  %v3354_v15 = vadd.f32 %v4835_v37, %v3082_v29  ;;  %v2817_v16 = vadd.f32 %v7325_v47, %v7324_v58  ;;  %v3086_v10 = vadd.f32 %v7326_v42, %v2818_v60  ;;  %v7327_v37 = vld [vmem:[#allocation29_spill] sm:$0xff] }
 0x298   : > { %3761 = vst.msk [vmem:[%s6807_s21 + $0x88] sm:$0xff] %vm1019_vm2, %v3729_v45  ;;  %v3728_v24 = vmax.f32 %v3696_v2, 0.0  ;;  %v3699_v26 = vadd.f32 %v6791_v52, %v3660_v36  ;;  %v3659_v48 = vmul.f32 %v6781_v31, %v3620_v54  ;;  %v3623_v40 = vadd.f32 %v4882_v6, %v3352_v8  ;;  %v3282_v25 = vpop.f32.mrf.mxu1 }
 0x299   : > { %v3543_v30 = vpop.f32.mrf.mxu0  ;;  %v3353_v59 = vadd.f32 %v3282_v25, %v3081_v5  ;;  %v2820_v55 = vadd.f32 %v7328_v56, %v7327_v37  ;;  %v3085_v3 = vadd.f32 %v7329_v23, %v2817_v16  ;;  %v7330_v25 = vld [vmem:[#allocation32_spill] sm:$0xff] }
 0x29a   : > { %3760 = vst.msk [vmem:[%s6807_s21 + $0x80] sm:$0xff] %vm1019_vm2, %v3728_v24  ;;  %v3731_v62 = vmax.f32 %v3699_v26, 0.0  ;;  %v3698_v39 = vadd.f32 %v6791_v52, %v3659_v48  ;;  %v3662_v18 = vmul.f32 %v6781_v31, %v3623_v40  ;;  %v3622_v12 = vadd.f32 %v3543_v30, %v3351_v20  ;;  %v4838_v34 = vpop.f32.mrf.mxu1 }
 0x29b   : > { %v4885_v44 = vpop.f32.mrf.mxu0  ;;  %v3356_v13 = vadd.f32 %v4838_v34, %v3084_v41  ;;  %v2819_v50 = vadd.f32 %v7331_v7, %v7330_v25  ;;  %v3088_v35 = vadd.f32 %v7332_v33, %v2820_v55  ;;  %v7333_v34 = vld [vmem:[#allocation33_spill] sm:$0xff] }
 0x29c   : > { %3763 = vst.msk [vmem:[%s6807_s21 + $0x98] sm:$0xff] %vm1019_vm2, %v3731_v62  ;;  %v3730_v1 = vmax.f32 %v3698_v39, 0.0  ;;  %v3701_v43 = vadd.f32 %v6791_v52, %v3662_v18  ;;  %v3661_v21 = vmul.f32 %v6781_v31, %v3622_v12  ;;  %v3625_v63 = vadd.f32 %v4885_v44, %v3354_v15  ;;  %v3292_v14 = vpop.f32.mrf.mxu1 }
 0x29d   : > { %v3553_v27 = vpop.f32.mrf.mxu0  ;;  %v3355_v32 = vadd.f32 %v3292_v14, %v3083_v51  ;;  %v2822_v61 = vadd.f32 %v7334_v4, %v7333_v34  ;;  %v3087_v17 = vadd.f32 %v7335_v46, %v2819_v50  ;;  %v7336_v14 = vld [vmem:[#allocation2_spill] sm:$0xff] }
 0x29e   : > { %3762 = vst.msk [vmem:[%s6807_s21 + $0x90] sm:$0xff] %vm1019_vm2, %v3730_v1  ;;  %v3733_v0 = vmax.f32 %v3701_v43, 0.0  ;;  %v3700_v53 = vadd.f32 %v6791_v52, %v3661_v21  ;;  %v3664_v22 = vmul.f32 %v6781_v31, %v3625_v63  ;;  %v3624_v19 = vadd.f32 %v3553_v27, %v3353_v59  ;;  %v4841_v49 = vpop.f32.mrf.mxu1 }
 0x29f   : > { %v4888_v8 = vpop.f32.mrf.mxu0  ;;  %v3358_v29 = vadd.f32 %v4841_v49, %v3086_v10  ;;  %v2821_v9 = vadd.f32 %v7337_v28, %v7336_v14  ;;  %v3090_v60 = vadd.f32 %v6768_v38, %v2822_v61 }
 0x2a0   : > { %3765 = vst.msk [vmem:[%s6807_s21 + $0xa8] sm:$0xff] %vm1019_vm2, %v3733_v0  ;;  %v3732_v11 = vmax.f32 %v3700_v53, 0.0  ;;  %v3703_v45 = vadd.f32 %v6791_v52, %v3664_v22  ;;  %v3663_v2 = vmul.f32 %v6781_v31, %v3624_v19  ;;  %v3627_v36 = vadd.f32 %v4888_v8, %v3356_v13  ;;  %v3302_v54 = vpop.f32.mrf.mxu1  ;;  %v7338_v19 = vld [vmem:[#allocation36_spill] sm:$0xff] }
 0x2a1   : > { %v3563_v20 = vpop.f32.mrf.mxu0  ;;  %v3357_v5 = vadd.f32 %v3302_v54, %v3085_v3  ;;  %v3089_v49 = vadd.f32 %v7338_v19, %v2821_v9 }
 0x2a2   : > { %3764 = vst.msk [vmem:[%s6807_s21 + $0xa0] sm:$0xff] %vm1019_vm2, %v3732_v11  ;;  %v3735_v6 = vmax.f32 %v3703_v45, 0.0  ;;  %v3702_v24 = vadd.f32 %v6791_v52, %v3663_v2  ;;  %v3666_v26 = vmul.f32 %v6781_v31, %v3627_v36  ;;  %v3626_v48 = vadd.f32 %v3563_v20, %v3355_v32  ;;  %v4844_v40 = vpop.f32.mrf.mxu1 }
 0x2a3   : > { %v4891_v15 = vpop.f32.mrf.mxu0  ;;  %v3360_v41 = vadd.f32 %v4844_v40, %v3088_v35 }
 0x2a4   : > { %3767 = vst.msk [vmem:[%s6807_s21 + $0xb8] sm:$0xff] %vm1019_vm2, %v3735_v6  ;;  %v3734_v30 = vmax.f32 %v3702_v24, 0.0  ;;  %v3705_v62 = vadd.f32 %v6791_v52, %v3666_v26  ;;  %v3665_v39 = vmul.f32 %v6781_v31, %v3626_v48  ;;  %v3629_v18 = vadd.f32 %v4891_v15, %v3358_v29  ;;  %v3312_v12 = vpop.f32.mrf.mxu1 }
 0x2a5   : > { %v3573_v59 = vpop.f32.mrf.mxu0  ;;  %v3359_v57 = vadd.f32 %v3312_v12, %v3087_v17 }
 0x2a6   : > { %3766 = vst.msk [vmem:[%s6807_s21 + $0xb0] sm:$0xff] %vm1019_vm2, %v3734_v30  ;;  %v3737_v44 = vmax.f32 %v3705_v62, 0.0  ;;  %v3704_v1 = vadd.f32 %v6791_v52, %v3665_v39  ;;  %v3668_v43 = vmul.f32 %v6781_v31, %v3629_v18  ;;  %v3628_v21 = vadd.f32 %v3573_v59, %v3357_v5  ;;  %v4847_v63 = vpop.f32.mrf.mxu1 }
 0x2a7   : > { %v4894_v51 = vpop.f32.mrf.mxu0  ;;  %v3362_v58 = vadd.f32 %v4847_v63, %v3090_v60 }
 0x2a8   : > { %3769 = vst.msk [vmem:[%s6807_s21 + $0xc8] sm:$0xff] %vm1019_vm2, %v3737_v44  ;;  %v3736_v13 = vmax.f32 %v3704_v1, 0.0  ;;  %v3707_v27 = vadd.f32 %v6791_v52, %v3668_v43  ;;  %v3667_v0 = vmul.f32 %v6781_v31, %v3628_v21  ;;  %v3631_v53 = vadd.f32 %v4894_v51, %v3360_v41  ;;  %v3322_v22 = vpop.f32.mrf.mxu1 }
 0x2a9   : > { %v3583_v47 = vpop.f32.mrf.mxu0  ;;  %v3361_v32 = vadd.f32 %v3322_v22, %v3089_v49 }
 0x2aa   : > { %3768 = vst.msk [vmem:[%s6807_s21 + $0xc0] sm:$0xff] %vm1019_vm2, %v3736_v13  ;;  %v3739_v38 = vmax.f32 %v3707_v27, 0.0  ;;  %v3706_v16 = vadd.f32 %v6791_v52, %v3667_v0  ;;  %v3670_v42 = vmul.f32 %v6781_v31, %v3631_v53  ;;  %v3630_v10 = vadd.f32 %v3583_v47, %v3359_v57 }
 0x2ab   : > { %v4897_v8 = vpop.f32.mrf.mxu0 }
 0x2ac   : > { %3771 = vst.msk [vmem:[%s6807_s21 + $0xd8] sm:$0xff] %vm1019_vm2, %v3739_v38  ;;  %v3738_v11 = vmax.f32 %v3706_v16, 0.0  ;;  %v3709_v45 = vadd.f32 %v6791_v52, %v3670_v42  ;;  %v3669_v2 = vmul.f32 %v6781_v31, %v3630_v10  ;;  %v3633_v36 = vadd.f32 %v4897_v8, %v3362_v58 }
 0x2ad   : > { %v3593_v54 = vpop.f32.mrf.mxu0 }
 0x2ae   : > { %3770 = vst.msk [vmem:[%s6807_s21 + $0xd0] sm:$0xff] %vm1019_vm2, %v3738_v11  ;;  %v3741_v37 = vmax.f32 %v3709_v45, 0.0  ;;  %v3708_v56 = vadd.f32 %v6791_v52, %v3669_v2  ;;  %v3672_v55 = vmul.f32 %v6781_v31, %v3633_v36  ;;  %v3632_v23 = vadd.f32 %v3593_v54, %v3361_v32 }
 0x2b0   : > { %3773 = vst.msk [vmem:[%s6807_s21 + $0xe8] sm:$0xff] %vm1019_vm2, %v3741_v37  ;;  %v3740_v3 = vmax.f32 %v3708_v56, 0.0  ;;  %v3711_v29 = vadd.f32 %v6791_v52, %v3672_v55  ;;  %v3671_v20 = vmul.f32 %v6781_v31, %v3632_v23 }
 0x2b2   : > { %3772 = vst.msk [vmem:[%s6807_s21 + $0xe0] sm:$0xff] %vm1019_vm2, %v3740_v3  ;;  %v3743_v6 = vmax.f32 %v3711_v29, 0.0  ;;  %v3710_v24 = vadd.f32 %v6791_v52, %v3671_v20 }
 0x2b4   : > { %3775 = vst.msk [vmem:[%s6807_s21 + $0xf8] sm:$0xff] %vm1019_vm2, %v3743_v6  ;;  %v3742_v26 = vmax.f32 %v3710_v24, 0.0 }
 0x2b6   : > { %3774 = vst.msk [vmem:[%s6807_s21 + $0xf0] sm:$0xff] %vm1019_vm2, %v3742_v26 }
 0x2b7 PF: > { %s17_s24 = sadd.s32 1, %s4920_s24  }
 0x2b8   : > { %p14_p4 = scmp.ge.s32.totalorder %s17_s24, 4  }
 0x2ba   :  { %16 = sbr.rel (!%p14_p4) target bundleno = 1 (0x1), region = 86 }

</bundles_post_ra>
